<compile_context>
chip_gen: v7x
topology: tpu7x:2x2x1
jax: 0.10.0
libtpu: 0.0.40
codegen_flags: <defaults>
</compile_context>

<pallas_src>
import functools

import jax
import jax.numpy as jnp
import numpy as np
from jax.experimental import pallas as pl
from jax.experimental.pallas import tpu as pltpu


# ----------------------------- Pallas kernel ------------------------------- #

def _mask_block_kernel(x_ref, emb_ref, w1_ref, w2_ref, w3bd_ref, w3p_ref,
                       p_ref, vec_ref, o_ref, *, precision=None):
    """One (tb, Fp) row tile of the fused MaskBlock forward.

    x_ref, emb_ref : (tb, Fp)   Fp = round_up(f*e, 128), zero lane-padded
    w1_ref         : (Fp, Wp)   Wp = round_up(f*e*increase, 128)
    w2_ref         : (Wp, Fp)
    w3bd_ref       : (Fp, Fp)   kron(I_f, w3)            (block-diag Linear)
    w3p_ref        : (Fp, Fp)   w3bd @ p   (per-field mean of the Linear)
    p_ref          : (Fp, Fp)   kron(I_f, ones(e,e)/e)   (segment-mean bcast)
    vec_ref        : (8, Wp)    packed rows: b2, b3, b3p, gamma, beta, b1
    o_ref          : (tb, Fp)
    """
    fp = o_ref.shape[-1]
    b2 = vec_ref[0:1, 0:fp]
    b3 = vec_ref[1:2, 0:fp]
    b3p = vec_ref[2:3, 0:fp]
    gamma = vec_ref[3:4, 0:fp]
    beta = vec_ref[4:5, 0:fp]
    b1 = vec_ref[5:6, :]

    emb = emb_ref[...]
    x = x_ref[...]
    if emb.dtype != w1_ref.dtype:           # e.g. bf16 activations, f32 weights
        emb = emb.astype(w1_ref.dtype)

    # ---- InstanceMask: mask = Linear2(ReLU(Linear1(emb))); gate raw features.
    h = jnp.dot(emb, w1_ref[...], preferred_element_type=jnp.float32,
                precision=precision) + b1
    h = jnp.maximum(h, 0.0)
    mask = jnp.dot(h, w2_ref[...], preferred_element_type=jnp.float32,
                   precision=precision) + b2
    masked = x.astype(jnp.float32) * mask                         # (tb, Fp)

    # ---- Per-field Linear(e,e) as one block-diagonal matmul; its per-field
    # mean is computed directly from `masked` (w3p = w3bd @ p) so the two MXU
    # pushes are independent and can overlap in the pipeline.
    y = jnp.dot(masked, w3bd_ref[...], preferred_element_type=jnp.float32,
                precision=precision) + b3
    mean = jnp.dot(masked, w3p_ref[...], preferred_element_type=jnp.float32,
                   precision=precision) + b3p

    # ---- Per-field LayerNorm (biased variance, eps=1e-5 like torch) + ReLU.
    d = y - mean
    var = jnp.dot(d * d, p_ref[...], preferred_element_type=jnp.float32,
                  precision=precision)
    yn = d * jax.lax.rsqrt(var + 1e-5)
    yn = yn * gamma + beta
    o_ref[...] = jnp.maximum(yn, 0.0).astype(o_ref.dtype)


# ------------------------------- helpers ------------------------------------ #

def _round_up(v, m):
    return (v + m - 1) // m * m


def _default_vmem_limit_bytes():
    """Per-generation scoped-VMEM limit (raise on 128 MiB parts, keep headroom
    under v7x's 64 MiB physical VMEM)."""
    try:
        kind = jax.devices()[0].device_kind.lower()
    except Exception:
        kind = ""
    if "v5" in kind or "v6" in kind:
        return 96 * 1024 * 1024
    if "v2" in kind or "v3" in kind:
        return 16 * 1024 * 1024
    return 48 * 1024 * 1024             # v4 / v7x / unknown: safe everywhere


def init_mask_block_params(key, input_dim, increase, feature_dim):
    """Deterministic synthetic parameters (shapes match the PyTorch module)."""
    wide = input_dim * increase
    ks = jax.random.split(key, 8)
    return {
        # InstanceMask.net: Linear(input_dim, wide) -> ReLU -> Linear(wide, input_dim)
        "w1": jax.random.normal(ks[0], (input_dim, wide), jnp.float32) / np.sqrt(input_dim),
        "b1": 0.1 * jax.random.normal(ks[1], (1, wide), jnp.float32),
        "w2": jax.random.normal(ks[2], (wide, input_dim), jnp.float32) / np.sqrt(wide),
        "b2": 0.1 * jax.random.normal(ks[3], (1, input_dim), jnp.float32),
        # MaskBlock.net: Linear(feature_dim, feature_dim) -> LayerNorm -> ReLU
        "w3": jax.random.normal(ks[4], (feature_dim, feature_dim), jnp.float32) / np.sqrt(feature_dim),
        "b3": 0.1 * jax.random.normal(ks[5], (1, feature_dim), jnp.float32),
        "gamma": 1.0 + 0.1 * jax.random.normal(ks[6], (1, feature_dim), jnp.float32),
        "beta": 0.1 * jax.random.normal(ks[7], (1, feature_dim), jnp.float32),
    }


# ------------------------------- wrapper ------------------------------------ #

def mask_block_forward(x, emb, params, *, tb=1024, min_grid_steps=4,
                       vmem_limit_bytes=None):
    """Fused MaskBlock forward. x, emb: (b, f, e) -> (b, f, e) in x.dtype.

    Pass bf16 x/emb (and bf16 w1/w2/w3 in `params`) to halve HBM traffic and
    double MXU rate; accumulation stays in f32 inside the kernel.
    """
    b, f, e = x.shape
    F = f * e
    W = params["w1"].shape[1]
    Fp = _round_up(F, 128)
    Wp = _round_up(W, 128)
    f32 = jnp.float32
    hi = jax.lax.Precision.HIGHEST

    # ---- Derived lane-dense weights (one-time; constant-folded under jit).
    # Pad rows/cols stay OUTSIDE the kron(I_f, .) block structure -> zero
    # contribution to every per-field LayerNorm statistic.
    eye_f = jnp.eye(f, dtype=f32)
    seg_mean = jnp.full((e, e), 1.0 / e, f32)
    w3 = params["w3"].astype(f32)
    w3_bd = jnp.kron(eye_f, w3)                                  # (F, F) block-diag
    p_mat = jnp.kron(eye_f, seg_mean)                            # (F, F) segment mean
    w3p = jnp.kron(eye_f, jnp.dot(w3, seg_mean, precision=hi))   # == w3_bd @ p_mat
    b3_seg = params["b3"].reshape(1, e).astype(f32)
    b3_full = jnp.tile(b3_seg, (1, f))                           # (1, F)
    b3p_full = jnp.tile(jnp.dot(b3_seg, seg_mean, precision=hi), (1, f))

    def pad2(a, rows, cols):
        r, c = a.shape
        if (r, c) == (rows, cols):
            return a
        return jnp.pad(a, ((0, rows - r), (0, cols - c)))

    w1p = pad2(params["w1"].astype(f32), Fp, Wp)
    w2p = pad2(params["w2"].astype(f32), Wp, Fp)
    w3bdp = pad2(w3_bd, Fp, Fp)
    w3pp = pad2(w3p, Fp, Fp)
    p_p = pad2(p_mat, Fp, Fp)
    # TODO(synk): for large F the (Fp,Fp) kron helpers waste f x FLOPs/VMEM;
    # swap p for a narrow (Fp,f)/(f,Fp) reduce+broadcast pair in that regime.

    # Five bias/affine vectors + b1 packed into one (8, Wp) constant operand
    # (each (1,N) operand would otherwise occupy its own padded VMEM tile).
    vecs = jnp.zeros((8, Wp), f32)
    vecs = vecs.at[0, :F].set(params["b2"].reshape(-1).astype(f32))
    vecs = vecs.at[1, :F].set(b3_full.reshape(-1))
    vecs = vecs.at[2, :F].set(b3p_full.reshape(-1))
    vecs = vecs.at[3, :F].set(jnp.tile(params["gamma"].reshape(-1).astype(f32), f))
    vecs = vecs.at[4, :F].set(jnp.tile(params["beta"].reshape(-1).astype(f32), f))
    vecs = vecs.at[5, :W].set(params["b1"].reshape(-1).astype(f32))

    # ---- Batch tile: >= min_grid_steps grid steps (pipelining + both v7x TCs),
    # capped by the per-generation VMEM budget.
    vmem_limit = int(vmem_limit_bytes or _default_vmem_limit_bytes())
    itemsize = jnp.dtype(x.dtype).itemsize
    weight_bytes = 4 * (2 * Fp * Wp + 3 * Fp * Fp + 8 * Wp)
    per_row = 2 * 3 * Fp * itemsize + 4 * (Wp + 5 * Fp)   # dbl-buffered streams + f32 temps
    avail = vmem_limit - 2 * weight_bytes                 # assume dbl-buffered weights
    tb_cap = max(8, (avail // per_row) // 8 * 8) if avail > per_row * 8 else 8
    tb_eff = max(8, min(tb, _round_up(pl.cdiv(b, min_grid_steps), 8), tb_cap))
    bp = _round_up(b, tb_eff)
    grid = (bp // tb_eff,)

    # One pad op covers both the batch tail and the F->Fp lane pad; skipped
    # entirely when shapes already line up.  No separate upcast copy.
    x_flat = x.reshape(b, F)
    emb_flat = emb.reshape(b, F)
    if bp != b or Fp != F:
        x_flat = jnp.pad(x_flat, ((0, bp - b), (0, Fp - F)))
        emb_flat = jnp.pad(emb_flat, ((0, bp - b), (0, Fp - F)))

    row_spec = pl.BlockSpec((tb_eff, Fp), lambda i: (i, 0))

    def build(single_buffer_weights, precision):
        if single_buffer_weights:
            def const_spec(shape):   # resident weights: constant index_map, 1 buffer
                return pl.BlockSpec(shape, lambda i: (0, 0),
                                    pipeline_mode=pl.Buffered(1))
        else:
            def const_spec(shape):
                return pl.BlockSpec(shape, lambda i: (0, 0))
        return pl.pallas_call(
            functools.partial(_mask_block_kernel, precision=precision),
            out_shape=jax.ShapeDtypeStruct((bp, Fp), x.dtype),
            grid=grid,
            in_specs=[row_spec, row_spec,
                      const_spec((Fp, Wp)), const_spec((Wp, Fp)),
                      const_spec((Fp, Fp)), const_spec((Fp, Fp)),
                      const_spec((Fp, Fp)), const_spec((8, Wp))],
            out_specs=row_spec,
            compiler_params=pltpu.CompilerParams(
                dimension_semantics=("parallel",),
                vmem_limit_bytes=vmem_limit),
        )

    args = (x_flat, emb_flat, w1p, w2p, w3bdp, w3pp, p_p, vecs)
    try:
        out = build(True, jax.lax.Precision.HIGHEST)(*args)
    except Exception:
        # Fallback for JAX versions without pl.Buffered(1) single-buffering or
        # explicit in-kernel matmul precision support.
        out = build(False, None)(*args)

    return out[:b, :F].reshape(b, f, e)


# ---------------------------- NumPy reference -------------------------------- #

def mask_block_reference(x, emb, params):
    """float64 NumPy reference of the PyTorch MaskBlock forward."""
    x = np.asarray(x, np.float64)
    emb = np.asarray(emb, np.float64)
    p = {k: np.asarray(v, np.float64) for k, v in params.items()}
    b, f, e = x.shape
    xf = x.reshape(b, -1)
    ef = emb.reshape(b, -1)
    h = np.maximum(ef @ p["w1"] + p["b1"], 0.0)
    weight = h @ p["w2"] + p["b2"]
    masked = (xf * weight).reshape(b, f, e)
    y = masked @ p["w3"] + p["b3"]
    mean = y.mean(-1, keepdims=True)
    var = ((y - mean) ** 2).mean(-1, keepdims=True)
    yn = (y - mean) / np.sqrt(var + 1e-5)
    yn = yn * p["gamma"] + p["beta"]
    return np.maximum(yn, 0.0)


# --------------------------------- main -------------------------------------- #

if __name__ == "__main__":
    # Shapes consistent with the module: x, emb: (b, f, e);
    # input_dim = f*e, feature_dim = e.
    b, f, e = 128, 4, 16
    increase = 3
    input_dim = f * e        # 64
    feature_dim = e          # 16

    key = jax.random.PRNGKey(0)
    kx, kemb, kparams = jax.random.split(key, 3)
    x = jax.random.normal(kx, (b, f, e), jnp.float32)
    emb = jax.random.normal(kemb, (b, f, e), jnp.float32)
    params = init_mask_block_params(kparams, input_dim, increase, feature_dim)

    # Defaults give a 4-step pipelined "parallel" grid (tb=32) on this small demo.
    out = jax.block_until_ready(mask_block_forward(x, emb, params))

    ref = mask_block_reference(x, emb, params)
    # Tolerance covers MXU multi-pass f32 matmul rounding vs. the float64 reference.
    np.testing.assert_allclose(np.asarray(out), ref, rtol=2e-3, atol=2e-3)
    assert out.shape == (b, f, e)
    print("KERNEL_OK")
</pallas_src>

<mosaic_0001>
module attributes {stable_mosaic.version = 11 : i64} {
  func.func @_mask_block_kernel(%arg0: i32, %arg1: memref<32x128xf32, #tpu.memory_space<vmem>>, %arg2: memref<32x128xf32, #tpu.memory_space<vmem>>, %arg3: memref<128x256xf32, #tpu.memory_space<vmem>>, %arg4: memref<256x128xf32, #tpu.memory_space<vmem>>, %arg5: memref<128x128xf32, #tpu.memory_space<vmem>>, %arg6: memref<128x128xf32, #tpu.memory_space<vmem>>, %arg7: memref<128x128xf32, #tpu.memory_space<vmem>>, %arg8: memref<8x256xf32, #tpu.memory_space<vmem>>, %arg9: memref<32x128xf32, #tpu.memory_space<vmem>>) attributes {dimension_semantics = [#tpu.dimension_semantics<parallel>], iteration_bounds = array<i64: 4>, scalar_prefetch = 0 : i64, scratch_operands = 0 : i64, tpu.core_type = #tpu.core_type<tc>, window_params = [{transform_indices = @transform_0, window_bounds = array<i64: 32, 128>}, {transform_indices = @transform_1, window_bounds = array<i64: 32, 128>}, {pipeline_mode = #tpu.pipeline_mode<synchronous>, transform_indices = @transform_2, window_bounds = array<i64: 128, 256>}, {pipeline_mode = #tpu.pipeline_mode<synchronous>, transform_indices = @transform_3, window_bounds = array<i64: 256, 128>}, {pipeline_mode = #tpu.pipeline_mode<synchronous>, transform_indices = @transform_4, window_bounds = array<i64: 128, 128>}, {pipeline_mode = #tpu.pipeline_mode<synchronous>, transform_indices = @transform_5, window_bounds = array<i64: 128, 128>}, {pipeline_mode = #tpu.pipeline_mode<synchronous>, transform_indices = @transform_6, window_bounds = array<i64: 128, 128>}, {pipeline_mode = #tpu.pipeline_mode<synchronous>, transform_indices = @transform_7, window_bounds = array<i64: 8, 256>}, {transform_indices = @transform_8, window_bounds = array<i64: 32, 128>}]} {
    %c0 = arith.constant 0 : index
    %c0_0 = arith.constant 0 : index
    %0 = vector.load %arg8[%c0, %c0_0] : memref<8x256xf32, #tpu.memory_space<vmem>>, vector<1x128xf32>
    %c1 = arith.constant 1 : index
    %c0_1 = arith.constant 0 : index
    %1 = vector.load %arg8[%c1, %c0_1] : memref<8x256xf32, #tpu.memory_space<vmem>>, vector<1x128xf32>
    %c2 = arith.constant 2 : index
    %c0_2 = arith.constant 0 : index
    %2 = vector.load %arg8[%c2, %c0_2] : memref<8x256xf32, #tpu.memory_space<vmem>>, vector<1x128xf32>
    %c3 = arith.constant 3 : index
    %c0_3 = arith.constant 0 : index
    %3 = vector.load %arg8[%c3, %c0_3] : memref<8x256xf32, #tpu.memory_space<vmem>>, vector<1x128xf32>
    %c4 = arith.constant 4 : index
    %c0_4 = arith.constant 0 : index
    %4 = vector.load %arg8[%c4, %c0_4] : memref<8x256xf32, #tpu.memory_space<vmem>>, vector<1x128xf32>
    %c5 = arith.constant 5 : index
    %c0_5 = arith.constant 0 : index
    %5 = vector.load %arg8[%c5, %c0_5] : memref<8x256xf32, #tpu.memory_space<vmem>>, vector<1x256xf32>
    %c0_6 = arith.constant 0 : index
    %c0_7 = arith.constant 0 : index
    %6 = vector.load %arg2[%c0_6, %c0_7] : memref<32x128xf32, #tpu.memory_space<vmem>>, vector<32x128xf32>
    %c0_8 = arith.constant 0 : index
    %c0_9 = arith.constant 0 : index
    %7 = vector.load %arg1[%c0_8, %c0_9] : memref<32x128xf32, #tpu.memory_space<vmem>>, vector<32x128xf32>
    %c0_10 = arith.constant 0 : index
    %c0_11 = arith.constant 0 : index
    %8 = vector.load %arg3[%c0_10, %c0_11] : memref<128x256xf32, #tpu.memory_space<vmem>>, vector<128x256xf32>
    %cst = arith.constant dense<0.000000e+00> : vector<32x256xf32>
    %9 = tpu.matmul %6, %8, %cst {dimension_numbers = #tpu.dot_dimension_numbers<[1], [0], [0], [1], [0, 0, 1, 1], [], []>, precision = #tpu.contract_precision<fp32>} : vector<32x128xf32>, vector<128x256xf32>, vector<32x256xf32> -> vector<32x256xf32>
    %10 = vector.broadcast %5 : vector<1x256xf32> to vector<32x256xf32>
    %11 = arith.addf %9, %10 : vector<32x256xf32>
    %cst_12 = arith.constant 0.000000e+00 : f32
    %12 = vector.broadcast %cst_12 : f32 to vector<32x256xf32>
    %13 = arith.maximumf %11, %12 : vector<32x256xf32>
    %c0_13 = arith.constant 0 : index
    %c0_14 = arith.constant 0 : index
    %14 = vector.load %arg4[%c0_13, %c0_14] : memref<256x128xf32, #tpu.memory_space<vmem>>, vector<256x128xf32>
    %cst_15 = arith.constant dense<0.000000e+00> : vector<32x128xf32>
    %15 = tpu.matmul %13, %14, %cst_15 {dimension_numbers = #tpu.dot_dimension_numbers<[1], [0], [0], [1], [0, 0, 1, 1], [], []>, precision = #tpu.contract_precision<fp32>} : vector<32x256xf32>, vector<256x128xf32>, vector<32x128xf32> -> vector<32x128xf32>
    %16 = vector.broadcast %0 : vector<1x128xf32> to vector<32x128xf32>
    %17 = arith.addf %15, %16 : vector<32x128xf32>
    %18 = arith.mulf %7, %17 : vector<32x128xf32>
    %c0_16 = arith.constant 0 : index
    %c0_17 = arith.constant 0 : index
    %19 = vector.load %arg5[%c0_16, %c0_17] : memref<128x128xf32, #tpu.memory_space<vmem>>, vector<128x128xf32>
    %cst_18 = arith.constant dense<0.000000e+00> : vector<32x128xf32>
    %20 = tpu.matmul %18, %19, %cst_18 {dimension_numbers = #tpu.dot_dimension_numbers<[1], [0], [0], [1], [0, 0, 1, 1], [], []>, precision = #tpu.contract_precision<fp32>} : vector<32x128xf32>, vector<128x128xf32>, vector<32x128xf32> -> vector<32x128xf32>
    %21 = vector.broadcast %1 : vector<1x128xf32> to vector<32x128xf32>
    %22 = arith.addf %20, %21 : vector<32x128xf32>
    %c0_19 = arith.constant 0 : index
    %c0_20 = arith.constant 0 : index
    %23 = vector.load %arg6[%c0_19, %c0_20] : memref<128x128xf32, #tpu.memory_space<vmem>>, vector<128x128xf32>
    %cst_21 = arith.constant dense<0.000000e+00> : vector<32x128xf32>
    %24 = tpu.matmul %18, %23, %cst_21 {dimension_numbers = #tpu.dot_dimension_numbers<[1], [0], [0], [1], [0, 0, 1, 1], [], []>, precision = #tpu.contract_precision<fp32>} : vector<32x128xf32>, vector<128x128xf32>, vector<32x128xf32> -> vector<32x128xf32>
    %25 = vector.broadcast %2 : vector<1x128xf32> to vector<32x128xf32>
    %26 = arith.addf %24, %25 : vector<32x128xf32>
    %27 = arith.subf %22, %26 : vector<32x128xf32>
    %28 = arith.mulf %27, %27 : vector<32x128xf32>
    %c0_22 = arith.constant 0 : index
    %c0_23 = arith.constant 0 : index
    %29 = vector.load %arg7[%c0_22, %c0_23] : memref<128x128xf32, #tpu.memory_space<vmem>>, vector<128x128xf32>
    %cst_24 = arith.constant dense<0.000000e+00> : vector<32x128xf32>
    %30 = tpu.matmul %28, %29, %cst_24 {dimension_numbers = #tpu.dot_dimension_numbers<[1], [0], [0], [1], [0, 0, 1, 1], [], []>, precision = #tpu.contract_precision<fp32>} : vector<32x128xf32>, vector<128x128xf32>, vector<32x128xf32> -> vector<32x128xf32>
    %cst_25 = arith.constant 9.99999974E-6 : f32
    %31 = vector.broadcast %cst_25 : f32 to vector<32x128xf32>
    %32 = arith.addf %30, %31 : vector<32x128xf32>
    %33 = math.rsqrt %32 : vector<32x128xf32>
    %34 = arith.mulf %27, %33 : vector<32x128xf32>
    %35 = vector.broadcast %3 : vector<1x128xf32> to vector<32x128xf32>
    %36 = arith.mulf %34, %35 : vector<32x128xf32>
    %37 = vector.broadcast %4 : vector<1x128xf32> to vector<32x128xf32>
    %38 = arith.addf %36, %37 : vector<32x128xf32>
    %cst_26 = arith.constant 0.000000e+00 : f32
    %39 = vector.broadcast %cst_26 : f32 to vector<32x128xf32>
    %40 = arith.maximumf %38, %39 : vector<32x128xf32>
    %c0_27 = arith.constant 0 : index
    %c0_28 = arith.constant 0 : index
    %41 = vector.load %arg9[%c0_27, %c0_28] : memref<32x128xf32, #tpu.memory_space<vmem>>, vector<32x128xf32>
    tpu.vector_store %arg9[%c0_27, %c0_28], %40 {strides = array<i32>} : memref<32x128xf32, #tpu.memory_space<vmem>>, vector<32x128xf32>,
    return
  }
  func.func @transform_0(%arg0: i32) -> (i32, i32) {
    %c0_i32 = arith.constant 0 : i32
    %c0_i32_0 = arith.constant 0 : i32
    return %arg0, %c0_i32 : i32, i32
  }
  func.func @transform_1(%arg0: i32) -> (i32, i32) {
    %c0_i32 = arith.constant 0 : i32
    %c0_i32_0 = arith.constant 0 : i32
    return %arg0, %c0_i32 : i32, i32
  }
  func.func @transform_2(%arg0: i32) -> (i32, i32) {
    %c0_i32 = arith.constant 0 : i32
    %c0_i32_0 = arith.constant 0 : i32
    %c0_i32_1 = arith.constant 0 : i32
    return %c0_i32, %c0_i32_0 : i32, i32
  }
  func.func @transform_3(%arg0: i32) -> (i32, i32) {
    %c0_i32 = arith.constant 0 : i32
    %c0_i32_0 = arith.constant 0 : i32
    %c0_i32_1 = arith.constant 0 : i32
    return %c0_i32, %c0_i32_0 : i32, i32
  }
  func.func @transform_4(%arg0: i32) -> (i32, i32) {
    %c0_i32 = arith.constant 0 : i32
    %c0_i32_0 = arith.constant 0 : i32
    %c0_i32_1 = arith.constant 0 : i32
    return %c0_i32, %c0_i32_0 : i32, i32
  }
  func.func @transform_5(%arg0: i32) -> (i32, i32) {
    %c0_i32 = arith.constant 0 : i32
    %c0_i32_0 = arith.constant 0 : i32
    %c0_i32_1 = arith.constant 0 : i32
    return %c0_i32, %c0_i32_0 : i32, i32
  }
  func.func @transform_6(%arg0: i32) -> (i32, i32) {
    %c0_i32 = arith.constant 0 : i32
    %c0_i32_0 = arith.constant 0 : i32
    %c0_i32_1 = arith.constant 0 : i32
    return %c0_i32, %c0_i32_0 : i32, i32
  }
  func.func @transform_7(%arg0: i32) -> (i32, i32) {
    %c0_i32 = arith.constant 0 : i32
    %c0_i32_0 = arith.constant 0 : i32
    %c0_i32_1 = arith.constant 0 : i32
    return %c0_i32, %c0_i32_0 : i32, i32
  }
  func.func @transform_8(%arg0: i32) -> (i32, i32) {
    %c0_i32 = arith.constant 0 : i32
    %c0_i32_0 = arith.constant 0 : i32
    return %arg0, %c0_i32 : i32, i32
  }
}

module attributes {stable_mosaic.version = 11 : i64} {
  func.func @_mask_block_kernel(%arg0: i32, %arg1: memref<32x128xf32, #tpu.memory_space<vmem>>, %arg2: memref<32x128xf32, #tpu.memory_space<vmem>>, %arg3: memref<128x256xf32, #tpu.memory_space<vmem>>, %arg4: memref<256x128xf32, #tpu.memory_space<vmem>>, %arg5: memref<128x128xf32, #tpu.memory_space<vmem>>, %arg6: memref<128x128xf32, #tpu.memory_space<vmem>>, %arg7: memref<128x128xf32, #tpu.memory_space<vmem>>, %arg8: memref<8x256xf32, #tpu.memory_space<vmem>>, %arg9: memref<32x128xf32, #tpu.memory_space<vmem>>) attributes {dimension_semantics = [#tpu.dimension_semantics<parallel>], iteration_bounds = array<i64: 4>, scalar_prefetch = 0 : i64, scratch_operands = 0 : i64, tpu.core_type = #tpu.core_type<tc>, window_params = [{transform_indices = @transform_0, window_bounds = array<i64: 32, 128>}, {transform_indices = @transform_1, window_bounds = array<i64: 32, 128>}, {pipeline_mode = #tpu.pipeline_mode<synchronous>, transform_indices = @transform_2, window_bounds = array<i64: 128, 256>}, {pipeline_mode = #tpu.pipeline_mode<synchronous>, transform_indices = @transform_3, window_bounds = array<i64: 256, 128>}, {pipeline_mode = #tpu.pipeline_mode<synchronous>, transform_indices = @transform_4, window_bounds = array<i64: 128, 128>}, {pipeline_mode = #tpu.pipeline_mode<synchronous>, transform_indices = @transform_5, window_bounds = array<i64: 128, 128>}, {pipeline_mode = #tpu.pipeline_mode<synchronous>, transform_indices = @transform_6, window_bounds = array<i64: 128, 128>}, {pipeline_mode = #tpu.pipeline_mode<synchronous>, transform_indices = @transform_7, window_bounds = array<i64: 8, 256>}, {transform_indices = @transform_8, window_bounds = array<i64: 32, 128>}]} {
    %c0 = arith.constant 0 : index
    %c0_0 = arith.constant 0 : index
    %0 = vector.load %arg8[%c0, %c0_0] : memref<8x256xf32, #tpu.memory_space<vmem>>, vector<1x128xf32>
    %c1 = arith.constant 1 : index
    %c0_1 = arith.constant 0 : index
    %1 = vector.load %arg8[%c1, %c0_1] : memref<8x256xf32, #tpu.memory_space<vmem>>, vector<1x128xf32>
    %c2 = arith.constant 2 : index
    %c0_2 = arith.constant 0 : index
    %2 = vector.load %arg8[%c2, %c0_2] : memref<8x256xf32, #tpu.memory_space<vmem>>, vector<1x128xf32>
    %c3 = arith.constant 3 : index
    %c0_3 = arith.constant 0 : index
    %3 = vector.load %arg8[%c3, %c0_3] : memref<8x256xf32, #tpu.memory_space<vmem>>, vector<1x128xf32>
    %c4 = arith.constant 4 : index
    %c0_4 = arith.constant 0 : index
    %4 = vector.load %arg8[%c4, %c0_4] : memref<8x256xf32, #tpu.memory_space<vmem>>, vector<1x128xf32>
    %c5 = arith.constant 5 : index
    %c0_5 = arith.constant 0 : index
    %5 = vector.load %arg8[%c5, %c0_5] : memref<8x256xf32, #tpu.memory_space<vmem>>, vector<1x256xf32>
    %c0_6 = arith.constant 0 : index
    %c0_7 = arith.constant 0 : index
    %6 = vector.load %arg2[%c0_6, %c0_7] : memref<32x128xf32, #tpu.memory_space<vmem>>, vector<32x128xf32>
    %c0_8 = arith.constant 0 : index
    %c0_9 = arith.constant 0 : index
    %7 = vector.load %arg1[%c0_8, %c0_9] : memref<32x128xf32, #tpu.memory_space<vmem>>, vector<32x128xf32>
    %c0_10 = arith.constant 0 : index
    %c0_11 = arith.constant 0 : index
    %8 = vector.load %arg3[%c0_10, %c0_11] : memref<128x256xf32, #tpu.memory_space<vmem>>, vector<128x256xf32>
    %cst = arith.constant dense<0.000000e+00> : vector<32x256xf32>
    %9 = tpu.matmul %6, %8, %cst {dimension_numbers = #tpu.dot_dimension_numbers<[1], [0], [0], [1], [0, 0, 1, 1], [], []>} : vector<32x128xf32>, vector<128x256xf32>, vector<32x256xf32> -> vector<32x256xf32>
    %10 = vector.broadcast %5 : vector<1x256xf32> to vector<32x256xf32>
    %11 = arith.addf %9, %10 : vector<32x256xf32>
    %cst_12 = arith.constant 0.000000e+00 : f32
    %12 = vector.broadcast %cst_12 : f32 to vector<32x256xf32>
    %13 = arith.maximumf %11, %12 : vector<32x256xf32>
    %c0_13 = arith.constant 0 : index
    %c0_14 = arith.constant 0 : index
    %14 = vector.load %arg4[%c0_13, %c0_14] : memref<256x128xf32, #tpu.memory_space<vmem>>, vector<256x128xf32>
    %cst_15 = arith.constant dense<0.000000e+00> : vector<32x128xf32>
    %15 = tpu.matmul %13, %14, %cst_15 {dimension_numbers = #tpu.dot_dimension_numbers<[1], [0], [0], [1], [0, 0, 1, 1], [], []>} : vector<32x256xf32>, vector<256x128xf32>, vector<32x128xf32> -> vector<32x128xf32>
    %16 = vector.broadcast %0 : vector<1x128xf32> to vector<32x128xf32>
    %17 = arith.addf %15, %16 : vector<32x128xf32>
    %18 = arith.mulf %7, %17 : vector<32x128xf32>
    %c0_16 = arith.constant 0 : index
    %c0_17 = arith.constant 0 : index
    %19 = vector.load %arg5[%c0_16, %c0_17] : memref<128x128xf32, #tpu.memory_space<vmem>>, vector<128x128xf32>
    %cst_18 = arith.constant dense<0.000000e+00> : vector<32x128xf32>
    %20 = tpu.matmul %18, %19, %cst_18 {dimension_numbers = #tpu.dot_dimension_numbers<[1], [0], [0], [1], [0, 0, 1, 1], [], []>} : vector<32x128xf32>, vector<128x128xf32>, vector<32x128xf32> -> vector<32x128xf32>
    %21 = vector.broadcast %1 : vector<1x128xf32> to vector<32x128xf32>
    %22 = arith.addf %20, %21 : vector<32x128xf32>
    %c0_19 = arith.constant 0 : index
    %c0_20 = arith.constant 0 : index
    %23 = vector.load %arg6[%c0_19, %c0_20] : memref<128x128xf32, #tpu.memory_space<vmem>>, vector<128x128xf32>
    %cst_21 = arith.constant dense<0.000000e+00> : vector<32x128xf32>
    %24 = tpu.matmul %18, %23, %cst_21 {dimension_numbers = #tpu.dot_dimension_numbers<[1], [0], [0], [1], [0, 0, 1, 1], [], []>} : vector<32x128xf32>, vector<128x128xf32>, vector<32x128xf32> -> vector<32x128xf32>
    %25 = vector.broadcast %2 : vector<1x128xf32> to vector<32x128xf32>
    %26 = arith.addf %24, %25 : vector<32x128xf32>
    %27 = arith.subf %22, %26 : vector<32x128xf32>
    %28 = arith.mulf %27, %27 : vector<32x128xf32>
    %c0_22 = arith.constant 0 : index
    %c0_23 = arith.constant 0 : index
    %29 = vector.load %arg7[%c0_22, %c0_23] : memref<128x128xf32, #tpu.memory_space<vmem>>, vector<128x128xf32>
    %cst_24 = arith.constant dense<0.000000e+00> : vector<32x128xf32>
    %30 = tpu.matmul %28, %29, %cst_24 {dimension_numbers = #tpu.dot_dimension_numbers<[1], [0], [0], [1], [0, 0, 1, 1], [], []>} : vector<32x128xf32>, vector<128x128xf32>, vector<32x128xf32> -> vector<32x128xf32>
    %cst_25 = arith.constant 9.99999974E-6 : f32
    %31 = vector.broadcast %cst_25 : f32 to vector<32x128xf32>
    %32 = arith.addf %30, %31 : vector<32x128xf32>
    %33 = math.rsqrt %32 : vector<32x128xf32>
    %34 = arith.mulf %27, %33 : vector<32x128xf32>
    %35 = vector.broadcast %3 : vector<1x128xf32> to vector<32x128xf32>
    %36 = arith.mulf %34, %35 : vector<32x128xf32>
    %37 = vector.broadcast %4 : vector<1x128xf32> to vector<32x128xf32>
    %38 = arith.addf %36, %37 : vector<32x128xf32>
    %cst_26 = arith.constant 0.000000e+00 : f32
    %39 = vector.broadcast %cst_26 : f32 to vector<32x128xf32>
    %40 = arith.maximumf %38, %39 : vector<32x128xf32>
    %c0_27 = arith.constant 0 : index
    %c0_28 = arith.constant 0 : index
    %41 = vector.load %arg9[%c0_27, %c0_28] : memref<32x128xf32, #tpu.memory_space<vmem>>, vector<32x128xf32>
    tpu.vector_store %arg9[%c0_27, %c0_28], %40 {strides = array<i32>} : memref<32x128xf32, #tpu.memory_space<vmem>>, vector<32x128xf32>,
    return
  }
  func.func @transform_0(%arg0: i32) -> (i32, i32) {
    %c0_i32 = arith.constant 0 : i32
    %c0_i32_0 = arith.constant 0 : i32
    return %arg0, %c0_i32 : i32, i32
  }
  func.func @transform_1(%arg0: i32) -> (i32, i32) {
    %c0_i32 = arith.constant 0 : i32
    %c0_i32_0 = arith.constant 0 : i32
    return %arg0, %c0_i32 : i32, i32
  }
  func.func @transform_2(%arg0: i32) -> (i32, i32) {
    %c0_i32 = arith.constant 0 : i32
    %c0_i32_0 = arith.constant 0 : i32
    %c0_i32_1 = arith.constant 0 : i32
    return %c0_i32, %c0_i32_0 : i32, i32
  }
  func.func @transform_3(%arg0: i32) -> (i32, i32) {
    %c0_i32 = arith.constant 0 : i32
    %c0_i32_0 = arith.constant 0 : i32
    %c0_i32_1 = arith.constant 0 : i32
    return %c0_i32, %c0_i32_0 : i32, i32
  }
  func.func @transform_4(%arg0: i32) -> (i32, i32) {
    %c0_i32 = arith.constant 0 : i32
    %c0_i32_0 = arith.constant 0 : i32
    %c0_i32_1 = arith.constant 0 : i32
    return %c0_i32, %c0_i32_0 : i32, i32
  }
  func.func @transform_5(%arg0: i32) -> (i32, i32) {
    %c0_i32 = arith.constant 0 : i32
    %c0_i32_0 = arith.constant 0 : i32
    %c0_i32_1 = arith.constant 0 : i32
    return %c0_i32, %c0_i32_0 : i32, i32
  }
  func.func @transform_6(%arg0: i32) -> (i32, i32) {
    %c0_i32 = arith.constant 0 : i32
    %c0_i32_0 = arith.constant 0 : i32
    %c0_i32_1 = arith.constant 0 : i32
    return %c0_i32, %c0_i32_0 : i32, i32
  }
  func.func @transform_7(%arg0: i32) -> (i32, i32) {
    %c0_i32 = arith.constant 0 : i32
    %c0_i32_0 = arith.constant 0 : i32
    %c0_i32_1 = arith.constant 0 : i32
    return %c0_i32, %c0_i32_0 : i32, i32
  }
  func.func @transform_8(%arg0: i32) -> (i32, i32) {
    %c0_i32 = arith.constant 0 : i32
    %c0_i32_0 = arith.constant 0 : i32
    return %arg0, %c0_i32 : i32, i32
  }
}

</mosaic_0001>

<bundles_post_ra>
// kernel: tpu_custom_call.1
= control target key start
LH: loop header
LB: loop body
LE: loop exit
PB: predicated region body
PF: predicated region fallthrough
CT: control target
= control target key end

     0   :  { %s10709_s0 = inlined_call_operand.hbm [shape: f32[128,128], index: 0, kind: input, shape index: {}]   ;;  %s10710_s1 = inlined_call_operand.hbm [shape: f32[128,128], index: 1, kind: input, shape index: {}]   ;;  %s10711_s2 = inlined_call_operand.hbm [shape: f32[128,256], index: 2, kind: input, shape index: {}]   ;;  %s10712_s3 = inlined_call_operand.hbm [shape: f32[256,128], index: 3, kind: input, shape index: {}]   ;;  %s10713_s4 = inlined_call_operand.hbm [shape: f32[128,128], index: 4, kind: input, shape index: {}]   ;;  %s10714_s5 = inlined_call_operand.hbm [shape: f32[128,128], index: 5, kind: input, shape index: {}]   ;;  %s10715_s6 = inlined_call_operand.hbm [shape: f32[128,128], index: 6, kind: input, shape index: {}]   ;;  %s10716_s7 = inlined_call_operand.vmem [shape: f32[8,256], index: 7, kind: input, shape index: {}]   ;;  %s10717_s8 = inlined_call_operand.hbm [shape: f32[128,128], index: 8, kind: output, shape index: {}]  }
   0x1   :  { %10987 = sst [smem:[#allocation62_spill]] %s10709_s0 }
   0x2   :  { %10988 = sst [smem:[#allocation63_spill]] %s10711_s2 }
   0x3   :  { %10989 = sst [smem:[#allocation64_spill]] %s10712_s3 }
   0x4   :  { %10990 = sst [smem:[#allocation65_spill]] %s10713_s4 }
   0x5   :  { %10991 = sst [smem:[#allocation66_spill]] %s10714_s5 }
   0x6   :  { %10992 = sst [smem:[#allocation67_spill]] %s10715_s6 }
   0x7   :  { %13 = vsyncpa [#allocation3], 0 }
   0x8   :  { %15 = vsyncpa [#allocation3 + $0x1], 0 }
   0x9   :  { %16 = vsyncpa [#allocation6], 0 }
   0xa   :  { %18 = vsyncpa [#allocation6 + $0x1], 0 }
   0xb   :  { %19 = vsyncpa [#allocation9], 0 }
   0xc   :  { %20 = vsyncpa [#allocation12], 0 }
   0xd   :  { %21 = vsyncpa [#allocation4], 0 }
   0xe   :  { %23 = vsyncpa [#allocation4 + $0x1], 0  ;;  %s8001_s27 = smov 0   ;;  %s8003_s28 = smov 0  }
   0xf   :  { %s8005_s29 = smov 0   ;;  %s8007_s30 = smov 0  }
  0x10 LB: > { %s7941_s9 = smov [#allocation7]   ;;  %s8022_s11 = sadd.s32 4294967295, %s7939_s30   ;;  %s7939_s30 = sphi %s8007_s30, %s11367_s30   ;;  %s7935_s29 = sphi %s8005_s29, %s11366_s29   ;;  %s7931_s28 = sphi %s8003_s28, %s11365_s28   ;;  %s7927_s27 = sphi %s8001_s27, %s11364_s27  }
  0x11   : > { %s250_s10 = sshll.u32 %s7941_s9, 4  ;;  %p5121_p0 = scmp.ge.s32.totalorder %s7939_s30, 1  ;;  %s8027_s10 = int_to_ptr.vmem [resolvable:$true] %s250_s10 }
  0x12   : > { %p10718_p1 = scmp.eq.s32.totalorder %s8022_s11, 0  ;;  %p238_p2 = scmp.lt.s32.totalorder %s7939_s30, 5 }
  0x13   : > { %s7942_s13 = smov [#allocation8]   ;;  %s7943_s16 = smov [#allocation11]  }
  0x14   : > { %p8029_p3 = pnand %p5121_p0, %p238_p2  ;;  %s263_s14 = sshll.u32 %s7942_s13, 4  ;;  %s8041_s14 = int_to_ptr.vmem [resolvable:$true] %s263_s14 }
  0x15   : > { %s8043_s17 = sshll.u32 %s7943_s16, 4  ;;  %s10995_s2 = sld [smem:[#allocation63_spill]]  ;;  %s290_s17 = int_to_ptr.vmem [resolvable:$true] %s8043_s17 }
  0x16   : > { %s10993_s12 = scalar_select %p8029_p3, 1, 0 }
  0x17   : > { %p7566_p4 = pneg %p8029_p3 }
  0x19   : > { %p8037_p5 = pnand %p7566_p4, %p10718_p1 }
  0x1b   : > { %s7657_s20 = scalar_lea.hbm %s10995_s2, 4096  ;;  %p8053_p7 = pneg %p8037_p5 }
  0x1c   : > { %p7658_p6 = scmp.ne.s32.totalorder %s10995_s2, %s7657_s20  ;;  %p7664_p10 = scmp.lt.u32.totalorder %s7657_s20, %s10995_s2 }
  0x1e   : > { %p7660_p8 = pnand %p8053_p7, %p7658_p6 }
  0x20   : > { %p7661_p9 = pneg %p7660_p8 }
  0x22   : > { %p7666_p11 = pnand %p7664_p10, %p7661_p9 }
  0x24   : > { %7669 = shalt.err (!%p7666_p11)
}
  0x25   : > { %s7670_s26 = scalar_lea.vmem %s8027_s10, 4096  ;;  %p7678_p2 = scmp.lt.s32.totalorder %s8027_s10, %s8027_s10 }
  0x26   : > { %p7671_p12 = scmp.ne.s32.totalorder %s8027_s10, %s7670_s26  ;;  %p7679_p4 = scmp.lt.s32.totalorder %s7670_s26, %s7670_s26 }
  0x28   : > { %p7673_p13 = pnand %p7671_p12, %p8053_p7  ;;  %p7680_p6 = por %p7679_p4, %p7678_p2 }
  0x2a   : > { %p7674_p0 = pneg %p7673_p13 }
  0x2c   : > { %p7681_p8 = pnand %p7680_p6, %p7674_p0 }
  0x2e   : > { %7684 = shalt.err (!%p7681_p8)
}
  0x2f   : > { %s7944_s9 = smov 256   ;;  %s7945_s13 = smov 16  }
  0x30   : > { %7569 = dma.hbm_to_vmem [thread:$0]  (!%p8037_p5), %s10995_s2, 4096, %s8027_s10, [#allocation6], %s7944_s9, %s7944_s9, %s7945_s13  }
  0x31   : > { %s10997_s3 = sld [smem:[#allocation64_spill]] }
  0x37   : > { %s7685_s21 = scalar_lea.hbm %s10997_s3, 4096 }
  0x38   : > { %p7686_p9 = scmp.ne.s32.totalorder %s10997_s3, %s7685_s21  ;;  %p7692_p12 = scmp.lt.u32.totalorder %s7685_s21, %s10997_s3 }
  0x3a   : > { %p7688_p10 = pnand %p7686_p9, %p8053_p7 }
  0x3c   : > { %p7689_p11 = pneg %p7688_p10 }
  0x3e   : > { %p7694_p13 = pnand %p7692_p12, %p7689_p11 }
  0x40   : > { %7697 = shalt.err (!%p7694_p13)
}
  0x41   : > { %s7698_s10 = scalar_lea.vmem %s8041_s14, 4096  ;;  %p7706_p6 = scmp.lt.s32.totalorder %s8041_s14, %s8041_s14 }
  0x42   : > { %p7699_p0 = scmp.ne.s32.totalorder %s8041_s14, %s7698_s10  ;;  %p7707_p8 = scmp.lt.s32.totalorder %s7698_s10, %s7698_s10 }
  0x44   : > { %p7701_p2 = pnand %p7699_p0, %p8053_p7  ;;  %p7708_p9 = por %p7707_p8, %p7706_p6 }
  0x46   : > { %p7702_p4 = pneg %p7701_p2 }
  0x48   : > { %p7709_p10 = pnand %p7708_p9, %p7702_p4 }
  0x4a   : > { %7712 = shalt.err (!%p7709_p10)
}
  0x4b   : > { %s10720_s9 = smov 128   ;;  %s10722_s13 = smov 8  }
  0x4c   : > { %7572 = dma.hbm_to_vmem [thread:$0]  (!%p8037_p5), %s10997_s3, 4096, %s8041_s14, [#allocation9], %s10720_s9, %s10720_s9, %s10722_s13  }
  0x4d   : > { %s10998_s5 = sld [smem:[#allocation66_spill]] }
  0x53   : > { %s7713_s21 = scalar_lea.hbm %s10998_s5, 2048 }
  0x54   : > { %p7714_p11 = scmp.ne.s32.totalorder %s10998_s5, %s7713_s21  ;;  %p7720_p0 = scmp.lt.u32.totalorder %s7713_s21, %s10998_s5 }
  0x56   : > { %p7716_p12 = pnand %p7714_p11, %p8053_p7 }
  0x58   : > { %p7717_p13 = pneg %p7716_p12 }
  0x5a   : > { %p7722_p2 = pnand %p7720_p0, %p7717_p13 }
  0x5c   : > { %7725 = shalt.err (!%p7722_p2)
}
  0x5d   : > { %s7726_s10 = scalar_lea.vmem %s290_s17, 2048  ;;  %p7734_p9 = scmp.lt.s32.totalorder %s290_s17, %s290_s17 }
  0x5e   : > { %p7727_p4 = scmp.ne.s32.totalorder %s290_s17, %s7726_s10  ;;  %p7735_p10 = scmp.lt.s32.totalorder %s7726_s10, %s7726_s10 }
  0x60   : > { %p7729_p6 = pnand %p7727_p4, %p8053_p7  ;;  %p7736_p1 = por %p7735_p10, %p7734_p9 }
  0x62   : > { %p7730_p8 = pneg %p7729_p6 }
  0x64   : > { %p7737_p3 = pnand %p7736_p1, %p7730_p8 }
  0x66   : > { %7740 = shalt.err (!%p7737_p3)
}
  0x67   : > { %7578 = dma.hbm_to_vmem [thread:$0]  (!%p8037_p5), %s10998_s5, 2048, %s290_s17, [#allocation12], %s10720_s9, %s10720_s9, %s10722_s13  }
  0x68   : > { %s7948_s18 = smov [#allocation10]   ;;  %s7949_s20 = smov [#allocation13]  }
  0x69   : > { %s276_s19 = sshll.u32 %s7948_s18, 4  ;;  %s302_s21 = sshll.u32 %s7949_s20, 4  ;;  %s277_s19 = int_to_ptr.vmem [resolvable:$true] %s276_s19  ;;  %s303_s21 = int_to_ptr.vmem [resolvable:$true] %s302_s21 }
  0x6a   : > { %s10999_s4 = sld [smem:[#allocation65_spill]] }
  0x70   : > { %s7741_s25 = scalar_lea.hbm %s10999_s4, 2048 }
  0x71   : > { %p7742_p1 = scmp.ne.s32.totalorder %s10999_s4, %s7741_s25  ;;  %p7748_p12 = scmp.lt.u32.totalorder %s7741_s25, %s10999_s4 }
  0x73   : > { %p7744_p3 = pnand %p7742_p1, %p8053_p7 }
  0x75   : > { %p7745_p11 = pneg %p7744_p3 }
  0x77   : > { %p7750_p13 = pnand %p7748_p12, %p7745_p11 }
  0x79   : > { %7753 = shalt.err (!%p7750_p13)
}
  0x7a   : > { %s7754_s17 = scalar_lea.vmem %s277_s19, 2048  ;;  %p7762_p6 = scmp.lt.s32.totalorder %s277_s19, %s277_s19 }
  0x7b   : > { %p7755_p0 = scmp.ne.s32.totalorder %s277_s19, %s7754_s17  ;;  %p7763_p8 = scmp.lt.s32.totalorder %s7754_s17, %s7754_s17 }
  0x7d   : > { %p7757_p2 = pnand %p7755_p0, %p8053_p7  ;;  %p7764_p9 = por %p7763_p8, %p7762_p6 }
  0x7f   : > { %p7758_p4 = pneg %p7757_p2 }
  0x81   : > { %p7765_p10 = pnand %p7764_p9, %p7758_p4 }
  0x83   : > { %7768 = shalt.err (!%p7765_p10)
}
  0x84   : > { %7575 = dma.hbm_to_vmem [thread:$0]  (!%p8037_p5), %s10999_s4, 2048, %s277_s19, [#allocation9], %s10720_s9, %s10720_s9, %s10722_s13  }
  0x85   : > { %s11000_s6 = sld [smem:[#allocation67_spill]] }
  0x8b   : > { %s7769_s22 = scalar_lea.hbm %s11000_s6, 2048 }
  0x8c   : > { %p7770_p1 = scmp.ne.s32.totalorder %s11000_s6, %s7769_s22  ;;  %p7776_p12 = scmp.lt.u32.totalorder %s7769_s22, %s11000_s6 }
  0x8e   : > { %p7772_p3 = pnand %p7770_p1, %p8053_p7 }
  0x90   : > { %p7773_p11 = pneg %p7772_p3 }
  0x92   : > { %p7778_p13 = pnand %p7776_p12, %p7773_p11 }
  0x94   : > { %7781 = shalt.err (!%p7778_p13)
}
  0x95   : > { %s7782_s14 = scalar_lea.vmem %s303_s21, 2048  ;;  %p7790_p6 = scmp.lt.s32.totalorder %s303_s21, %s303_s21 }
  0x96   : > { %p7783_p0 = scmp.ne.s32.totalorder %s303_s21, %s7782_s14  ;;  %p7791_p8 = scmp.lt.s32.totalorder %s7782_s14, %s7782_s14 }
  0x98   : > { %p7785_p2 = pnand %p7783_p0, %p8053_p7  ;;  %p7792_p9 = por %p7791_p8, %p7790_p6 }
  0x9a   : > { %p7786_p4 = pneg %p7785_p2 }
  0x9c   : > { %p7793_p10 = pnand %p7792_p9, %p7786_p4 }
  0x9e   : > { %7796 = shalt.err (!%p7793_p10)
}
  0x9f   : > { %7581 = dma.hbm_to_vmem [thread:$0]  (!%p8037_p5), %s11000_s6, 2048, %s303_s21, [#allocation12], %s10720_s9, %s10720_s9, %s10722_s13  }
  0xa0   : > { %s5120_s15 = sadd.s32 4294967294, %s7939_s30   ;;  %s8166_s23 = sadd.s32 1, %s7939_s30  }
  0xa1   : > { %s36_s2 = sadd.s32 1, %s7935_s29  ;;  %s33_s16 = ssub.s32 %s7939_s30, %s8166_s23 }
  0xa2   : > { %p43_p7 = scmp.ne.s32.totalorder %s7935_s29, %s7931_s28  ;;  %p34_p1 = scmp.eq.s32.totalorder %s33_s16, 0 }
  0xa3   : > { %p44_p3 = scmp.eq.s32.totalorder %s7939_s30, 0  ;;  %p49_p11 = scmp.ne.s32.totalorder %s7931_s28, %s7927_s27 }
  0xa4   : > { %p225_p12 = scmp.eq.s32.totalorder %s8022_s11, 3  ;;  %p11002_p0 = scmp.eq.s32.totalorder %s8022_s11, 0 }
  0xa5   : > { %s8178_s18 = scalar_select %p34_p1, %s7935_s29, %s36_s2  }
  0xa6   : > { %p45_p13 = por %p44_p3, %p43_p7  ;;  %p8182_p2 = por %p11002_p0, %p49_p11 }
  0xa7   : > { %11001 = sst [smem:[#allocation21_spill]] %s8178_s18  ;;  %p8186_p5 = por %p225_p12, %p43_p7 }
  0xa8   : > { %p231_p4 = scmp.eq.s32.totalorder %s5120_s15, 3  ;;  %p7598_p6 = scmp.lt.s32.totalorder %s7939_s30, 4 }
  0xa9   : > { %s11004_s21 = scalar_select %p8186_p5, 1, 0 }
  0xaa   : > { %s319_s22 = sand.u32 1, %s7935_s29   ;;  %p8192_p8 = por %p231_p4, %p49_p11 }
  0xab   : > { %s8196_s25 = sshll.u32 %s319_s22, 5  ;;  %s5149_s26 = sshll.u32 %s7939_s30, 9 }
  0xac   : > { %s11005_s24 = scalar_select %p8192_p8, 1, 0 }
  0xad   : > { %s11006_s0 = sld [smem:[#allocation62_spill]]  ;;  %s323_s17 = scalar_lea.vmem [#allocation2], %s8196_s25 }
  0xae   : > { %s330_s15 = sshll.u32 %s323_s17, 4  ;;  %p8205_p9 = pnand %p7598_p6, %p45_p13  ;;  %s8209_s15 = int_to_ptr.vmem [resolvable:$true] %s330_s15 }
  0xaf   : > { %s8214_s10 = scalar_lea.hbm %s10710_s1, %s5149_s26  ;;  %s8216_s14 = scalar_lea.sflag [#allocation3], %s319_s22 }
  0xb0   : > { %p7799_p7 = pneg %p8205_p9 }
  0xb3   : > { %s8202_s19 = scalar_lea.hbm %s11006_s0, %s5149_s26  ;;  %s7802_s4 = scalar_lea.hbm %s11006_s0, 2048 }
  0xb4   : > { %s7797_s13 = scalar_lea.hbm %s8202_s19, 512  ;;  %p7803_p11 = scmp.lt.u32.totalorder %s8202_s19, %s11006_s0 }
  0xb5   : > { %p7798_p10 = scmp.ne.s32.totalorder %s8202_s19, %s7797_s13  ;;  %p7804_p12 = scmp.lt.u32.totalorder %s7802_s4, %s7797_s13 }
  0xb6   : > { %p7806_p0 = scmp.lt.u32.totalorder %s7797_s13, %s8202_s19 }
  0xb7   : > { %p7800_p1 = pnand %p7799_p7, %p7798_p10  ;;  %p7805_p13 = por %p7804_p12, %p7803_p11 }
  0xb9   : > { %p7801_p3 = pneg %p7800_p1  ;;  %p7807_p4 = por %p7806_p0, %p7805_p13 }
  0xbb   : > { %p7808_p6 = pnand %p7807_p4, %p7801_p3 }
  0xbd   : > { %7811 = shalt.err (!%p7808_p6)
}
  0xbe   : > { %s7812_s9 = scalar_lea.vmem %s8209_s15, 512  ;;  %s7950_s3 = smov [#allocation2]  }
  0xbf   : > { %p7813_p10 = scmp.ne.s32.totalorder %s8209_s15, %s7812_s9  ;;  %s7817_s22 = sshll.u32 %s7950_s3, 4  ;;  %s7818_s22 = int_to_ptr.vmem [resolvable:$false] %s7817_s22 }
  0xc0   : > { %s7819_s5 = scalar_lea.vmem %s7818_s22, 1024  ;;  %p7820_p5 = scmp.lt.s32.totalorder %s8209_s15, %s7818_s22 }
  0xc1   : > { %p7815_p1 = pnand %p7813_p10, %p7799_p7  ;;  %p7821_p11 = scmp.lt.s32.totalorder %s7819_s5, %s7812_s9 }
  0xc3   : > { %p7816_p8 = pneg %p7815_p1  ;;  %p7822_p12 = por %p7821_p11, %p7820_p5 }
  0xc5   : > { %p7823_p13 = pnand %p7822_p12, %p7816_p8 }
  0xc7   : > { %7826 = shalt.err (!%p7823_p13)
}
  0xc8   : > { %s11008_s4 = smov 8   ;;  %s11009_s6 = smov 128  }
  0xc9   : > { %7585 = dma.hbm_to_vmem [thread:$0]  (!%p8205_p9), %s8202_s19, 512, %s8209_s15, %s8216_s14, %s11009_s6, %s11009_s6, %s11008_s4  }
  0xca   : > { %s344_s13 = scalar_lea.vmem [#allocation5], %s8196_s25  ;;  %s340_s16 = sand.u32 1, %s7939_s30  }
  0xcb   : > { %s351_s26 = sshll.u32 %s344_s13, 4  ;;  %s8251_s17 = scalar_lea.sflag [#allocation6], %s340_s16  ;;  %s8249_s26 = int_to_ptr.vmem [resolvable:$true] %s351_s26 }
  0xcc   : > { %s7827_s9 = scalar_lea.hbm %s8214_s10, 512  ;;  %s7832_s5 = scalar_lea.hbm %s10710_s1, 2048 }
  0xcd   : > { %p7828_p5 = scmp.ne.s32.totalorder %s8214_s10, %s7827_s9  ;;  %p7833_p0 = scmp.lt.u32.totalorder %s8214_s10, %s10710_s1 }
  0xce   : > { %p7834_p4 = scmp.lt.u32.totalorder %s7832_s5, %s7827_s9  ;;  %p7836_p10 = scmp.lt.u32.totalorder %s7827_s9, %s8214_s10 }
  0xcf   : > { %p7830_p8 = pnand %p7828_p5, %p7799_p7 }
  0xd0   : > { %p7835_p6 = por %p7834_p4, %p7833_p0 }
  0xd1   : > { %p7831_p3 = pneg %p7830_p8 }
  0xd2   : > { %p7837_p1 = por %p7836_p10, %p7835_p6 }
  0xd4   : > { %p7838_p11 = pnand %p7837_p1, %p7831_p3 }
  0xd6   : > { %7841 = shalt.err (!%p7838_p11)
}
  0xd7   : > { %s7842_s25 = scalar_lea.vmem %s8249_s26, 512  ;;  %s7951_s19 = smov [#allocation5]  }
  0xd8   : > { %p7843_p12 = scmp.ne.s32.totalorder %s8249_s26, %s7842_s25  ;;  %s7847_s15 = sshll.u32 %s7951_s19, 4  ;;  %s7848_s15 = int_to_ptr.vmem [resolvable:$false] %s7847_s15 }
  0xd9   : > { %s7849_s0 = scalar_lea.vmem %s7848_s15, 1024  ;;  %p7850_p8 = scmp.lt.s32.totalorder %s8249_s26, %s7848_s15 }
  0xda   : > { %p7845_p13 = pnand %p7843_p12, %p7799_p7  ;;  %p7851_p0 = scmp.lt.s32.totalorder %s7849_s0, %s7842_s25 }
  0xdc   : > { %p7846_p5 = pneg %p7845_p13  ;;  %p7852_p4 = por %p7851_p0, %p7850_p8 }
  0xde   : > { %p7853_p6 = pnand %p7852_p4, %p7846_p5 }
  0xe0   : > { %7856 = shalt.err (!%p7853_p6)
}
  0xe1   : > { %7588 = dma.hbm_to_vmem [thread:$0]  (!%p8205_p9), %s8214_s10, 512, %s8249_s26, %s8251_s17, %s11009_s6, %s11009_s6, %s11008_s4  }
  0xe2   : > { %p11010_p7 = scmp.ne.s32.totalorder %s10993_s12, 0 }
  0xe4   : > { %363 = sbr.rel (%p11010_p7) target bundleno = 1784 (0x6f8), region = 52 }
  0xeb   : > { %s8283_s18 = sand.u32 1, %s7931_s28  }
  0xec   : > { %s8286_s14 = sshll.u32 %s8283_s18, 5  ;;  %s366_s2 = scalar_lea.sflag [#allocation3], %s8283_s18 }
  0xed   : > { %s8290_s13 = scalar_lea.vmem [#allocation2], %s8286_s14 }
  0xee   : > { %7902 = dma.done.wait (%p8182_p2), %s366_s2, 512  }
  0xef   : > { %7904 = vsyncadd (%p8182_p2), %s366_s2, 4294966784  ;;  %s374_s12 = sand.u32 1, %s8022_s11   ;;  %s8298_s4 = scalar_lea.vmem [#allocation5], %s8286_s14 }
  0xf0   : > { %s375_s10 = scalar_lea.sflag [#allocation6], %s374_s12 }
  0xf1   : > { %7906 = dma.done.wait (%p8182_p2), %s375_s10, 512  }
  0xf2   : > { %7908 = vsyncadd (%p8182_p2), %s375_s10, 4294966784  ;;  %p11011_p9 = scmp.eq.s32.totalorder %s8022_s11, 0 }
  0xf4   : > { %7910 = dma.done.wait (%p11011_p9), [#allocation6], 4096   ;;  %p11012_p3 = pmov %p11011_p9 }
  0xf6   : > { %7912 = vsyncadd (%p11012_p3), [#allocation6], 4294963200  ;;  %p11013_p10 = pmov %p11012_p3 }
  0xf7   : > { %p11014_p1 = pmov %p11012_p3 }
  0xf8   : > { %7914 = dma.done.wait (%p11013_p10), [#allocation9], 6144  }
  0xf9   : > { %7916 = vsyncadd (%p11014_p1), [#allocation9], 4294961152  ;;  %p11015_p11 = pmov %p11014_p1 }
  0xfa   : > { %p11016_p12 = pmov %p11014_p1 }
  0xfb   : > { %7918 = dma.done.wait (%p11015_p11), [#allocation12], 4096  }
  0xfc   : > { %7920 = vsyncadd (%p11016_p12), [#allocation12], 4294963200  ;;  %v10725_v0 = vmov 0.0   ;;  %v455_v1 = vld [vmem:[#allocation7 + $0x8] sm:$0xff]  ;;  %v457_v2 = vld [vmem:[#allocation7 + $0x18] sm:$0xff]  ;;  %s5151_s0 = sshll.u32 %s8022_s11, 9 }
  0xfd   : > { %593 = vmatprep.mubr.f32.mxu1 %v10725_v0  ;;  %1148 = vmatprep.mubr.f32.mxu0 %v10725_v0  ;;  %v454_v3 = vld [vmem:[#allocation7] sm:$0xff]  ;;  %v497_v4 = vand.u32 4294901760, %v455_v1  ;;  %v501_v5 = vand.u32 4294901760, %v457_v2  ;;  %v456_v6 = vld [vmem:[#allocation7 + $0x10] sm:$0xff]  ;;  %v459_v8 = vld [vmem:[#allocation7 + $0x28] sm:$0xff]  ;;  %s435_s2 = scalar_lea.vmem [#allocation14], %s8286_s14 }
  0xfe   : > { %v499_v7 = vand.u32 4294901760, %v454_v3  ;;  %v461_v9 = vld [vmem:[#allocation7 + $0x38] sm:$0xff]  ;;  %v503_v10 = vand.u32 4294901760, %v456_v6  ;;  %v505_v11 = vand.u32 4294901760, %v459_v8  ;;  %v458_v13 = vld [vmem:[#allocation7 + $0x20] sm:$0xff]  ;;  %v460_v14 = vld [vmem:[#allocation7 + $0x30] sm:$0xff] }
  0xff   : > { %v509_v12 = vand.u32 4294901760, %v461_v9  ;;  %v463_v15 = vld [vmem:[#allocation7 + $0x48] sm:$0xff]  ;;  %v8318_v16 = vpack.c.bf16 %v501_v5, %v497_v4  ;;  %v8320_v17 = vsub.f32 %v455_v1, %v497_v4  ;;  %v8322_v18 = vsub.f32 %v457_v2, %v501_v5  ;;  %v465_v19 = vld [vmem:[#allocation7 + $0x58] sm:$0xff]  ;;  %v462_v20 = vld [vmem:[#allocation7 + $0x40] sm:$0xff]  ;;  %s4964_s11 = scalar_lea.sflag [#allocation4], %s8283_s18  ;;  %p11361_p13 = scmp.ne.s32.totalorder %s11004_s21, 0 }
 0x100   : > { %v464_v21 = vld [vmem:[#allocation7 + $0x50] sm:$0xff]  ;;  %v8324_v22 = vpack.c.bf16 %v503_v10, %v499_v7  ;;  %v8326_v23 = vsub.f32 %v454_v3, %v499_v7  ;;  %v8328_v24 = vsub.f32 %v456_v6, %v503_v10  ;;  %v467_v26 = vld [vmem:[#allocation7 + $0x68] sm:$0xff]  ;;  %v469_v27 = vld [vmem:[#allocation7 + $0x78] sm:$0xff]  ;;  %v8334_v28 = vsub.f32 %v459_v8, %v505_v11  ;;  %s7953_s20 = smov [#allocation14]  }
 0x101   : > { %v8330_v25 = vpack.c.bf16 %v509_v12, %v505_v11  ;;  %6461 = vmatprep.subr.bf16.mxu1 %v8318_v16  ;;  %6557 = vmatprep.subr.bf16.mxu0 %v8318_v16  ;;  %v507_v29 = vand.u32 4294901760, %v458_v13  ;;  %v511_v30 = vand.u32 4294901760, %v460_v14  ;;  %v513_v31 = vand.u32 4294901760, %v463_v15  ;;  %v466_v40 = vld [vmem:[#allocation7 + $0x60] sm:$0xff]  ;;  %v468_v41 = vld [vmem:[#allocation7 + $0x70] sm:$0xff]  ;;  %v471_v42 = vld [vmem:[#allocation7 + $0x88] sm:$0xff] }
 0x102   : > { %11017 = vst [vmem:[#allocation22_spill] sm:$0xff] %v8324_v22  ;;  %6463 = vmatpush1.bf16.msra.mxu1 %v8324_v22  ;;  %6559 = vmatpush1.bf16.msra.mxu0 %v8324_v22  ;;  %v517_v32 = vand.u32 4294901760, %v465_v19  ;;  %v515_v33 = vand.u32 4294901760, %v462_v20  ;;  %v519_v34 = vand.u32 4294901760, %v464_v21  ;;  %v521_v35 = vand.u32 4294901760, %v467_v26  ;;  %v473_v47 = vld [vmem:[#allocation7 + $0x98] sm:$0xff] }
 0x103   : > { %11018 = vst [vmem:[#allocation23_spill] sm:$0xff] %v8330_v25  ;;  %6465 = vmatprep.subr.bf16.mxu1 %v8330_v25  ;;  %v8339_v36 = vsub.f32 %v461_v9, %v509_v12  ;;  %6561 = vmatprep.subr.bf16.mxu0 %v8330_v25  ;;  %v8342_v37 = vpack.c.bf16 %v511_v30, %v507_v29  ;;  %v525_v39 = vand.u32 4294901760, %v469_v27  ;;  %v470_v48 = vld [vmem:[#allocation7 + $0x80] sm:$0xff]  ;;  %v472_v49 = vld [vmem:[#allocation7 + $0x90] sm:$0xff]  ;;  %v475_v54 = vld [vmem:[#allocation7 + $0xa8] sm:$0xff]  ;;  %v523_v56 = vand.u32 4294901760, %v466_v40 }
 0x104   : > { %v8344_v38 = vsub.f32 %v458_v13, %v507_v29  ;;  %v8346_v43 = vsub.f32 %v460_v14, %v511_v30  ;;  %v8348_v44 = vpack.c.bf16 %v517_v32, %v513_v31  ;;  %v8350_v45 = vsub.f32 %v463_v15, %v513_v31  ;;  %v477_v63 = vld [vmem:[#allocation7 + $0xb8] sm:$0xff]  ;;  %v474_v1 = vld [vmem:[#allocation7 + $0xa0] sm:$0xff]  ;;  %v476_v2 = vld [vmem:[#allocation7 + $0xb0] sm:$0xff]  ;;  %s7861_s6 = sshll.u32 %s7953_s20, 4  ;;  %s7862_s6 = int_to_ptr.vmem [resolvable:$false] %s7861_s6 }
 0x105   : > { %11019 = vst [vmem:[#allocation24_spill] sm:$0xff] %v8342_v37  ;;  %v8352_v46 = vsub.f32 %v465_v19, %v517_v32  ;;  %v8354_v50 = vpack.c.bf16 %v519_v34, %v515_v33  ;;  %v8356_v51 = vsub.f32 %v462_v20, %v515_v33  ;;  %v8358_v52 = vsub.f32 %v464_v21, %v519_v34  ;;  %v479_v7 = vld [vmem:[#allocation7 + $0xc8] sm:$0xff]  ;;  %v481_v8 = vld [vmem:[#allocation7 + $0xd8] sm:$0xff]  ;;  %v478_v9 = vld [vmem:[#allocation7 + $0xc0] sm:$0xff]  ;;  %s7863_s26 = scalar_lea.vmem %s7862_s6, 1024 }
 0x106   : > { %11020 = vst [vmem:[#allocation25_spill] sm:$0xff] %v8348_v44  ;;  %v8360_v53 = vpack.c.bf16 %v525_v39, %v521_v35  ;;  %6467 = vmatpush1.bf16.msra.mxu1 %v8342_v37  ;;  %6563 = vmatpush1.bf16.msra.mxu0 %v8342_v37  ;;  %v8364_v55 = vsub.f32 %v467_v26, %v521_v35  ;;  %v527_v57 = vand.u32 4294901760, %v468_v41  ;;  %v529_v58 = vand.u32 4294901760, %v471_v42  ;;  %v480_v14 = vld [vmem:[#allocation7 + $0xd0] sm:$0xff]  ;;  %v483_v31 = vld [vmem:[#allocation7 + $0xe8] sm:$0xff] }
 0x107   : > { %11021 = vst [vmem:[#allocation26_spill] sm:$0xff] %v8354_v50  ;;  %11022 = vst [vmem:[#allocation27_spill] sm:$0xff] %v8356_v51  ;;  %6469 = vmatprep.subr.bf16.mxu1 %v8348_v44  ;;  %6565 = vmatprep.subr.bf16.mxu0 %v8348_v44  ;;  %v8368_v59 = vsub.f32 %v469_v27, %v525_v39  ;;  %v533_v60 = vand.u32 4294901760, %v473_v47  ;;  %v531_v61 = vand.u32 4294901760, %v470_v48  ;;  %v535_v62 = vand.u32 4294901760, %v472_v49  ;;  %v485_v39 = vld [vmem:[#allocation7 + $0xf8] sm:$0xff] }
 0x108   : > { %11023 = vst [vmem:[#allocation28_spill] sm:$0xff] %v8358_v52  ;;  %11024 = vst [vmem:[#allocation29_spill] sm:$0xff] %v8360_v53  ;;  %v8370_v3 = vpack.c.bf16 %v527_v57, %v523_v56  ;;  %v8372_v4 = vsub.f32 %v466_v40, %v523_v56  ;;  %v8374_v5 = vsub.f32 %v468_v41, %v527_v57  ;;  %v537_v6 = vand.u32 4294901760, %v475_v54  ;;  %v482_v40 = vld [vmem:[#allocation7 + $0xe0] sm:$0xff]  ;;  %v484_v41 = vld [vmem:[#allocation7 + $0xf0] sm:$0xff] }
 0x109   : > { %v8376_v10 = vpack.c.bf16 %v533_v60, %v529_v58  ;;  %v8378_v11 = vsub.f32 %v471_v42, %v529_v58  ;;  %v8380_v12 = vsub.f32 %v473_v47, %v533_v60  ;;  %v8382_v13 = vpack.c.bf16 %v535_v62, %v531_v61  ;;  %v446_v56 = vld [vmem:[%s8298_s4] sm:$0xff] }
 0x10a   : > { %11025 = vst [vmem:[#allocation30_spill] sm:$0xff] %v8370_v3  ;;  %6471 = vmatpush1.bf16.msra.mxu1 %v8354_v50  ;;  %6567 = vmatpush1.bf16.msra.mxu0 %v8354_v50  ;;  %v8386_v15 = vsub.f32 %v470_v48, %v531_v61  ;;  %v8388_v19 = vsub.f32 %v472_v49, %v535_v62  ;;  %v541_v20 = vand.u32 4294901760, %v477_v63  ;;  %v539_v21 = vand.u32 4294901760, %v474_v1 }
 0x10b   : > { %11026 = vst [vmem:[#allocation31_spill] sm:$0xff] %v8376_v10  ;;  %11027 = vst [vmem:[#allocation32_spill] sm:$0xff] %v8382_v13  ;;  %6473 = vmatprep.subr.bf16.mxu1 %v8360_v53  ;;  %6569 = vmatprep.subr.bf16.mxu0 %v8360_v53  ;;  %v543_v26 = vand.u32 4294901760, %v476_v2  ;;  %v545_v27 = vand.u32 4294901760, %v479_v7  ;;  %v549_v29 = vand.u32 4294901760, %v481_v8  ;;  %v547_v30 = vand.u32 4294901760, %v478_v9 }
 0x10c   : > { %v8392_v32 = vpack.c.bf16 %v541_v20, %v537_v6  ;;  %v8394_v33 = vsub.f32 %v475_v54, %v537_v6  ;;  %v8396_v34 = vsub.f32 %v477_v63, %v541_v20  ;;  %v551_v35 = vand.u32 4294901760, %v480_v14 }
 0x10d   : > { %v8398_v42 = vpack.c.bf16 %v543_v26, %v539_v21  ;;  %v8400_v47 = vsub.f32 %v474_v1, %v539_v21  ;;  %v8402_v48 = vsub.f32 %v476_v2, %v543_v26  ;;  %v8404_v49 = vpack.c.bf16 %v549_v29, %v545_v27 }
 0x10e   : > { %11028 = vst [vmem:[#allocation33_spill] sm:$0xff] %v8392_v32  ;;  %11029 = vst [vmem:[#allocation34_spill] sm:$0xff] %v8394_v33  ;;  %6475 = vmatpush1.bf16.msra.mxu1 %v8370_v3  ;;  %6571 = vmatpush1.bf16.msra.mxu0 %v8370_v3  ;;  %v8409_v54 = vsub.f32 %v479_v7, %v545_v27  ;;  %v8411_v57 = vsub.f32 %v481_v8, %v549_v29  ;;  %v553_v60 = vand.u32 4294901760, %v483_v31 }
 0x10f   : > { %11030 = vst [vmem:[#allocation35_spill] sm:$0xff] %v8398_v42  ;;  %11031 = vst [vmem:[#allocation36_spill] sm:$0xff] %v8404_v49  ;;  %v8413_v58 = vpack.c.bf16 %v551_v35, %v547_v30  ;;  %6477 = vmatprep.subr.bf16.mxu1 %v8376_v10  ;;  %6573 = vmatprep.subr.bf16.mxu0 %v8376_v10  ;;  %v8417_v61 = vsub.f32 %v478_v9, %v547_v30  ;;  %v557_v62 = vand.u32 4294901760, %v485_v39 }
 0x110   : > { %v555_v63 = vand.u32 4294901760, %v482_v40  ;;  %v559_v1 = vand.u32 4294901760, %v484_v41  ;;  %v8419_v2 = vsub.f32 %v480_v14, %v551_v35  ;;  %v640_v6 = vand.u32 4294901760, %v8320_v17 }
 0x111   : > { %11032 = vst [vmem:[#allocation37_spill] sm:$0xff] %v8413_v58  ;;  %v652_v7 = vand.u32 4294901760, %v8322_v18  ;;  %v8423_v8 = vand.u32 4294901760, %v446_v56  ;;  %v8425_v20 = vpack.c.bf16 %v557_v62, %v553_v60  ;;  %v8427_v21 = vsub.f32 %v483_v31, %v553_v60 }
 0x112   : > { %v8429_v26 = vsub.f32 %v485_v39, %v557_v62  ;;  %v8431_v27 = vpack.c.bf16 %v559_v1, %v555_v63  ;;  %6479 = vmatpush1.bf16.msra.mxu1 %v8382_v13  ;;  %6575 = vmatpush1.bf16.msra.mxu0 %v8382_v13  ;;  %v8435_v9 = vsub.f32 %v482_v40, %v555_v63  ;;  %v646_v30 = vand.u32 4294901760, %v8326_v23 }
 0x113   : > { %11033 = vst [vmem:[#allocation38_spill] sm:$0xff] %v8425_v20  ;;  %v641_v14 = vsub.f32 %v8320_v17, %v640_v6  ;;  %v653_v29 = vsub.f32 %v8322_v18, %v652_v7  ;;  %6481 = vmatprep.subr.bf16.mxu1 %v8392_v32  ;;  %6577 = vmatprep.subr.bf16.mxu0 %v8392_v32  ;;  %v658_v39 = vand.u32 4294901760, %v8328_v24  ;;  %v664_v40 = vand.u32 4294901760, %v8334_v28 }
 0x114   : > { %11034 = vst [vmem:[#allocation39_spill] sm:$0xff] %v8431_v27  ;;  %v8442_v31 = vsub.f32 %v484_v41, %v559_v1  ;;  %v8445_v35 = vsub.f32 %v446_v56, %v8423_v8  ;;  %v647_v63 = vsub.f32 %v8326_v23, %v646_v30  ;;  %v676_v0 = vand.u32 4294901760, %v8339_v36 }
 0x115   : > { %v642_v60 = vand.u32 4294901760, %v641_v14  ;;  %v654_v62 = vand.u32 4294901760, %v653_v29  ;;  %v6588_v13 = vpack.c.bf16 %v652_v7, %v640_v6  ;;  %v659_v32 = vsub.f32 %v8328_v24, %v658_v39 }
 0x116   : > { %11035 = vst [vmem:[#allocation40_spill] sm:$0xff] %v8445_v35  ;;  %v596_v10 = vand.u32 4294901760, %v8445_v35  ;;  %v665_v41 = vsub.f32 %v8334_v28, %v664_v40  ;;  %6483 = vmatpush1.bf16.msra.mxu1 %v8398_v42  ;;  %6579 = vmatpush1.bf16.msra.mxu0 %v8398_v42  ;;  %v648_v1 = vand.u32 4294901760, %v647_v63  ;;  %v6590_v3 = vpack.c.bf16 %v658_v39, %v646_v30 }
 0x117   : > { %v6492_v56 = vpack.c.bf16 %v654_v62, %v642_v60  ;;  %v677_v14 = vsub.f32 %v8339_v36, %v676_v0  ;;  %6485 = vmatprep.subr.bf16.mxu1 %v8404_v49  ;;  %6581 = vmatprep.subr.bf16.mxu0 %v8404_v49  ;;  %v660_v7 = vand.u32 4294901760, %v659_v32  ;;  %v670_v53 = vand.u32 4294901760, %v8344_v38 }
 0x118   : > { %v597_v6 = vsub.f32 %v8445_v35, %v596_v10  ;;  %v666_v29 = vand.u32 4294901760, %v665_v41  ;;  %v682_v44 = vand.u32 4294901760, %v8346_v43  ;;  %v688_v42 = vand.u32 4294901760, %v8350_v45 }
 0x119   : > { %v678_v50 = vand.u32 4294901760, %v677_v14  ;;  %v700_v60 = vand.u32 4294901760, %v8352_v46  ;;  %v6592_v39 = vpack.c.bf16 %v676_v0, %v664_v40  ;;  %v671_v62 = vsub.f32 %v8344_v38, %v670_v53 }
 0x11a   : > { %v598_v30 = vand.u32 4294901760, %v597_v6  ;;  %v694_v63 = vand.u32 4294901760, %v8356_v51  ;;  %6487 = vmatpush1.bf16.msra.mxu1 %v8413_v58  ;;  %6583 = vmatpush1.bf16.msra.mxu0 %v8413_v58  ;;  %v6494_v32 = vpack.c.bf16 %v660_v7, %v648_v1  ;;  %v683_v14 = vsub.f32 %v8346_v43, %v682_v44 }
 0x11b   : > { %v6496_v41 = vpack.c.bf16 %v678_v50, %v666_v29  ;;  %v706_v35 = vand.u32 4294901760, %v8358_v52  ;;  %6489 = vmatprep.subr.bf16.mxu1 %v8425_v20  ;;  %6585 = vmatprep.subr.bf16.mxu0 %v8425_v20  ;;  %v672_v6 = vand.u32 4294901760, %v671_v62  ;;  %v6594_v0 = vpack.c.bf16 %v682_v44, %v670_v53 }
 0x11c   : > { %v689_v40 = vsub.f32 %v8350_v45, %v688_v42  ;;  %v701_v49 = vsub.f32 %v8352_v46, %v700_v60  ;;  %v684_v37 = vand.u32 4294901760, %v683_v14  ;;  %v6596_v25 = vpack.c.bf16 %v700_v60, %v688_v42 }
 0x11d   : > { %v695_v58 = vsub.f32 %v8356_v51, %v694_v63  ;;  %v707_v50 = vsub.f32 %v8358_v52, %v706_v35  ;;  %v712_v29 = vand.u32 4294901760, %v8364_v55  ;;  %v724_v22 = vand.u32 4294901760, %v8368_v59 }
 0x11e   : > { %v690_v1 = vand.u32 4294901760, %v689_v40  ;;  %v702_v7 = vand.u32 4294901760, %v701_v49  ;;  %6491 = vmatpush1.bf16.msra.mxu1 %v8431_v27  ;;  %6587 = vmatpush1.bf16.msra.mxu0 %v8431_v27  ;;  %v6598_v62 = vpack.c.bf16 %v706_v35, %v694_v63  ;;  %v718_v14 = vand.u32 4294901760, %v8372_v4 }
 0x11f   : > { %v696_v44 = vand.u32 4294901760, %v695_v58  ;;  %v708_v53 = vand.u32 4294901760, %v707_v50  ;;  %6493 = vmatprep.subr.bf16.mxu1 %v6492_v56  ;;  %6589 = vmatprep.subr.bf16.mxu0 %v6588_v13  ;;  %v6498_v42 = vpack.c.bf16 %v684_v37, %v672_v6  ;;  %v713_v60 = vsub.f32 %v8364_v55, %v712_v29 }
 0x120   : > { %v725_v49 = vsub.f32 %v8368_v59, %v724_v22  ;;  %v730_v40 = vand.u32 4294901760, %v8374_v5  ;;  %v6500_v20 = vpack.c.bf16 %v702_v7, %v690_v1  ;;  %v719_v51 = vsub.f32 %v8372_v4, %v718_v14 }
 0x121   : > { %v6502_v52 = vpack.c.bf16 %v708_v53, %v696_v44  ;;  %v736_v27 = vand.u32 4294901760, %v8378_v11  ;;  %599 = vmatmul.mubr.f32.vlgmr.msra.gmra.mrb[0].mxu1 %v598_v30  ;;  %1152 = vmatmul.mubr.f32.vlgmr.msra.gmra.mrb[0].mxu0 %v596_v10  ;;  %v714_v58 = vand.u32 4294901760, %v713_v60  ;;  %v6600_v56 = vpack.c.bf16 %v724_v22, %v712_v29  ;;  %v447_v22 = vld [vmem:[%s8298_s4 + $0x8] sm:$0xff] }
 0x122   : > { %v726_v35 = vand.u32 4294901760, %v725_v49  ;;  %v731_v37 = vsub.f32 %v8374_v5, %v730_v40  ;;  %6495 = vmatpush1.bf16.msra.mxu1 %v6494_v32  ;;  %6591 = vmatpush1.bf16.msra.mxu0 %v6590_v3  ;;  %v720_v13 = vand.u32 4294901760, %v719_v51  ;;  %v748_v6 = vand.u32 4294901760, %v8380_v12 }
 0x123   : > { %v737_v63 = vsub.f32 %v8378_v11, %v736_v27  ;;  %v742_v50 = vand.u32 4294901760, %v8386_v15  ;;  %6497 = vmatprep.subr.bf16.mxu1 %v6496_v41  ;;  %6593 = vmatprep.subr.bf16.mxu0 %v6592_v39  ;;  %v6602_v30 = vpack.c.bf16 %v730_v40, %v718_v14  ;;  %v754_v10 = vand.u32 4294901760, %v8388_v19 }
 0x124   : > { %v732_v1 = vand.u32 4294901760, %v731_v37  ;;  %v760_v7 = vand.u32 4294901760, %v8394_v33  ;;  %v6504_v29 = vpack.c.bf16 %v726_v35, %v714_v58  ;;  %v749_v32 = vsub.f32 %v8380_v12, %v748_v6 }
 0x125   : > { %v743_v51 = vsub.f32 %v8386_v15, %v742_v50  ;;  %v11036_v3 = vmov 0.0   ;;  %v738_v44 = vand.u32 4294901760, %v737_v63  ;;  %v6604_v53 = vpack.c.bf16 %v748_v6, %v736_v27 }
 0x126   : > { %604 = vmatprep.mubr.f32.mxu1 %v11036_v3  ;;  %1157 = vmatprep.mubr.f32.mxu0 %v11036_v3  ;;  %v755_v39 = vsub.f32 %v8388_v19, %v754_v10  ;;  %v761_v41 = vsub.f32 %v8394_v33, %v760_v7  ;;  %v6506_v14 = vpack.c.bf16 %v732_v1, %v720_v13  ;;  %v750_v60 = vand.u32 4294901760, %v749_v32  ;;  %v448_v13 = vld [vmem:[%s8298_s4 + $0x10] sm:$0xff] }
 0x127   : > { %6499 = vmatpush1.bf16.msra.mxu1 %v6498_v42  ;;  %6595 = vmatpush1.bf16.msra.mxu0 %v6594_v0  ;;  %v772_v49 = vand.u32 4294901760, %v8396_v34  ;;  %v8500_v40 = vand.u32 4294901760, %v447_v22  ;;  %v744_v58 = vand.u32 4294901760, %v743_v51  ;;  %v6606_v35 = vpack.c.bf16 %v754_v10, %v742_v50 }
 0x128   : > { %6501 = vmatprep.subr.bf16.mxu1 %v6500_v20  ;;  %6597 = vmatprep.subr.bf16.mxu0 %v6596_v25  ;;  %v766_v37 = vand.u32 4294901760, %v8400_v47  ;;  %v778_v27 = vand.u32 4294901760, %v8402_v48  ;;  %v756_v63 = vand.u32 4294901760, %v755_v39  ;;  %v762_v6 = vand.u32 4294901760, %v761_v41 }
 0x129   : > { %v773_v42 = vsub.f32 %v8396_v34, %v772_v49  ;;  %v8506_v0 = vsub.f32 %v447_v22, %v8500_v40  ;;  %v6508_v1 = vpack.c.bf16 %v750_v60, %v738_v44  ;;  %v6608_v32 = vpack.c.bf16 %v772_v49, %v760_v7 }
 0x12a   : > { %v767_v33 = vsub.f32 %v8400_v47, %v766_v37  ;;  %v779_v25 = vsub.f32 %v8402_v48, %v778_v27  ;;  %v784_v10 = vand.u32 4294901760, %v8409_v54  ;;  %v796_v51 = vand.u32 4294901760, %v8411_v57 }
 0x12b   : > { %11037 = vst [vmem:[#allocation41_spill] sm:$0xff] %v8506_v0  ;;  %6503 = vmatpush1.bf16.msra.mxu1 %v6502_v52  ;;  %6599 = vmatpush1.bf16.msra.mxu0 %v6598_v62  ;;  %v774_v20 = vand.u32 4294901760, %v773_v42  ;;  %v607_v50 = vand.u32 4294901760, %v8506_v0  ;;  %v8514_v44 = vand.u32 4294901760, %v448_v13  ;;  %v790_v7 = vand.u32 4294901760, %v8417_v61 }
 0x12c   : > { %6505 = vmatprep.subr.bf16.mxu1 %v6504_v29  ;;  %6601 = vmatprep.subr.bf16.mxu0 %v6600_v56  ;;  %v768_v22 = vand.u32 4294901760, %v767_v33  ;;  %v780_v39 = vand.u32 4294901760, %v779_v25  ;;  %v6510_v41 = vpack.c.bf16 %v756_v63, %v744_v58  ;;  %v785_v62 = vsub.f32 %v8409_v54, %v784_v10  ;;  %v449_v29 = vld [vmem:[%s8298_s4 + $0x18] sm:$0xff]  ;;  %s10664_s4 = scalar_lea.hbm %s10717_s8, %s5151_s0 }
 0x12d   : > { %v608_v52 = vsub.f32 %v8506_v0, %v607_v50  ;;  %1161 = vmatmul.mubr.f32.gmra.mrb[2].mxu0 %v607_v50  ;;  %v797_v60 = vsub.f32 %v8411_v57, %v796_v51  ;;  %v6512_v49 = vpack.c.bf16 %v774_v20, %v762_v6  ;;  %v6610_v42 = vpack.c.bf16 %v778_v27, %v766_v37 }
 0x12e   : > { %1166 = vmatprep.mubr.f32.mxu0 %v11036_v3  ;;  %v8522_v56 = vsub.f32 %v448_v13, %v8514_v44  ;;  %v791_v33 = vsub.f32 %v8417_v61, %v790_v7  ;;  %v786_v63 = vand.u32 4294901760, %v785_v62  ;;  %v802_v50 = vand.u32 4294901760, %v8419_v2 }
 0x12f   : > { %6507 = vmatpush1.bf16.msra.mxu1 %v6506_v14  ;;  %6603 = vmatpush1.bf16.msra.mxu0 %v6602_v30  ;;  %v609_v58 = vand.u32 4294901760, %v608_v52  ;;  %v798_v25 = vand.u32 4294901760, %v797_v60  ;;  %v6514_v0 = vpack.c.bf16 %v780_v39, %v768_v22  ;;  %v808_v27 = vand.u32 4294901760, %v8427_v21 }
 0x130   : > { %11038 = vst [vmem:[#allocation42_spill] sm:$0xff] %v8522_v56  ;;  %6509 = vmatprep.subr.bf16.mxu1 %v6508_v1  ;;  %6605 = vmatprep.subr.bf16.mxu0 %v6604_v53  ;;  %v618_v37 = vand.u32 4294901760, %v8522_v56  ;;  %v820_v6 = vand.u32 4294901760, %v8429_v26  ;;  %v6612_v13 = vpack.c.bf16 %v796_v51, %v784_v10  ;;  %v792_v20 = vand.u32 4294901760, %v791_v33 }
 0x131   : > { %610 = vmatmul.mubr.f32.gmra.mrb[2].mxu1 %v609_v58  ;;  %v803_v14 = vsub.f32 %v8419_v2, %v802_v50  ;;  %v8531_v30 = vand.u32 4294901760, %v449_v29  ;;  %v809_v53 = vsub.f32 %v8427_v21, %v808_v27  ;;  %v814_v22 = vand.u32 4294901760, %v8435_v9 }
 0x132   : > { %615 = vmatprep.mubr.f32.mxu1 %v11036_v3  ;;  %v619_v52 = vsub.f32 %v8522_v56, %v618_v37  ;;  %1170 = vmatmul.mubr.f32.gmra.mrb[4].mxu0 %v618_v37  ;;  %v821_v1 = vsub.f32 %v8429_v26, %v820_v6  ;;  %v6516_v39 = vpack.c.bf16 %v798_v25, %v786_v63  ;;  %v826_v62 = vand.u32 4294901760, %v8442_v31  ;;  %v8547_v25 = vld [vmem:[#allocation8 + $0x80] sm:$0xff] }
 0x133   : > { %6511 = vmatpush1.bf16.msra.mxu1 %v6510_v41  ;;  %6607 = vmatpush1.bf16.msra.mxu0 %v6606_v35  ;;  %v804_v10 = vand.u32 4294901760, %v803_v14  ;;  %v8539_v51 = vsub.f32 %v449_v29, %v8531_v30  ;;  %v810_v33 = vand.u32 4294901760, %v809_v53  ;;  %v815_v37 = vsub.f32 %v8435_v9, %v814_v22  ;;  %v8549_v53 = vld [vmem:[#allocation8 + $0x88] sm:$0xff] }
 0x134   : > { %6513 = vmatprep.subr.bf16.mxu1 %v6512_v49  ;;  %6609 = vmatprep.subr.bf16.mxu0 %v6608_v32  ;;  %v620_v60 = vand.u32 4294901760, %v619_v52  ;;  %v822_v58 = vand.u32 4294901760, %v821_v1  ;;  %v827_v35 = vsub.f32 %v8442_v31, %v826_v62  ;;  %v6614_v41 = vpack.c.bf16 %v802_v50, %v790_v7  ;;  %v8552_v7 = vld [vmem:[#allocation8] sm:$0xff] }
 0x135   : > { %1175 = vmatprep.mubr.f32.mxu0 %v11036_v3  ;;  %v629_v56 = vand.u32 4294901760, %v8539_v51  ;;  %v6518_v29 = vpack.c.bf16 %v804_v10, %v792_v20  ;;  %v816_v49 = vand.u32 4294901760, %v815_v37  ;;  %v6616_v52 = vpack.c.bf16 %v820_v6, %v808_v27  ;;  %v8560_v20 = vld [vmem:[#allocation8 + $0x98] sm:$0xff] }
 0x136   : > { %621 = vmatmul.mubr.f32.gmra.mrb[4].mxu1 %v620_v60  ;;  %v828_v32 = vand.u32 4294901760, %v827_v35  ;;  %v6520_v14 = vpack.c.bf16 %v822_v58, %v810_v33  ;;  %v10755_v50 = vand.u32 4294901760, %v8547_v25  ;;  %v6618_v6 = vpack.c.bf16 %v826_v62, %v814_v22  ;;  %v8575_v37 = vld [vmem:[#allocation8 + $0x18] sm:$0xff]  ;;  %v8584_v62 = vld [vmem:[#allocation8 + $0xa0] sm:$0xff]  ;;  %v8586_v35 = vld [vmem:[#allocation8 + $0xa8] sm:$0xff] }
 0x137   : > { %6515 = vmatpush1.bf16.msra.mxu1 %v6514_v0  ;;  %6611 = vmatpush1.bf16.msra.mxu0 %v6610_v42  ;;  %v630_v63 = vsub.f32 %v8539_v51, %v629_v56  ;;  %v8554_v0 = vld [vmem:[#allocation8 + $0x8] sm:$0xff]  ;;  %v8556_v42 = vld [vmem:[#allocation8 + $0x90] sm:$0xff]  ;;  %v10750_v60 = vand.u32 4294901760, %v8552_v7 }
 0x138   : > { %6517 = vmatprep.subr.bf16.mxu1 %v6516_v39  ;;  %6613 = vmatprep.subr.bf16.mxu0 %v6612_v13  ;;  %v8562_v13 = vld [vmem:[#allocation8 + $0x10] sm:$0xff]  ;;  %v6522_v27 = vpack.c.bf16 %v828_v32, %v816_v49  ;;  %v10754_v39 = vand.u32 4294901760, %v8549_v53  ;;  %v8570_v10 = vsub.f32 %v8547_v25, %v10755_v50  ;;  %v10749_v33 = vand.u32 4294901760, %v8554_v0  ;;  %v8604_v49 = vld [vmem:[#allocation8 + $0x20] sm:$0xff]  ;;  %v8606_v32 = vld [vmem:[#allocation8 + $0x28] sm:$0xff] }
 0x139   : > { %626 = vmatprep.mubr.f32.mxu1 %v11036_v3  ;;  %v631_v1 = vand.u32 4294901760, %v630_v63  ;;  %1179 = vmatmul.mubr.f32.gmra.mrb[6].mxu0 %v629_v56  ;;  %v6524_v56 = vpack.c.bf16 %v8322_v18, %v8320_v17  ;;  %v10748_v58 = vand.u32 4294901760, %v8556_v42  ;;  %v10751_v18 = vand.u32 4294901760, %v8560_v20 }
 0x13a   : > { %1345 = vmatprep.mubr.f32.mxu0 %v11036_v3  ;;  %v8580_v17 = vsub.f32 %v8549_v53, %v10754_v39  ;;  %v10752_v22 = vand.u32 4294901760, %v8562_v13  ;;  %v11040_v39 = vld [vmem:[#allocation22_spill] sm:$0xff] }
 0x13b   : > { %6519 = vmatpush1.bf16.msra.mxu1 %v6518_v29  ;;  %6615 = vmatpush1.bf16.msra.mxu0 %v6614_v41  ;;  %v8592_v41 = vsub.f32 %v8552_v7, %v10750_v60  ;;  %v8597_v29 = vsub.f32 %v8554_v0, %v10749_v33  ;;  %v8602_v63 = vsub.f32 %v8556_v42, %v10748_v58  ;;  %v8621_v33 = vld [vmem:[#allocation8 + $0xb0] sm:$0xff]  ;;  %v8623_v60 = vld [vmem:[#allocation8 + $0xb8] sm:$0xff] }
 0x13c   : > { %6521 = vmatprep.subr.bf16.mxu1 %v6520_v14  ;;  %6617 = vmatprep.subr.bf16.mxu0 %v6616_v52  ;;  %v6526_v14 = vpack.c.bf16 %v8328_v24, %v8326_v23  ;;  %v8613_v52 = vsub.f32 %v8560_v20, %v10751_v18  ;;  %v8619_v58 = vsub.f32 %v8562_v13, %v10752_v22  ;;  %v10756_v24 = vand.u32 4294901760, %v8584_v62  ;;  %v8632_v18 = vld [vmem:[#allocation8 + $0x38] sm:$0xff] }
 0x13d   : > { %632 = vmatmul.mubr.f32.gmra.mrb[6].mxu1 %v631_v1  ;;  %v10753_v1 = vand.u32 4294901760, %v8575_v37  ;;  %v6528_v23 = vpack.c.bf16 %v8339_v36, %v8334_v28  ;;  %v6530_v22 = vpack.c.bf16 %v8346_v43, %v8344_v38  ;;  %v10760_v28 = vand.u32 4294901760, %v8606_v32  ;;  %v11041_v43 = vld [vmem:[#allocation23_spill] sm:$0xff] }
 0x13e   : > { %862 = vmatprep.mubr.f32.mxu1 %v11036_v3  ;;  %v8648_v36 = vsub.f32 %v8584_v62, %v10756_v24 }
 0x13f   : > { %6523 = vmatpush1.bf16.msra.mxu1 %v6522_v27  ;;  %6619 = vmatpush1.bf16.msra.mxu0 %v6618_v6  ;;  %v10757_v27 = vand.u32 4294901760, %v8586_v35  ;;  %v8630_v6 = vld [vmem:[#allocation8 + $0x30] sm:$0xff]  ;;  %v8666_v24 = vsub.f32 %v8606_v32, %v10760_v28 }
 0x140   : > { %6525 = vmatprep.subr.bf16.mxu1 %v6524_v56  ;;  %6621 = vmatprep.subr.bf16.mxu0 %v8318_v16  ;;  %v8639_v56 = vsub.f32 %v8575_v37, %v10753_v1  ;;  %v10759_v16 = vand.u32 4294901760, %v8604_v49  ;;  %v10761_v1 = vand.u32 4294901760, %v8623_v60 }
 0x141   : > { %v8653_v38 = vsub.f32 %v8586_v35, %v10757_v27  ;;  %v10763_v27 = vand.u32 4294901760, %v8630_v6 }
 0x142   : > { %864 = vmatmul.mubr.f32.vlgmr.msra.gmra.mrb[0].mxu1 %v8423_v8  ;;  %1347 = vmatmul.mubr.f32.vlgmr.msra.gmra.mrb[0].mxu0 %v8423_v8  ;;  %v8661_v50 = vsub.f32 %v8604_v49, %v10759_v16  ;;  %v8681_v28 = vsub.f32 %v8623_v60, %v10761_v1 }
 0x143   : > { %11039 = vst [vmem:[#allocation43_spill] sm:$0xff] %v8653_v38  ;;  %6527 = vmatpush1.bf16.msra.mxu1 %v6526_v14  ;;  %6623 = vmatpush1.bf16.msra.mxu0 %v11040_v39  ;;  %v1561_v38 = vand.u32 4294901760, %v8632_v18  ;;  %v6532_v39 = vpack.c.bf16 %v8352_v46, %v8350_v45  ;;  %v11042_v14 = vand.u32 4294901760, %v8621_v33  ;;  %v11044_v46 = vld [vmem:[#allocation24_spill] sm:$0xff] }
 0x144   : > { %6529 = vmatprep.subr.bf16.mxu1 %v6528_v23  ;;  %6625 = vmatprep.subr.bf16.mxu0 %v11041_v43  ;;  %11043 = vst [vmem:[#allocation22_spill] sm:$0xff] %v8681_v28  ;;  %v8688_v23 = vsub.f32 %v8630_v6, %v10763_v27  ;;  %v11045_v43 = vld [vmem:[#allocation27_spill] sm:$0xff]  ;;  %v11047_v28 = vld [vmem:[#allocation25_spill] sm:$0xff]  ;;  %v6536_v27 = vpack.c.bf16 %v8368_v59, %v8364_v55  ;;  %v11050_v59 = vld [vmem:[#allocation30_spill] sm:$0xff] }
 0x145   : > { %v8676_v16 = vsub.f32 %v8621_v33, %v11042_v14  ;;  %869 = vmatprep.mubr.f32.mxu1 %v11036_v3  ;;  %1352 = vmatprep.mubr.f32.mxu0 %v11036_v3  ;;  %v8693_v45 = vsub.f32 %v8632_v18, %v1561_v38  ;;  %v11046_v14 = vld [vmem:[#allocation28_spill] sm:$0xff]  ;;  %v6540_v55 = vpack.c.bf16 %v8380_v12, %v8378_v11 }
 0x146   : > { %871 = vmatmul.mubr.f32.gmra.mrb[2].mxu1 %v8500_v40  ;;  %1354 = vmatmul.mubr.f32.gmra.mrb[2].mxu0 %v8500_v40  ;;  %v6534_v1 = vpack.c.bf16 %v11046_v14, %v11045_v43  ;;  %v11053_v12 = vld [vmem:[#allocation32_spill] sm:$0xff]  ;;  %v6552_v14 = vpack.c.bf16 %v8429_v26, %v8427_v21  ;;  %v11063_v21 = vand.u32 4294901760, %v8552_v7  ;;  %v11064_v26 = vand.u32 4294901760, %v8554_v0 }
 0x147   : > { %6531 = vmatpush1.bf16.msra.mxu1 %v6530_v22  ;;  %6627 = vmatpush1.bf16.msra.mxu0 %v11044_v46  ;;  %v11048_v22 = vld [vmem:[#allocation26_spill] sm:$0xff]  ;;  %v6538_v46 = vpack.c.bf16 %v8374_v5, %v8372_v4  ;;  %v6542_v4 = vpack.c.bf16 %v8388_v19, %v8386_v15  ;;  %v11051_v5 = vld [vmem:[#allocation31_spill] sm:$0xff]  ;;  %v6548_v15 = vpack.c.bf16 %v8411_v57, %v8409_v54  ;;  %v11056_v43 = vld [vmem:[#allocation36_spill] sm:$0xff]  ;;  %v11059_v57 = vand.u32 4294901760, %v8547_v25 }
 0x148   : > { %6533 = vmatprep.subr.bf16.mxu1 %v6532_v39  ;;  %6629 = vmatprep.subr.bf16.mxu0 %v11047_v28  ;;  %v11049_v39 = vld [vmem:[#allocation29_spill] sm:$0xff]  ;;  %v11055_v19 = vld [vmem:[#allocation35_spill] sm:$0xff]  ;;  %v11058_v54 = vld [vmem:[#allocation38_spill] sm:$0xff]  ;;  %v11070_v7 = vand.u32 4294901760, %v8562_v13  ;;  %v11071_v0 = vand.u32 4294901760, %v8575_v37  ;;  %v11077_v13 = vand.u32 4294901760, %v8604_v49 }
 0x149   : > { %876 = vmatprep.mubr.f32.mxu1 %v11036_v3  ;;  %1359 = vmatprep.mubr.f32.mxu0 %v11036_v3  ;;  %v11054_v28 = vld [vmem:[#allocation33_spill] sm:$0xff]  ;;  %v11078_v37 = vand.u32 4294901760, %v8606_v32  ;;  %v11084_v49 = vand.u32 4294901760, %v8630_v6 }
 0x14a   : > { %878 = vmatmul.mubr.f32.gmra.mrb[4].mxu1 %v8514_v44  ;;  %1361 = vmatmul.mubr.f32.gmra.mrb[4].mxu0 %v8514_v44 }
 0x14b   : > { %6535 = vmatpush1.bf16.msra.mxu1 %v6534_v1  ;;  %6631 = vmatpush1.bf16.msra.mxu0 %v11048_v22  ;;  %v11052_v1 = vld [vmem:[#allocation34_spill] sm:$0xff]  ;;  %v11060_v22 = vand.u32 4294901760, %v8549_v53  ;;  %v11069_v53 = vld [vmem:[#allocation40_spill] sm:$0xff]  ;;  %v8806_v32 = vpack.c.bf16 %v1561_v38, %v11084_v49  ;;  %v10791_v49 = vand.u32 4294901760, %v8597_v29 }
 0x14c   : > { %6537 = vmatprep.subr.bf16.mxu1 %v6536_v27  ;;  %6633 = vmatprep.subr.bf16.mxu0 %v11049_v39  ;;  %v6544_v11 = vpack.c.bf16 %v8396_v34, %v11052_v1  ;;  %v6546_v27 = vpack.c.bf16 %v8402_v48, %v8400_v47  ;;  %v6550_v34 = vpack.c.bf16 %v8419_v2, %v8417_v61  ;;  %v11057_v47 = vld [vmem:[#allocation37_spill] sm:$0xff]  ;;  %v11062_v2 = vld [vmem:[#allocation39_spill] sm:$0xff]  ;;  %v1533_v38 = vld [vmem:[#allocation8 + $0xd0] sm:$0xff] }
 0x14d   : > { %883 = vmatprep.mubr.f32.mxu1 %v11036_v3  ;;  %1366 = vmatprep.mubr.f32.mxu0 %v11036_v3  ;;  %v6554_v48 = vpack.c.bf16 %v8442_v31, %v8435_v9  ;;  %v8745_v61 = vpack.c.bf16 %v11060_v22, %v11059_v57  ;;  %v11066_v9 = vand.u32 4294901760, %v8556_v42  ;;  %v11067_v31 = vand.u32 4294901760, %v8560_v20  ;;  %11085 = vst [vmem:[#allocation30_spill] sm:$0xff] %v8806_v32  ;;  %v1516_v1 = vld [vmem:[#allocation8 + $0x48] sm:$0xff]  ;;  %v1519_v22 = vld [vmem:[#allocation8 + $0x60] sm:$0xff] }
 0x14e   : > { %885 = vmatmul.mubr.f32.gmra.mrb[6].mxu1 %v8531_v30  ;;  %1368 = vmatmul.mubr.f32.gmra.mrb[6].mxu0 %v8531_v30  ;;  %v8770_v39 = vpack.c.bf16 %v11071_v0, %v11070_v7  ;;  %v11073_v42 = vand.u32 4294901760, %v8584_v62  ;;  %v11074_v20 = vand.u32 4294901760, %v8586_v35  ;;  %v11080_v62 = vand.u32 4294901760, %v8621_v33  ;;  %v1538_v7 = vld [vmem:[#allocation8 + $0xf8] sm:$0xff] }
 0x14f   : > { %6539 = vmatpush1.bf16.msra.mxu1 %v6538_v46  ;;  %6635 = vmatpush1.bf16.msra.mxu0 %v11050_v59  ;;  %11061 = vst [vmem:[#allocation23_spill] sm:$0xff] %v8745_v61  ;;  %v8753_v46 = vpack.c.bf16 %v11064_v26, %v11063_v21  ;;  %v8759_v25 = vpack.c.bf16 %v11067_v31, %v11066_v9  ;;  %v11081_v35 = vand.u32 4294901760, %v8623_v60  ;;  %v1532_v60 = vld [vmem:[#allocation8 + $0xc8] sm:$0xff]  ;;  %v1567_v6 = vand.u32 4294901760, %v1516_v1 }
 0x150   : > { %6541 = vmatprep.subr.bf16.mxu1 %v6540_v55  ;;  %6637 = vmatprep.subr.bf16.mxu0 %v11051_v5  ;;  %11072 = vst [vmem:[#allocation28_spill] sm:$0xff] %v8770_v39  ;;  %v8777_v55 = vpack.c.bf16 %v11074_v20, %v11073_v42  ;;  %v8788_v59 = vpack.c.bf16 %v11078_v37, %v11077_v13  ;;  %v1515_v5 = vld [vmem:[#allocation8 + $0x40] sm:$0xff]  ;;  %v1576_v21 = vand.u32 4294901760, %v1519_v22  ;;  %v1633_v42 = vand.u32 4294901760, %v1538_v7  ;;  %v1521_v20 = vld [vmem:[#allocation8 + $0x70] sm:$0xff] }
 0x151   : > { %1019 = vmatprep.mubr.f32.mxu1 %v11036_v3  ;;  %1470 = vmatprep.mubr.f32.mxu0 %v11036_v3  ;;  %11065 = vst [vmem:[#allocation24_spill] sm:$0xff] %v8753_v46  ;;  %11068 = vst [vmem:[#allocation27_spill] sm:$0xff] %v8759_v25  ;;  %v10782_v13 = vand.u32 4294901760, %v8570_v10  ;;  %v10785_v37 = vand.u32 4294901760, %v8580_v17 }
 0x152   : > { %11075 = vst [vmem:[#allocation25_spill] sm:$0xff] %v8777_v55  ;;  %11079 = vst [vmem:[#allocation26_spill] sm:$0xff] %v8788_v59 }
 0x153   : > { %6543 = vmatpush1.bf16.msra.mxu1 %v6542_v4  ;;  %6639 = vmatpush1.bf16.msra.mxu0 %v11053_v12  ;;  %v8795_v4 = vpack.c.bf16 %v11081_v35, %v11080_v62  ;;  %v1582_v62 = vand.u32 4294901760, %v1521_v20 }
 0x154   : > { %6545 = vmatprep.subr.bf16.mxu1 %v6544_v11  ;;  %6641 = vmatprep.subr.bf16.mxu0 %v11054_v28  ;;  %v1564_v11 = vand.u32 4294901760, %v1515_v5  ;;  %v1517_v28 = vld [vmem:[#allocation8 + $0x50] sm:$0xff] }
 0x155   : > { %11082 = vst [vmem:[#allocation29_spill] sm:$0xff] %v8795_v4 }
 0x156   : > { %v8814_v18 = vpack.c.bf16 %v1567_v6, %v1564_v11 }
 0x157   : > { %6547 = vmatpush1.bf16.msra.mxu1 %v6546_v27  ;;  %6643 = vmatpush1.bf16.msra.mxu0 %v11055_v19  ;;  %v1534_v27 = vld [vmem:[#allocation8 + $0xd8] sm:$0xff]  ;;  %v1570_v19 = vand.u32 4294901760, %v1517_v28 }
 0x158   : > { %6549 = vmatprep.subr.bf16.mxu1 %v6548_v15  ;;  %6645 = vmatprep.subr.bf16.mxu0 %v11056_v43  ;;  %11087 = vst [vmem:[#allocation34_spill] sm:$0xff] %v8814_v18  ;;  %v1518_v15 = vld [vmem:[#allocation8 + $0x58] sm:$0xff] }
 0x15b   : > { %6551 = vmatpush1.bf16.msra.mxu1 %v6550_v34  ;;  %6647 = vmatpush1.bf16.msra.mxu0 %v11057_v47  ;;  %v1573_v34 = vand.u32 4294901760, %v1518_v15  ;;  %v1535_v47 = vld [vmem:[#allocation8 + $0xe0] sm:$0xff] }
 0x15c   : > { %6553 = vmatprep.subr.bf16.mxu1 %v6552_v14  ;;  %6649 = vmatprep.subr.bf16.mxu0 %v11058_v54  ;;  %v1624_v54 = vand.u32 4294901760, %v1535_v47 }
 0x15d   : > { %v8820_v14 = vpack.c.bf16 %v1573_v34, %v1570_v19 }
 0x15f   : > { %6555 = vmatpush1.bf16.msra.mxu1 %v6554_v48  ;;  %6651 = vmatpush1.bf16.msra.mxu0 %v11062_v2  ;;  %11089 = vst [vmem:[#allocation33_spill] sm:$0xff] %v8820_v14  ;;  %v1536_v48 = vld [vmem:[#allocation8 + $0xe8] sm:$0xff] }
 0x160   : > { %6653 = vmatprep.subr.bf16.mxu1 %v8745_v61  ;;  %v1627_v57 = vand.u32 4294901760, %v1536_v48  ;;  %v1520_v2 = vld [vmem:[#allocation8 + $0x68] sm:$0xff] }
 0x161   : > { %v1579_v26 = vand.u32 4294901760, %v1520_v2 }
 0x162   : > { %1022 = vmatmul.mubr.f32.vlgmr.msra.gmra.mrb[0].mxu1 %v11069_v53  ;;  %1472 = vmatmul.mubr.f32.vlgmr.msra.gmra.mrb[0].mxu0 %v8423_v8  ;;  %v11076_v8 = vld [vmem:[#allocation41_spill] sm:$0xff]  ;;  %v8824_v9 = vpack.c.bf16 %v1627_v57, %v1624_v54  ;;  %v1537_v53 = vld [vmem:[#allocation8 + $0xf0] sm:$0xff] }
 0x163   : > { %1027 = vmatprep.mubr.f32.mxu1 %v11036_v3  ;;  %1477 = vmatprep.mubr.f32.mxu0 %v11036_v3  ;;  %v8826_v31 = vpack.c.bf16 %v1579_v26, %v1576_v21  ;;  %v1630_v0 = vand.u32 4294901760, %v1537_v53 }
 0x164   : > { %6655 = vmatpush3.bf16.msra.mxu1 %v8753_v46  ;;  %11090 = vst [vmem:[#allocation35_spill] sm:$0xff] %v8824_v9 }
 0x165   : > { %6657 = vmatprep.subr.bf16.mxu1 %v8759_v25  ;;  %11091 = vst [vmem:[#allocation36_spill] sm:$0xff] %v8826_v31  ;;  %v8864_v25 = vsub.f32 %v1517_v28, %v1570_v19 }
 0x166   : > { %1030 = vmatmul.mubr.f32.gmra.mrb[2].mxu1 %v11076_v8  ;;  %1479 = vmatmul.mubr.f32.gmra.mrb[2].mxu0 %v8500_v40  ;;  %v11083_v40 = vld [vmem:[#allocation42_spill] sm:$0xff]  ;;  %v1522_v8 = vld [vmem:[#allocation8 + $0x78] sm:$0xff] }
 0x167   : > { %1035 = vmatprep.mubr.f32.mxu1 %v11036_v3  ;;  %1484 = vmatprep.mubr.f32.mxu0 %v11036_v3  ;;  %v1585_v35 = vand.u32 4294901760, %v1522_v8  ;;  %11095 = vst [vmem:[#allocation40_spill] sm:$0xff] %v8864_v25 }
 0x168   : > { %6659 = vmatpush3.bf16.msra.mxu1 %v8770_v39 }
 0x169   : > { %6661 = vmatprep.subr.bf16.mxu1 %v8777_v55  ;;  %v8855_v55 = vsub.f32 %v1515_v5, %v1564_v11  ;;  %v8873_v5 = vsub.f32 %v1519_v22, %v1576_v21 }
 0x16a   : > { %1038 = vmatmul.mubr.f32.gmra.mrb[4].mxu1 %v11083_v40  ;;  %1486 = vmatmul.mubr.f32.gmra.mrb[4].mxu0 %v8514_v44  ;;  %v1531_v44 = vld [vmem:[#allocation8 + $0xc0] sm:$0xff]  ;;  %v10788_v40 = vand.u32 4294901760, %v8592_v41 }
 0x16b   : > { %1043 = vmatprep.mubr.f32.mxu1 %v11036_v3  ;;  %1491 = vmatprep.mubr.f32.mxu0 %v11036_v3  ;;  %v1612_v33 = vand.u32 4294901760, %v1531_v44  ;;  %v1615_v3 = vand.u32 4294901760, %v1532_v60  ;;  %11099 = vst [vmem:[#allocation45_spill] sm:$0xff] %v8873_v5 }
 0x16c   : > { %6663 = vmatpush3.bf16.msra.mxu1 %v8788_v59 }
 0x16d   : > { %6665 = vmatprep.subr.bf16.mxu1 %v8795_v4  ;;  %v8812_v12 = vpack.c.bf16 %v1615_v3, %v1612_v33  ;;  %v8851_v59 = vsub.f32 %v1531_v44, %v1612_v33  ;;  %v8869_v33 = vsub.f32 %v1535_v47, %v1624_v54  ;;  %v8895_v47 = vsub.f32 %v1537_v53, %v1630_v0 }
 0x16e   : > { %1046 = vmatmul.mubr.f32.gmra.mrb[6].mxu1 %v8539_v51  ;;  %1493 = vmatmul.mubr.f32.gmra.mrb[6].mxu0 %v8531_v30  ;;  %v1618_v51 = vand.u32 4294901760, %v1533_v38  ;;  %v1621_v30 = vand.u32 4294901760, %v1534_v27  ;;  %v8899_v54 = vsub.f32 %v1521_v20, %v1582_v62 }
 0x16f   : > { %11086 = vst [vmem:[#allocation31_spill] sm:$0xff] %v8812_v12  ;;  %11097 = vst [vmem:[#allocation42_spill] sm:$0xff] %v8869_v33 }
 0x170   : > { %6667 = vmatpush3.bf16.msra.mxu1 %v8806_v32  ;;  %v8818_v43 = vpack.c.bf16 %v1621_v30, %v1618_v51  ;;  %v8860_v39 = vsub.f32 %v1533_v38, %v1618_v51  ;;  %v10805_v38 = vand.u32 4294901760, %v8648_v36  ;;  %11104 = vst [vmem:[#allocation48_spill] sm:$0xff] %v8899_v54 }
 0x171   : > { %6669 = vmatprep.subr.bf16.mxu1 %v8812_v12  ;;  %v1707_v12 = vsub.f32 %v8597_v29, %v10791_v49  ;;  %v8866_v49 = vsub.f32 %v1518_v15, %v1573_v34  ;;  %v10797_v34 = vand.u32 4294901760, %v8666_v24 }
 0x172   : > { %11088 = vst [vmem:[#allocation32_spill] sm:$0xff] %v8818_v43  ;;  %11094 = vst [vmem:[#allocation39_spill] sm:$0xff] %v8860_v39 }
 0x173   : > { %11096 = vst [vmem:[#allocation41_spill] sm:$0xff] %v8866_v49  ;;  %v1708_v44 = vand.u32 4294901760, %v1707_v12  ;;  %v10808_v12 = vand.u32 4294901760, %v8639_v56 }
 0x174   : > { %6671 = vmatpush3.bf16.msra.mxu1 %v8814_v18  ;;  %v8842_v18 = vpack.c.bf16 %v1585_v35, %v1582_v62  ;;  %v11106_v62 = vld [vmem:[#allocation22_spill] sm:$0xff] }
 0x175   : > { %6673 = vmatprep.subr.bf16.mxu1 %v8818_v43  ;;  %v1819_v43 = vsub.f32 %v8580_v17, %v10785_v37  ;;  %v8857_v37 = vsub.f32 %v1516_v1, %v1567_v6  ;;  %v8875_v1 = vsub.f32 %v1520_v2, %v1579_v26  ;;  %v1721_v21 = vsub.f32 %v8639_v56, %v10808_v12 }
 0x176   : > { %11093 = vst [vmem:[#allocation38_spill] sm:$0xff] %v8842_v18  ;;  %v1840_v26 = vsub.f32 %v8648_v36, %v10805_v38  ;;  %v10812_v38 = vand.u32 4294901760, %v8873_v5 }
 0x177   : > { %v1820_v4 = vand.u32 4294901760, %v1819_v43  ;;  %11100 = vst [vmem:[#allocation46_spill] sm:$0xff] %v8875_v1  ;;  %v1722_v20 = vand.u32 4294901760, %v1721_v21 }
 0x178   : > { %6675 = vmatpush3.bf16.msra.mxu1 %v8820_v14  ;;  %v8834_v14 = vpack.c.bf16 %v1633_v42, %v1630_v0  ;;  %v10794_v0 = vand.u32 4294901760, %v8676_v16 }
 0x179   : > { %6677 = vmatprep.subr.bf16.mxu1 %v8824_v9  ;;  %v1812_v9 = vsub.f32 %v8570_v10, %v10782_v13  ;;  %v8853_v13 = vsub.f32 %v1532_v60, %v1615_v3  ;;  %v10816_v60 = vand.u32 4294901760, %v8602_v63  ;;  %v8871_v3 = vsub.f32 %v1536_v48, %v1627_v57 }
 0x17a   : > { %11092 = vst [vmem:[#allocation37_spill] sm:$0xff] %v8834_v14  ;;  %v8897_v48 = vsub.f32 %v1538_v7, %v1633_v42  ;;  %v8901_v57 = vsub.f32 %v1522_v8, %v1585_v35  ;;  %v1735_v7 = vsub.f32 %v8666_v24, %v10797_v34  ;;  %v1841_v8 = vand.u32 4294901760, %v1840_v26 }
 0x17b   : > { %v1813_v32 = vand.u32 4294901760, %v1812_v9  ;;  %11098 = vst [vmem:[#allocation44_spill] sm:$0xff] %v8871_v3  ;;  %v1826_v6 = vsub.f32 %v8602_v63, %v10816_v60  ;;  %v10792_v35 = vand.u32 4294901760, %v11106_v62  ;;  %v10802_v34 = vand.u32 4294901760, %v8860_v39 }
 0x17c   : > { %6679 = vmatpush3.bf16.msra.mxu1 %v8826_v31  ;;  %v1700_v31 = vsub.f32 %v8592_v41, %v10788_v40  ;;  %v8862_v40 = vsub.f32 %v1534_v27, %v1621_v30  ;;  %v11101_v27 = vld [vmem:[#allocation43_spill] sm:$0xff]  ;;  %v10798_v30 = vand.u32 4294901760, %v8661_v50  ;;  %11103 = vst [vmem:[#allocation47_spill] sm:$0xff] %v8897_v48  ;;  %11105 = vst [vmem:[#allocation49_spill] sm:$0xff] %v8901_v57 }
 0x17d   : > { %6681 = vmatprep.subr.bf16.mxu1 %v8834_v14  ;;  %v6684_v9 = vpack.c.bf16 %v1820_v4, %v1813_v32  ;;  %v10815_v4 = vand.u32 4294901760, %v8613_v52  ;;  %v10811_v32 = vand.u32 4294901760, %v8619_v58  ;;  %v10801_v51 = vand.u32 4294901760, %v11101_v27  ;;  %11102 = vst [vmem:[#allocation43_spill] sm:$0xff] %v8895_v47 }
 0x17e   : > { %v1701_v43 = vand.u32 4294901760, %v1700_v31  ;;  %v1827_v28 = vand.u32 4294901760, %v1826_v6  ;;  %v1728_v53 = vsub.f32 %v8661_v50, %v10798_v30  ;;  %v1854_v6 = vsub.f32 %v8676_v16, %v10794_v0 }
 0x17f   : > { %v1833_v15 = vsub.f32 %v8613_v52, %v10815_v4  ;;  %v1714_v19 = vsub.f32 %v8619_v58, %v10811_v32  ;;  %v1847_v31 = vsub.f32 %v11101_v27, %v10801_v51 }
 0x180   : > { %6683 = vmatpush3.bf16.msra.mxu1 %v8842_v18  ;;  %v8877_v11 = vpack.c.bf16 %v1708_v44, %v1701_v43  ;;  %v1729_v43 = vand.u32 4294901760, %v1728_v53  ;;  %v1736_v44 = vand.u32 4294901760, %v1735_v7  ;;  %v10796_v53 = vand.u32 4294901760, %v8851_v59 }
 0x181   : > { %6685 = vmatprep.subr.bf16.mxu1 %v6684_v9  ;;  %v1834_v22 = vand.u32 4294901760, %v1833_v15  ;;  %v1715_v2 = vand.u32 4294901760, %v1714_v19  ;;  %v1848_v9 = vand.u32 4294901760, %v1847_v31  ;;  %v1861_v19 = vsub.f32 %v11106_v62, %v10792_v35 }
 0x182   : > { %v8934_v26 = vpack.c.bf16 %v1736_v44, %v1729_v43  ;;  %v1855_v31 = vand.u32 4294901760, %v1854_v6  ;;  %v10799_v35 = vand.u32 4294901760, %v8853_v13  ;;  %v10803_v43 = vand.u32 4294901760, %v8857_v37 }
 0x183   : > { %v8919_v42 = vpack.c.bf16 %v1834_v22, %v1827_v28  ;;  %v8925_v15 = vpack.c.bf16 %v1722_v20, %v1715_v2  ;;  %v10793_v28 = vand.u32 4294901760, %v8688_v23  ;;  %v10795_v22 = vand.u32 4294901760, %v8693_v45 }
 0x184   : > { %v8932_v21 = vpack.c.bf16 %v1848_v9, %v1841_v8  ;;  %v1862_v7 = vand.u32 4294901760, %v1861_v19  ;;  %v1868_v8 = vsub.f32 %v8851_v59, %v10796_v53  ;;  %v10800_v9 = vand.u32 4294901760, %v8855_v55 }
 0x185   : > { %v1742_v2 = vsub.f32 %v8688_v23, %v10793_v28  ;;  %v1749_v20 = vsub.f32 %v8693_v45, %v10795_v22  ;;  %v1875_v28 = vsub.f32 %v8853_v13, %v10799_v35  ;;  %v1763_v53 = vsub.f32 %v8857_v37, %v10803_v43 }
 0x186   : > { %v8949_v44 = vpack.c.bf16 %v1862_v7, %v1855_v31  ;;  %v1869_v0 = vand.u32 4294901760, %v1868_v8  ;;  %v1756_v22 = vsub.f32 %v8855_v55, %v10800_v9  ;;  %v10804_v7 = vand.u32 4294901760, %v8862_v40 }
 0x187   : > { %v1743_v6 = vand.u32 4294901760, %v1742_v2  ;;  %v1750_v19 = vand.u32 4294901760, %v1749_v20  ;;  %v1876_v31 = vand.u32 4294901760, %v1875_v28  ;;  %v10806_v2 = vand.u32 4294901760, %v8864_v25 }
 0x188   : > { %v1757_v20 = vand.u32 4294901760, %v1756_v22  ;;  %v1764_v35 = vand.u32 4294901760, %v1763_v53  ;;  %v1882_v8 = vsub.f32 %v8860_v39, %v10802_v34  ;;  %v10807_v9 = vand.u32 4294901760, %v8866_v49 }
 0x189   : > { %v8961_v30 = vpack.c.bf16 %v1750_v19, %v1743_v6  ;;  %v8969_v51 = vpack.c.bf16 %v1876_v31, %v1869_v0  ;;  %v1889_v6 = vsub.f32 %v8862_v40, %v10804_v7  ;;  %v1770_v28 = vsub.f32 %v8864_v25, %v10806_v2 }
 0x18a   : > { %v10809_v19 = vand.u32 4294901760, %v8869_v33  ;;  %v8978_v22 = vpack.c.bf16 %v1764_v35, %v1757_v20  ;;  %v1883_v53 = vand.u32 4294901760, %v1882_v8  ;;  %v1777_v34 = vsub.f32 %v8866_v49, %v10807_v9 }
 0x18b   : > { %v10810_v0 = vand.u32 4294901760, %v8871_v3  ;;  %v1890_v31 = vand.u32 4294901760, %v1889_v6  ;;  %v1771_v43 = vand.u32 4294901760, %v1770_v28  ;;  %v10814_v20 = vand.u32 4294901760, %v8875_v1 }
 0x18c   : > { %v1896_v7 = vsub.f32 %v8869_v33, %v10809_v19  ;;  %v1778_v2 = vand.u32 4294901760, %v1777_v34  ;;  %v1784_v6 = vsub.f32 %v8873_v5, %v10812_v38  ;;  %v10813_v28 = vand.u32 4294901760, %v8895_v47 }
 0x18d   : > { %v1903_v35 = vsub.f32 %v8871_v3, %v10810_v0  ;;  %v8992_v8 = vpack.c.bf16 %v1890_v31, %v1883_v53  ;;  %v1791_v34 = vsub.f32 %v8875_v1, %v10814_v20  ;;  %v10817_v0 = vand.u32 4294901760, %v8897_v48 }
 0x18e   : > { %v1897_v9 = vand.u32 4294901760, %v1896_v7  ;;  %v8998_v12 = vpack.c.bf16 %v1778_v2, %v1771_v43  ;;  %v1785_v32 = vand.u32 4294901760, %v1784_v6  ;;  %v1910_v7 = vsub.f32 %v8895_v47, %v10813_v28 }
 0x18f   : > { %v1904_v19 = vand.u32 4294901760, %v1903_v35  ;;  %v10818_v53 = vand.u32 4294901760, %v8899_v54  ;;  %v10819_v31 = vand.u32 4294901760, %v8901_v57  ;;  %v1792_v43 = vand.u32 4294901760, %v1791_v34 }
 0x190   : > { %v1917_v2 = vsub.f32 %v8897_v48, %v10817_v0  ;;  %v1911_v35 = vand.u32 4294901760, %v1910_v7 }
 0x191   : > { %v9009_v38 = vpack.c.bf16 %v1904_v19, %v1897_v9  ;;  %v1798_v6 = vsub.f32 %v8899_v54, %v10818_v53  ;;  %v1805_v28 = vsub.f32 %v8901_v57, %v10819_v31  ;;  %v9020_v20 = vpack.c.bf16 %v1792_v43, %v1785_v32 }
 0x192   : > { %v1918_v4 = vand.u32 4294901760, %v1917_v2 }
 0x193   : > { %v1799_v60 = vand.u32 4294901760, %v1798_v6  ;;  %v1806_v9 = vand.u32 4294901760, %v1805_v28  ;;  %v5143_v6 = vld [vmem:[%s10716_s7 + $0x5] ss:$8 sm:$0x3] }
 0x194   : > { %v9022_v19 = vpack.c.bf16 %v1918_v4, %v1911_v35  ;;  %v487_v4 = vlaneseq }
 0x195   : > { %v9024_v34 = vpack.c.bf16 %v1806_v9, %v1799_v60 }
 0x196   : > { %v488_v35 = vshrl.u32 %v487_v4, 7 }
 0x198   : > { %v489_v43 = vsub.s32 0, %v488_v35  ;;  %v493_v9 = vsub.s32 1, %v488_v35 }
 0x19a   : > { %v490_v32 = vrot.slane %v5143_v6, %v489_v43  ;;  %v494_v53 = vrot.slane %v5143_v6, %v493_v9 }
 0x235   : > { %v1023_v31 = vpop.f32.mrb[0].mxu1  ;;  %v1473_v0 = vpop.f32.mrb[0].mxu0 }
 0x236   : > { %v7420_v7 = vadd.f32 %v1023_v31, %v490_v32  ;;  %v1025_v60 = vpop.f32.mrb[1].mxu1  ;;  %v1475_v18 = vpop.f32.mrb[1].mxu0 }
 0x237   : > { %v7422_v14 = vadd.f32 %v1025_v60, %v494_v53 }
 0x238   : > { %v7421_v28 = vadd.f32 %v7420_v7, %v1473_v0 }
 0x239   : > { %v7423_v46 = vadd.f32 %v7422_v14, %v1475_v18  ;;  %v1031_v61 = vpop.f32.mrb[2].mxu1  ;;  %v1480_v2 = vpop.f32.mrb[2].mxu0 }
 0x23a   : > { %v1499_v54 = vmax.f32 %v7421_v28, 0.0  ;;  %v7424_v4 = vadd.f32 %v1031_v61, %v490_v32  ;;  %v1033_v57 = vpop.f32.mrb[3].mxu1  ;;  %v1482_v47 = vpop.f32.mrb[3].mxu0 }
 0x23b   : > { %v1500_v48 = vmax.f32 %v7423_v46, 0.0  ;;  %v7426_v5 = vadd.f32 %v1033_v57, %v494_v53 }
 0x23c   : > { %v9061_v1 = vand.u32 4294901760, %v1499_v54  ;;  %v7425_v43 = vadd.f32 %v7424_v4, %v1480_v2 }
 0x23d   : > { %v9063_v35 = vand.u32 4294901760, %v1500_v48  ;;  %v7427_v6 = vadd.f32 %v7426_v5, %v1482_v47  ;;  %v1039_v31 = vpop.f32.mrb[4].mxu1  ;;  %v1487_v9 = vpop.f32.mrb[4].mxu0 }
 0x23e   : > { %v9066_v60 = vsub.f32 %v1499_v54, %v9061_v1  ;;  %v1501_v18 = vmax.f32 %v7425_v43, 0.0  ;;  %v7428_v14 = vadd.f32 %v1039_v31, %v490_v32  ;;  %v1041_v0 = vpop.f32.mrb[5].mxu1  ;;  %v1489_v7 = vpop.f32.mrb[5].mxu0 }
 0x23f   : > { %v9069_v61 = vsub.f32 %v1500_v48, %v9063_v35  ;;  %v1502_v46 = vmax.f32 %v7427_v6, 0.0  ;;  %v7430_v57 = vadd.f32 %v1041_v0, %v494_v53 }
 0x240   : > { %11107 = vst [vmem:[#allocation22_spill] sm:$0xff] %v9066_v60  ;;  %v10850_v28 = vand.u32 4294901760, %v9066_v60  ;;  %v9072_v2 = vand.u32 4294901760, %v1501_v18  ;;  %v7429_v4 = vadd.f32 %v7428_v14, %v1487_v9 }
 0x241   : > { %v9074_v5 = vand.u32 4294901760, %v1502_v46  ;;  %v7431_v47 = vadd.f32 %v7430_v57, %v1489_v7  ;;  %v1047_v33 = vpop.f32.mrb[6].mxu1  ;;  %v1494_v54 = vpop.f32.mrb[6].mxu0  ;;  %v1637_v43 = vand.u32 4294901760, %v9069_v61 }
 0x242   : > { %v1644_v31 = vsub.f32 %v9066_v60, %v10850_v28  ;;  %v9081_v48 = vsub.f32 %v1501_v18, %v9072_v2  ;;  %v1503_v6 = vmax.f32 %v7429_v4, 0.0  ;;  %v7432_v0 = vadd.f32 %v1047_v33, %v490_v32  ;;  %v1049_v3 = vpop.f32.mrb[7].mxu1  ;;  %v1496_v25 = vpop.f32.mrb[7].mxu0 }
 0x243   : > { %v9084_v9 = vsub.f32 %v1502_v46, %v9074_v5  ;;  %v1504_v14 = vmax.f32 %v7431_v47, 0.0  ;;  %v7434_v7 = vadd.f32 %v1049_v3, %v494_v53  ;;  %v1638_v57 = vsub.f32 %v9069_v61, %v1637_v43 }
 0x244   : > { %v9089_v49 = vand.u32 4294901760, %v1503_v6  ;;  %v7433_v39 = vadd.f32 %v7432_v0, %v1494_v54  ;;  %v10857_v28 = vand.u32 4294901760, %v9081_v48  ;;  %v1645_v60 = vand.u32 4294901760, %v1644_v31 }
 0x245   : > { %v9092_v18 = vand.u32 4294901760, %v1504_v14  ;;  %v7435_v4 = vadd.f32 %v7434_v7, %v1496_v25  ;;  %v1639_v33 = vand.u32 4294901760, %v1638_v57  ;;  %v10858_v32 = vand.u32 4294901760, %v9084_v9 }
 0x246   : > { %v9096_v46 = vsub.f32 %v1503_v6, %v9089_v49  ;;  %v1505_v3 = vmax.f32 %v7433_v39, 0.0  ;;  %v1659_v53 = vsub.f32 %v9081_v48, %v10857_v28  ;;  %v11150_v28 = vld [vmem:[#allocation36_spill] sm:$0xff] }
 0x247   : > { %v9102_v47 = vsub.f32 %v1504_v14, %v9092_v18  ;;  %v1506_v54 = vmax.f32 %v7435_v4, 0.0  ;;  %1640 = vmatprep.mubr.f32.mxu1 %v1639_v33  ;;  %v1653_v25 = vsub.f32 %v9084_v9, %v10858_v32  ;;  %v11151_v32 = vld [vmem:[#allocation37_spill] sm:$0xff] }
 0x248   : > { %v9107_v0 = vand.u32 4294901760, %v1505_v3  ;;  %1646 = vmatmul.mubr.f32.vlgmr.msra.gmra.mrb[8].mxu1 %v1645_v60  ;;  %v10855_v31 = vand.u32 4294901760, %v9096_v46  ;;  %v1660_v57 = vand.u32 4294901760, %v1659_v53 }
 0x249   : > { %v9110_v6 = vand.u32 4294901760, %v1506_v54  ;;  %6687 = vmatpush3.bf16.msra.mxu1 %v8877_v11  ;;  %v1654_v39 = vand.u32 4294901760, %v1653_v25  ;;  %v10856_v7 = vand.u32 4294901760, %v9102_v47 }
 0x24a   : > { %11108 = vst [vmem:[#allocation50_spill] sm:$0xff] %v9107_v0  ;;  %v9115_v14 = vsub.f32 %v1505_v3, %v9107_v0  ;;  %6689 = vmatprep.subr.bf16.mxu1 %v8919_v42  ;;  %v1674_v4 = vsub.f32 %v9096_v46, %v10855_v31  ;;  %v11148_v31 = vld [vmem:[#allocation33_spill] sm:$0xff] }
 0x24b   : > { %v9122_v60 = vsub.f32 %v1506_v54, %v9110_v6  ;;  %1655 = vmatprep.mubr.f32.mxu1 %v1654_v39  ;;  %v1668_v11 = vsub.f32 %v9102_v47, %v10856_v7  ;;  %v11149_v7 = vld [vmem:[#allocation35_spill] sm:$0xff] }
 0x24c   : > { %1661 = vmatmul.mubr.f32.gmra.mrb[10].mxu1 %v1660_v57  ;;  %v10853_v33 = vand.u32 4294901760, %v9115_v14  ;;  %v1675_v53 = vand.u32 4294901760, %v1674_v4  ;;  %v11121_v57 = vld [vmem:[#allocation41_spill] sm:$0xff]  ;;  %v11122_v4 = vld [vmem:[#allocation40_spill] sm:$0xff] }
 0x24d   : > { %6691 = vmatpush3.bf16.msra.mxu1 %v8925_v15  ;;  %v1669_v3 = vand.u32 4294901760, %v1668_v11  ;;  %v10854_v42 = vand.u32 4294901760, %v9122_v60  ;;  %v11123_v11 = vpack.c.bf16 %v11121_v57, %v11122_v4 }
 0x24e   : > { %6693 = vmatprep.subr.bf16.mxu1 %v8932_v21  ;;  %v1689_v54 = vsub.f32 %v9115_v14, %v10853_v33  ;;  %v11113_v21 = vpack.c.bf16 %v11101_v27, %v8648_v36  ;;  %v11146_v33 = vld [vmem:[#allocation34_spill] sm:$0xff] }
 0x24f   : > { %1670 = vmatprep.mubr.f32.mxu1 %v1669_v3  ;;  %v1683_v25 = vsub.f32 %v9122_v60, %v10854_v42  ;;  %v11124_v3 = vld [vmem:[#allocation44_spill] sm:$0xff] }
 0x250   : > { %1676 = vmatmul.mubr.f32.gmra.mrb[12].mxu1 %v1675_v53  ;;  %v1690_v15 = vand.u32 4294901760, %v1689_v54  ;;  %v11125_v53 = vld [vmem:[#allocation42_spill] sm:$0xff]  ;;  %v11147_v42 = vld [vmem:[#allocation32_spill] sm:$0xff] }
 0x251   : > { %6695 = vmatpush3.bf16.msra.mxu1 %v8934_v26  ;;  %v1684_v39 = vand.u32 4294901760, %v1683_v25  ;;  %v11114_v26 = vpack.c.bf16 %v8666_v24, %v8661_v50  ;;  %v11126_v54 = vpack.c.bf16 %v11124_v3, %v11125_v53  ;;  %v11127_v25 = vld [vmem:[#allocation46_spill] sm:$0xff] }
 0x252   : > { %6697 = vmatprep.subr.bf16.mxu1 %v8949_v44  ;;  %v11115_v44 = vpack.c.bf16 %v11106_v62, %v8676_v16 }
 0x253   : > { %1685 = vmatprep.mubr.f32.mxu1 %v1684_v39  ;;  %v11128_v39 = vld [vmem:[#allocation45_spill] sm:$0xff] }
 0x254   : > { %1691 = vmatmul.mubr.f32.gmra.mrb[14].mxu1 %v1690_v15  ;;  %v11129_v15 = vpack.c.bf16 %v11127_v25, %v11128_v39 }
 0x255   : > { %6699 = vmatpush3.bf16.msra.mxu1 %v8961_v30  ;;  %1921 = vmatprep.mubr.f32.mxu1 %v9063_v35  ;;  %v11109_v30 = vpack.c.bf16 %v8580_v17, %v8570_v10 }
 0x256   : > { %6701 = vmatprep.subr.bf16.mxu1 %v8969_v51  ;;  %v11110_v51 = vpack.c.bf16 %v8597_v29, %v8592_v41 }
 0x259   : > { %6703 = vmatpush3.bf16.msra.mxu1 %v8978_v22  ;;  %v11116_v22 = vpack.c.bf16 %v8693_v45, %v8688_v23 }
 0x25a   : > { %6705 = vmatprep.subr.bf16.mxu1 %v8992_v8  ;;  %v11118_v8 = vpack.c.bf16 %v8857_v37, %v8855_v55 }
 0x25d   : > { %6707 = vmatpush3.bf16.msra.mxu1 %v8998_v12  ;;  %v11111_v12 = vpack.c.bf16 %v8613_v52, %v8602_v63 }
 0x25e   : > { %6709 = vmatprep.subr.bf16.mxu1 %v9009_v38  ;;  %v11112_v38 = vpack.c.bf16 %v8639_v56, %v8619_v58 }
 0x261   : > { %6711 = vmatpush3.bf16.msra.mxu1 %v9020_v20  ;;  %v11117_v20 = vpack.c.bf16 %v8853_v13, %v8851_v59 }
 0x262   : > { %6713 = vmatprep.subr.bf16.mxu1 %v9022_v19  ;;  %v11119_v19 = vld [vmem:[#allocation39_spill] sm:$0xff] }
 0x265   : > { %6715 = vmatpush3.bf16.msra.mxu1 %v9024_v34  ;;  %v11120_v34 = vpack.c.bf16 %v8862_v40, %v11119_v19 }
 0x266   : > { %6717 = vmatprep.subr.bf16.mxu1 %v11109_v30  ;;  %v11130_v30 = vld [vmem:[#allocation47_spill] sm:$0xff] }
 0x268   : > { %1923 = vmatmul.mubr.f32.vlgmr.msra.gmra.mrb[16].mxu1 %v9061_v1 }
 0x269   : > { %1928 = vmatprep.mubr.f32.mxu1 %v9074_v5  ;;  %6719 = vmatpush3.bf16.msra.mxu1 %v11110_v51  ;;  %v11131_v51 = vld [vmem:[#allocation43_spill] sm:$0xff] }
 0x26a   : > { %6721 = vmatprep.subr.bf16.mxu1 %v11111_v12  ;;  %v11132_v12 = vpack.c.bf16 %v11130_v30, %v11131_v51 }
 0x26c   : > { %1930 = vmatmul.mubr.f32.gmra.mrb[18].mxu1 %v9072_v2 }
 0x26d   : > { %1935 = vmatprep.mubr.f32.mxu1 %v9092_v18  ;;  %6723 = vmatpush3.bf16.msra.mxu1 %v11112_v38  ;;  %v11133_v38 = vld [vmem:[#allocation49_spill] sm:$0xff] }
 0x26e   : > { %6725 = vmatprep.subr.bf16.mxu1 %v11113_v21  ;;  %v11134_v21 = vld [vmem:[#allocation48_spill] sm:$0xff] }
 0x270   : > { %1937 = vmatmul.mubr.f32.gmra.mrb[20].mxu1 %v9089_v49 }
 0x271   : > { %1942 = vmatprep.mubr.f32.mxu1 %v9110_v6  ;;  %6727 = vmatpush3.bf16.msra.mxu1 %v11114_v26  ;;  %v11135_v26 = vpack.c.bf16 %v11133_v38, %v11134_v21 }
 0x272   : > { %6729 = vmatprep.subr.bf16.mxu1 %v11115_v44  ;;  %v11136_v44 = vld [vmem:[#allocation23_spill] sm:$0xff] }
 0x274   : > { %1944 = vmatmul.mubr.f32.gmra.mrb[22].mxu1 %v9107_v0  ;;  %v11152_v0 = vand.u32 4294901760, %v8570_v10  ;;  %v11160_v10 = vand.u32 4294901760, %v9084_v9 }
 0x275   : > { %6731 = vmatpush3.bf16.msra.mxu1 %v11116_v22  ;;  %2079 = vmatprep.mubr.f32.mxu1 %v9069_v61  ;;  %v11137_v22 = vld [vmem:[#allocation22_spill] sm:$0xff] }
 0x276   : > { %6733 = vmatprep.subr.bf16.mxu1 %v11117_v20  ;;  %v11138_v20 = vld [vmem:[#allocation24_spill] sm:$0xff] }
 0x279   : > { %6735 = vmatpush3.bf16.msra.mxu1 %v11118_v8  ;;  %v11139_v8 = vld [vmem:[#allocation27_spill] sm:$0xff] }
 0x27a   : > { %6737 = vmatprep.subr.bf16.mxu1 %v11120_v34  ;;  %v11140_v34 = vld [vmem:[#allocation28_spill] sm:$0xff] }
 0x27d   : > { %6739 = vmatpush3.bf16.msra.mxu1 %v11123_v11  ;;  %v11141_v11 = vld [vmem:[#allocation25_spill] sm:$0xff] }
 0x27e   : > { %6741 = vmatprep.subr.bf16.mxu1 %v11126_v54  ;;  %v11142_v54 = vld [vmem:[#allocation26_spill] sm:$0xff] }
 0x281   : > { %6743 = vmatpush3.bf16.msra.mxu1 %v11129_v15  ;;  %v11143_v15 = vld [vmem:[#allocation29_spill] sm:$0xff] }
 0x282   : > { %6745 = vmatprep.subr.bf16.mxu1 %v11132_v12  ;;  %v11144_v12 = vld [vmem:[#allocation30_spill] sm:$0xff] }
 0x285   : > { %6747 = vmatpush3.bf16.msra.mxu1 %v11135_v26  ;;  %v11145_v26 = vld [vmem:[#allocation31_spill] sm:$0xff] }
 0x286   : > { %6749 = vmatprep.subr.bf16.mxu1 %v11136_v44 }
 0x288   : > { %2082 = vmatmul.mubr.f32.vlgmr.msra.gmra.mrb[24].mxu1 %v11137_v22 }
 0x289   : > { %2088 = vmatprep.mubr.f32.mxu1 %v9084_v9  ;;  %6751 = vmatpush3.bf16.msra.mxu1 %v11138_v20  ;;  %v11167_v9 = vand.u32 4294901760, %v8661_v50  ;;  %v11174_v50 = vand.u32 4294901760, %v8693_v45  ;;  %v11180_v45 = vand.u32 4294901760, %v11119_v19  ;;  %v11187_v19 = vand.u32 4294901760, %v11127_v25  ;;  %v11193_v25 = vld [vmem:[#allocation30_spill] sm:$0xff] }
 0x28a   : > { %6753 = vmatprep.subr.bf16.mxu1 %v11139_v8 }
 0x28c   : > { %2091 = vmatmul.mubr.f32.gmra.mrb[26].mxu1 %v9081_v48 }
 0x28d   : > { %2097 = vmatprep.mubr.f32.mxu1 %v9102_v47  ;;  %6755 = vmatpush3.bf16.msra.mxu1 %v11140_v34 }
 0x28e   : > { %6757 = vmatprep.subr.bf16.mxu1 %v11141_v11 }
 0x290   : > { %2100 = vmatmul.mubr.f32.gmra.mrb[28].mxu1 %v9096_v46 }
 0x291   : > { %2106 = vmatprep.mubr.f32.mxu1 %v9122_v60  ;;  %6759 = vmatpush3.bf16.msra.mxu1 %v11142_v54 }
 0x292   : > { %6761 = vmatprep.subr.bf16.mxu1 %v11143_v15 }
 0x294   : > { %2109 = vmatmul.mubr.f32.gmra.mrb[30].mxu1 %v9115_v14 }
 0x295   : > { %6763 = vmatpush3.bf16.msra.mxu1 %v11144_v12  ;;  %2213 = vmatprep.mubr.f32.mxu1 %v1637_v43  ;;  %v11153_v12 = vand.u32 4294901760, %v8580_v17  ;;  %v11154_v43 = vld [vmem:[#allocation38_spill] sm:$0xff]  ;;  %v11161_v17 = vand.u32 4294901760, %v8619_v58  ;;  %v11168_v58 = vand.u32 4294901760, %v8666_v24  ;;  %v11175_v24 = vand.u32 4294901760, %v8851_v59 }
 0x296   : > { %6765 = vmatprep.subr.bf16.mxu1 %v11145_v26  ;;  %v11155_v26 = vand.u32 4294901760, %v8592_v41  ;;  %v11162_v41 = vand.u32 4294901760, %v8639_v56  ;;  %v11169_v56 = vand.u32 4294901760, %v8676_v16  ;;  %v11176_v16 = vand.u32 4294901760, %v8853_v13 }
 0x297   : > { %v6780_v61 = vpack.c.bf16 %v11153_v12, %v11152_v0  ;;  %v11182_v13 = vand.u32 4294901760, %v11122_v4  ;;  %v11189_v4 = vand.u32 4294901760, %v11130_v30  ;;  %v11195_v30 = vld [vmem:[#allocation34_spill] sm:$0xff] }
 0x298   : > { %v6786_v0 = vpack.c.bf16 %v11162_v41, %v11161_v17 }
 0x299   : > { %6767 = vmatpush3.bf16.msra.mxu1 %v11146_v33  ;;  %v11156_v33 = vand.u32 4294901760, %v8597_v29  ;;  %v11163_v29 = vand.u32 4294901760, %v8648_v36  ;;  %v11170_v36 = vand.u32 4294901760, %v11106_v62  ;;  %v11177_v62 = vand.u32 4294901760, %v9115_v14 }
 0x29a   : > { %6769 = vmatprep.subr.bf16.mxu1 %v11147_v42  ;;  %v11183_v14 = vand.u32 4294901760, %v11121_v57  ;;  %v11190_v57 = vand.u32 4294901760, %v11134_v21  ;;  %v11198_v21 = vld [vmem:[#allocation35_spill] sm:$0xff] }
 0x29b   : > { %v6782_v42 = vpack.c.bf16 %v11156_v33, %v11155_v26  ;;  %v11184_v26 = vand.u32 4294901760, %v11125_v53  ;;  %v11191_v53 = vand.u32 4294901760, %v11133_v38  ;;  %v11197_v38 = vld [vmem:[#allocation33_spill] sm:$0xff] }
 0x29c   : > { %v6802_v12 = vpack.c.bf16 %v11183_v14, %v11182_v13 }
 0x29d   : > { %6771 = vmatpush3.bf16.msra.mxu1 %v11148_v31  ;;  %v11157_v31 = vand.u32 4294901760, %v8602_v63  ;;  %v11164_v63 = vand.u32 4294901760, %v11101_v27  ;;  %v11171_v27 = vand.u32 4294901760, %v9096_v46  ;;  %v11178_v46 = vand.u32 4294901760, %v8855_v55 }
 0x29e   : > { %6773 = vmatprep.subr.bf16.mxu1 %v11149_v7  ;;  %v11158_v7 = vand.u32 4294901760, %v8613_v52  ;;  %v11165_v52 = vand.u32 4294901760, %v9081_v48  ;;  %v11172_v48 = vand.u32 4294901760, %v9122_v60  ;;  %v11179_v60 = vand.u32 4294901760, %v8857_v37 }
 0x29f   : > { %v6788_v33 = vpack.c.bf16 %v11164_v63, %v11163_v29  ;;  %v11185_v55 = vand.u32 4294901760, %v11124_v3  ;;  %v11186_v37 = vand.u32 4294901760, %v11128_v39  ;;  %v6810_v41 = vpack.c.bf16 %v11191_v53, %v11190_v57  ;;  %v11192_v3 = vld [vmem:[#allocation50_spill] sm:$0xff]  ;;  %v11194_v39 = vld [vmem:[#allocation31_spill] sm:$0xff] }
 0x2a0   : > { %v9352_v29 = vld [vmem:[#allocation11] sm:$0xff] }
 0x2a1   : > { %6775 = vmatpush3.bf16.msra.mxu1 %v11150_v28  ;;  %v6784_v28 = vpack.c.bf16 %v11158_v7, %v11157_v31  ;;  %v6790_v31 = vpack.c.bf16 %v11168_v58, %v11167_v9  ;;  %v9359_v9 = vld [vmem:[#allocation10 + $0x10] sm:$0xff]  ;;  %v9361_v58 = vld [vmem:[#allocation10 + $0x18] sm:$0xff] }
 0x2a2   : > { %6777 = vmatprep.subr.bf16.mxu1 %v11151_v32  ;;  %v11159_v32 = vand.u32 4294901760, %v11137_v22  ;;  %v11181_v22 = vand.u32 4294901760, %v8862_v40  ;;  %v11188_v40 = vand.u32 4294901760, %v11131_v51  ;;  %v11196_v51 = vld [vmem:[#allocation32_spill] sm:$0xff] }
 0x2a4   : > { %v6800_v59 = vpack.c.bf16 %v11181_v22, %v11180_v45  ;;  %v6808_v17 = vpack.c.bf16 %v11189_v4, %v11188_v40  ;;  %v9446_v4 = vld [vmem:[%s10716_s7] ss:$0 sm:$0xff] }
 0x2a5   : > { %6779 = vmatpush3.bf16.msra.mxu1 %v11154_v43 }
 0x2a6   : > { %6781 = vmatprep.subr.bf16.mxu1 %v6780_v61  ;;  %v6804_v61 = vpack.c.bf16 %v11185_v55, %v11184_v26  ;;  %v9432_v26 = vld [vmem:[#allocation10 + $0x38] sm:$0xff]  ;;  %v9434_v55 = vld [vmem:[#allocation11 + $0x30] sm:$0xff] }
 0x2a8   : > { %2217 = vmatmul.mubr.f32.vlgmr.msra.gmra.mrb[32].mxu1 %v11159_v32  ;;  %v11166_v32 = vand.u32 4294901760, %v9102_v47  ;;  %v11173_v47 = vand.u32 4294901760, %v8688_v23  ;;  %v6798_v23 = vpack.c.bf16 %v11179_v60, %v11178_v46 }
 0x2a9   : > { %2224 = vmatprep.mubr.f32.mxu1 %v11160_v10  ;;  %6783 = vmatpush3.bf16.msra.mxu1 %v6782_v42  ;;  %v6796_v42 = vpack.c.bf16 %v11176_v16, %v11175_v24  ;;  %v6806_v10 = vpack.c.bf16 %v11187_v19, %v11186_v37  ;;  %v9380_v24 = vld [vmem:[#allocation10 + $0x28] sm:$0xff]  ;;  %v10867_v37 = vand.u32 4294901760, %v9432_v26  ;;  %v9438_v19 = vld [vmem:[#allocation11 + $0x38] sm:$0xff] }
 0x2aa   : > { %6785 = vmatprep.subr.bf16.mxu1 %v6784_v28  ;;  %v6792_v28 = vpack.c.bf16 %v11170_v36, %v11169_v56  ;;  %v6794_v7 = vpack.c.bf16 %v11174_v50, %v11173_v47  ;;  %v2596_v56 = vand.u32 4294901760, %v9359_v9  ;;  %v10883_v36 = vand.u32 4294901760, %v9361_v58 }
 0x2ab   : > { %v10865_v40 = vand.u32 4294901760, %v9438_v19 }
 0x2ac   : > { %2228 = vmatmul.mubr.f32.gmra.mrb[34].mxu1 %v11165_v52  ;;  %v9356_v52 = vld [vmem:[#allocation11 + $0x8] sm:$0xff]  ;;  %v9397_v60 = vpack.c.bf16 %v10883_v36, %v2596_v56 }
 0x2ad   : > { %2235 = vmatprep.mubr.f32.mxu1 %v11166_v32  ;;  %6787 = vmatpush3.bf16.msra.mxu1 %v6786_v0  ;;  %v3376_v32 = vand.u32 4294901760, %v9352_v29 }
 0x2ae   : > { %6789 = vmatprep.subr.bf16.mxu1 %v6788_v33  ;;  %11203 = vst [vmem:[#allocation40_spill] sm:$0xff] %v9397_v60 }
 0x2b0   : > { %2239 = vmatmul.mubr.f32.gmra.mrb[36].mxu1 %v11171_v27  ;;  %v9368_v27 = vld [vmem:[#allocation11 + $0x18] sm:$0xff] }
 0x2b1   : > { %2246 = vmatprep.mubr.f32.mxu1 %v11172_v48  ;;  %6791 = vmatpush3.bf16.msra.mxu1 %v6790_v31  ;;  %v3379_v31 = vand.u32 4294901760, %v9356_v52  ;;  %v9370_v48 = vld [vmem:[#allocation10 + $0x20] sm:$0xff] }
 0x2b2   : > { %6793 = vmatprep.subr.bf16.mxu1 %v6792_v28  ;;  %v9366_v28 = vld [vmem:[#allocation11 + $0x10] sm:$0xff]  ;;  %v10876_v16 = vand.u32 4294901760, %v9370_v48 }
 0x2b3   : > { %v10882_v50 = vand.u32 4294901760, %v9366_v28  ;;  %v9391_v46 = vpack.c.bf16 %v3379_v31, %v3376_v32 }
 0x2b4   : > { %2250 = vmatmul.mubr.f32.gmra.mrb[38].mxu1 %v11177_v62  ;;  %v9385_v62 = vld [vmem:[#allocation11 + $0x28] sm:$0xff] }
 0x2b5   : > { %6795 = vmatpush3.bf16.msra.mxu1 %v6794_v7  ;;  %2416 = vmatprep.mubr.f32.mxu1 %v9063_v35  ;;  %v10881_v7 = vand.u32 4294901760, %v9368_v27  ;;  %11202 = vst [vmem:[#allocation41_spill] sm:$0xff] %v9391_v46 }
 0x2b6   : > { %6797 = vmatprep.subr.bf16.mxu1 %v6796_v42  ;;  %v9383_v42 = vld [vmem:[#allocation11 + $0x20] sm:$0xff] }
 0x2b7   : > { %v10874_v45 = vand.u32 4294901760, %v9383_v42  ;;  %v9406_v22 = vpack.c.bf16 %v10881_v7, %v10882_v50 }
 0x2b9   : > { %6799 = vmatpush3.bf16.msra.mxu1 %v6798_v23  ;;  %v10875_v23 = vand.u32 4294901760, %v9380_v24  ;;  %11204 = vst [vmem:[#allocation44_spill] sm:$0xff] %v9406_v22 }
 0x2ba   : > { %6801 = vmatprep.subr.bf16.mxu1 %v6800_v59  ;;  %v10873_v59 = vand.u32 4294901760, %v9385_v62 }
 0x2bb   : > { %v9417_v13 = vpack.c.bf16 %v10875_v23, %v10876_v16 }
 0x2bc   : > { %v9424_v14 = vpack.c.bf16 %v10873_v59, %v10874_v45 }
 0x2bd   : > { %6803 = vmatpush3.bf16.msra.mxu1 %v6802_v12  ;;  %11205 = vst [vmem:[#allocation42_spill] sm:$0xff] %v9417_v13  ;;  %v9430_v12 = vld [vmem:[#allocation10 + $0x30] sm:$0xff] }
 0x2be   : > { %6805 = vmatprep.subr.bf16.mxu1 %v6804_v61  ;;  %11206 = vst [vmem:[#allocation46_spill] sm:$0xff] %v9424_v14  ;;  %v10868_v61 = vand.u32 4294901760, %v9430_v12 }
 0x2c1   : > { %6807 = vmatpush3.bf16.msra.mxu1 %v6806_v10  ;;  %v10866_v10 = vand.u32 4294901760, %v9434_v55 }
 0x2c2   : > { %6809 = vmatprep.subr.bf16.mxu1 %v6808_v17  ;;  %v9453_v17 = vpack.c.bf16 %v10867_v37, %v10868_v61  ;;  %v9529_v37 = vld [vmem:[#allocation11 + $0x60] sm:$0xff] }
 0x2c3   : > { %v9459_v53 = vpack.c.bf16 %v10865_v40, %v10866_v10 }
 0x2c4   : > { %11207 = vst [vmem:[#allocation45_spill] sm:$0xff] %v9453_v17 }
 0x2c5   : > { %6811 = vmatpush3.bf16.msra.mxu1 %v6810_v41  ;;  %11208 = vst [vmem:[#allocation47_spill] sm:$0xff] %v9459_v53  ;;  %v9461_v41 = vld [vmem:[#allocation10 + $0x40] sm:$0xff] }
 0x2c6   : > { %6813 = vmatprep.subr.bf16.mxu1 %v11136_v44  ;;  %v11199_v44 = vld [vmem:[#allocation36_spill] sm:$0xff] }
 0x2c8   : > { %2418 = vmatmul.mubr.f32.vlgmr.msra.gmra.mrb[40].mxu1 %v9061_v1 }
 0x2c9   : > { %2423 = vmatprep.mubr.f32.mxu1 %v9074_v5  ;;  %6815 = vmatpush3.bf16.msra.mxu1 %v11138_v20  ;;  %v11200_v20 = vld [vmem:[#allocation37_spill] sm:$0xff] }
 0x2ca   : > { %6817 = vmatprep.subr.bf16.mxu1 %v11139_v8 }
 0x2cc   : > { %2425 = vmatmul.mubr.f32.gmra.mrb[42].mxu1 %v9072_v2 }
 0x2cd   : > { %2430 = vmatprep.mubr.f32.mxu1 %v9092_v18  ;;  %6819 = vmatpush3.bf16.msra.mxu1 %v11140_v34 }
 0x2ce   : > { %6821 = vmatprep.subr.bf16.mxu1 %v11141_v11 }
 0x2d0   : > { %2432 = vmatmul.mubr.f32.gmra.mrb[44].mxu1 %v9089_v49 }
 0x2d1   : > { %2437 = vmatprep.mubr.f32.mxu1 %v9110_v6  ;;  %6823 = vmatpush3.bf16.msra.mxu1 %v11142_v54 }
 0x2d2   : > { %6825 = vmatprep.subr.bf16.mxu1 %v11143_v15 }
 0x2d4   : > { %2439 = vmatmul.mubr.f32.gmra.mrb[46].mxu1 %v11192_v3 }
 0x2d5   : > { %6827 = vmatpush3.bf16.msra.mxu1 %v11193_v25  ;;  %2541 = vmatprep.mubr.f32.mxu1 %v9063_v35 }
 0x2d6   : > { %6829 = vmatprep.subr.bf16.mxu1 %v11194_v39  ;;  %v10864_v39 = vand.u32 4294901760, %v9461_v41 }
 0x2d9   : > { %6831 = vmatpush3.bf16.msra.mxu1 %v11195_v30 }
 0x2da   : > { %6833 = vmatprep.subr.bf16.mxu1 %v11196_v51  ;;  %v9468_v51 = vld [vmem:[#allocation11 + $0x40] sm:$0xff] }
 0x2dd   : > { %6835 = vmatpush3.bf16.msra.mxu1 %v11197_v38  ;;  %v9470_v38 = vld [vmem:[#allocation11 + $0x48] sm:$0xff] }
 0x2de   : > { %6837 = vmatprep.subr.bf16.mxu1 %v11198_v21 }
 0x2e1   : > { %6839 = vmatpush3.bf16.msra.mxu1 %v11199_v44 }
 0x2e2   : > { %6841 = vmatprep.subr.bf16.mxu1 %v11200_v20  ;;  %v10862_v20 = vand.u32 4294901760, %v9468_v51 }
 0x2e5   : > { %6843 = vmatpush3.bf16.msra.mxu1 %v11154_v43 }
 0x2e6   : > { %7037 = vmatprep.subr.bf16.mxu1 %v9391_v46 }
 0x2e8   : > { %2543 = vmatmul.mubr.f32.vlgmr.msra.gmra.mrb[48].mxu1 %v9061_v1 }
 0x2e9   : > { %2548 = vmatprep.mubr.f32.mxu1 %v9074_v5  ;;  %7039 = vmatpush3.bf16.msra.mxu1 %v9391_v46 }
 0x2ea   : > { %7041 = vmatprep.subr.bf16.mxu1 %v9406_v22 }
 0x2ec   : > { %2550 = vmatmul.mubr.f32.gmra.mrb[50].mxu1 %v9072_v2 }
 0x2ed   : > { %2555 = vmatprep.mubr.f32.mxu1 %v9092_v18  ;;  %7043 = vmatpush3.bf16.msra.mxu1 %v9406_v22 }
 0x2ee   : > { %7045 = vmatprep.subr.bf16.mxu1 %v9424_v14 }
 0x2f0   : > { %2557 = vmatmul.mubr.f32.gmra.mrb[52].mxu1 %v9089_v49  ;;  %v9348_v49 = vld [vmem:[#allocation10] sm:$0xff] }
 0x2f1   : > { %2562 = vmatprep.mubr.f32.mxu1 %v9110_v6  ;;  %v9350_v6 = vld [vmem:[#allocation10 + $0x8] sm:$0xff]  ;;  %v2590_v63 = vand.u32 4294901760, %v9348_v49  ;;  %7047 = vmatpush3.bf16.msra.mxu1 %v9424_v14 }
 0x2f2   : > { %v2593_v33 = vand.u32 4294901760, %v9350_v6  ;;  %7049 = vmatprep.subr.bf16.mxu1 %v9459_v53 }
 0x2f3   : > { %v9552_v23 = vsub.f32 %v9348_v49, %v2590_v63  ;;  %v9572_v49 = vld [vmem:[#allocation10 + $0x70] sm:$0xff] }
 0x2f4   : > { %2564 = vmatmul.mubr.f32.gmra.mrb[54].mxu1 %v11192_v3  ;;  %v9376_v47 = vpack.c.bf16 %v2593_v33, %v2590_v63  ;;  %v9463_v3 = vld [vmem:[#allocation10 + $0x48] sm:$0xff]  ;;  %v9574_v63 = vld [vmem:[#allocation10 + $0x78] sm:$0xff] }
 0x2f5   : > { %v10863_v30 = vand.u32 4294901760, %v9463_v3  ;;  %7051 = vmatpush3.bf16.msra.mxu1 %v9459_v53 }
 0x2f6   : > { %11201 = vst [vmem:[#allocation39_spill] sm:$0xff] %v9376_v47  ;;  %6845 = vmatprep.subr.bf16.mxu0 %v9376_v47 }
 0x2f7   : > { %6847 = vmatpush3.bf16.msra.mxu0 %v9376_v47 }
 0x2f8   : > { %6849 = vmatprep.subr.bf16.mxu0 %v9397_v60 }
 0x2fb   : > { %6851 = vmatpush3.bf16.msra.mxu0 %v9397_v60 }
 0x2fc   : > { %6853 = vmatprep.subr.bf16.mxu0 %v9417_v13 }
 0x2ff   : > { %6855 = vmatpush3.bf16.msra.mxu0 %v9417_v13 }
 0x300   : > { %6857 = vmatprep.subr.bf16.mxu0 %v9453_v17 }
 0x303   : > { %6859 = vmatpush3.bf16.msra.mxu0 %v9453_v17  ;;  %v11244_v17 = vand.u32 4294901760, %v9470_v38 }
 0x31b   : > { %v5184_v35 = vpop.f32.mrb[8].mxu1 }
 0x31c   : > { %v5185_v8 = vpop.f32.mrb[9].mxu1 }
 0x31d   : > { %v9340_v34 = vadd.f32 %v5185_v8, %v5184_v35  ;;  %v10861_v35 = vand.u32 4294901760, %v9470_v38  ;;  %v9483_v8 = vpack.c.bf16 %v10863_v30, %v10864_v39 }
 0x31f   : > { %v5187_v11 = vpop.f32.mrb[10].mxu1  ;;  %v1648_v21 = vadd.f32 %v9340_v34, %v9446_v4  ;;  %11209 = vst [vmem:[#allocation43_spill] sm:$0xff] %v9483_v8  ;;  %6861 = vmatprep.subr.bf16.mxu0 %v9483_v8 }
 0x320   : > { %v5188_v54 = vpop.f32.mrb[11].mxu1  ;;  %6863 = vmatpush3.bf16.msra.mxu0 %v9483_v8 }
 0x321   : > { %v9342_v15 = vadd.f32 %v5188_v54, %v5187_v11  ;;  %v9491_v54 = vpack.c.bf16 %v10861_v35, %v10862_v20 }
 0x323   : > { %v5190_v1 = vpop.f32.mrb[12].mxu1  ;;  %11210 = vst [vmem:[#allocation49_spill] sm:$0xff] %v9491_v54  ;;  %v1663_v35 = vadd.f32 %v9342_v15, %v9446_v4  ;;  %7053 = vmatprep.subr.bf16.mxu1 %v9491_v54 }
 0x324   : > { %v5191_v5 = vpop.f32.mrb[13].mxu1  ;;  %7055 = vmatpush3.bf16.msra.mxu1 %v9491_v54 }
 0x325   : > { %v9344_v43 = vadd.f32 %v5191_v5, %v5190_v1  ;;  %v9493_v1 = vld [vmem:[#allocation10 + $0x50] sm:$0xff]  ;;  %v9495_v5 = vld [vmem:[#allocation10 + $0x58] sm:$0xff] }
 0x327   : > { %v5193_v2 = vpop.f32.mrb[14].mxu1 }
 0x328   : > { %v5194_v18 = vpop.f32.mrb[15].mxu1 }
 0x329   : > { %v9346_v0 = vadd.f32 %v5194_v18, %v5193_v2  ;;  %v9497_v2 = vld [vmem:[#allocation11 + $0x50] sm:$0xff] }
 0x33b   : > { %v5228_v57 = vpop.f32.mrb[16].mxu1 }
 0x33c   : > { %v5229_v25 = vpop.f32.mrb[17].mxu1 }
 0x33d   : > { %v5230_v44 = vadd.f32 %v5229_v25, %v5228_v57  ;;  %v10870_v57 = vand.u32 4294901760, %v9493_v1  ;;  %v10869_v25 = vand.u32 4294901760, %v9495_v5 }
 0x33f   : > { %v9485_v11 = vadd.f32 %v5230_v44, %v1648_v21  ;;  %v5231_v34 = vpop.f32.mrb[18].mxu1  ;;  %v9502_v21 = vld [vmem:[#allocation11 + $0x58] sm:$0xff]  ;;  %v10872_v44 = vand.u32 4294901760, %v9497_v2  ;;  %v9515_v39 = vpack.c.bf16 %v10869_v25, %v10870_v57  ;;  %v10879_v57 = vand.u32 4294901760, %v9529_v37 }
 0x340   : > { %v5232_v18 = vpop.f32.mrb[19].mxu1  ;;  %v10871_v30 = vand.u32 4294901760, %v9502_v21 }
 0x341   : > { %v5233_v20 = vadd.f32 %v5232_v18, %v5231_v34  ;;  %11211 = vst [vmem:[#allocation48_spill] sm:$0xff] %v9515_v39  ;;  %v9525_v34 = vld [vmem:[#allocation10 + $0x60] sm:$0xff]  ;;  %v9527_v18 = vld [vmem:[#allocation10 + $0x68] sm:$0xff]  ;;  %6865 = vmatprep.subr.bf16.mxu0 %v9515_v39 }
 0x342   : > { %v9523_v15 = vpack.c.bf16 %v10871_v30, %v10872_v44  ;;  %v10880_v25 = vand.u32 4294901760, %v9525_v34  ;;  %v1678_v30 = vadd.f32 %v9344_v43, %v9446_v4  ;;  %6867 = vmatpush3.bf16.msra.mxu0 %v9515_v39  ;;  %v9557_v43 = vsub.f32 %v9350_v6, %v2593_v33  ;;  %v9576_v6 = vld [vmem:[#allocation11 + $0x70] sm:$0xff] }
 0x343   : > { %v9517_v40 = vadd.f32 %v5233_v20, %v1663_v35  ;;  %v5234_v10 = vpop.f32.mrb[20].mxu1  ;;  %v10877_v20 = vand.u32 4294901760, %v9527_v18  ;;  %v9534_v35 = vld [vmem:[#allocation11 + $0x68] sm:$0xff]  ;;  %v1693_v33 = vadd.f32 %v9346_v0, %v9446_v4  ;;  %v10886_v0 = vand.u32 4294901760, %v9552_v23 }
 0x344   : > { %11212 = vst [vmem:[#allocation23_spill] sm:$0xff] %v9523_v15  ;;  %v5235_v61 = vpop.f32.mrb[21].mxu1  ;;  %7057 = vmatprep.subr.bf16.mxu1 %v9523_v15  ;;  %v10878_v59 = vand.u32 4294901760, %v9534_v35  ;;  %v11228_v39 = vand.u32 4294901760, %v9430_v12 }
 0x345   : > { %v5236_v44 = vadd.f32 %v5235_v61, %v5234_v10  ;;  %7059 = vmatpush3.bf16.msra.mxu1 %v9523_v15  ;;  %v9547_v45 = vpack.c.bf16 %v10877_v20, %v10880_v25  ;;  %v9562_v61 = vsub.f32 %v9352_v29, %v3376_v32  ;;  %v9581_v29 = vsub.f32 %v9356_v52, %v3379_v31 }
 0x346   : > { %v9570_v20 = vpack.c.bf16 %v10878_v59, %v10879_v57  ;;  %v9588_v59 = vld [vmem:[#allocation11 + $0x78] sm:$0xff]  ;;  %v10887_v57 = vand.u32 4294901760, %v9576_v6  ;;  %v10888_v31 = vand.u32 4294901760, %v9557_v43  ;;  %v2714_v36 = vsub.f32 %v9552_v23, %v10886_v0 }
 0x347   : > { %11213 = vst [vmem:[#allocation22_spill] sm:$0xff] %v9547_v45  ;;  %v9564_v10 = vadd.f32 %v5236_v44, %v1678_v30  ;;  %v5237_v16 = vpop.f32.mrb[22].mxu1  ;;  %6869 = vmatprep.subr.bf16.mxu0 %v9547_v45  ;;  %v10890_v30 = vand.u32 4294901760, %v9572_v49  ;;  %v10884_v44 = vand.u32 4294901760, %v9574_v63  ;;  %v10885_v52 = vand.u32 4294901760, %v9588_v59 }
 0x348   : > { %11214 = vst [vmem:[#allocation24_spill] sm:$0xff] %v9570_v20  ;;  %v5238_v32 = vpop.f32.mrb[23].mxu1  ;;  %7061 = vmatprep.subr.bf16.mxu1 %v9570_v20  ;;  %6871 = vmatpush3.bf16.msra.mxu0 %v9547_v45  ;;  %v11217_v0 = vand.u32 4294901760, %v9361_v58 }
 0x349   : > { %v5239_v25 = vadd.f32 %v5238_v32, %v5237_v16  ;;  %7063 = vmatpush3.bf16.msra.mxu1 %v9570_v20  ;;  %v9601_v4 = vpack.c.bf16 %v10884_v44, %v10890_v30  ;;  %v10889_v16 = vand.u32 4294901760, %v9562_v61  ;;  %v10891_v32 = vand.u32 4294901760, %v9581_v29 }
 0x34a   : > { %v9611_v50 = vpack.c.bf16 %v10885_v52, %v10887_v57  ;;  %v2721_v44 = vsub.f32 %v9557_v43, %v10888_v31  ;;  %v9629_v52 = vsub.f32 %v9359_v9, %v2596_v56  ;;  %v9634_v57 = vsub.f32 %v9361_v58, %v11217_v0 }
 0x34b   : > { %11215 = vst [vmem:[#allocation27_spill] sm:$0xff] %v9601_v4  ;;  %v9605_v7 = vadd.f32 %v5239_v25, %v1693_v33  ;;  %6873 = vmatprep.subr.bf16.mxu0 %v9601_v4  ;;  %v3500_v25 = vsub.f32 %v9562_v61, %v10889_v16  ;;  %v3507_v33 = vsub.f32 %v9581_v29, %v10891_v32  ;;  %v2715_v31 = vand.u32 4294901760, %v2714_v36 }
 0x34c   : > { %11216 = vst [vmem:[#allocation28_spill] sm:$0xff] %v9611_v50  ;;  %7065 = vmatprep.subr.bf16.mxu1 %v9611_v50  ;;  %6875 = vmatpush3.bf16.msra.mxu0 %v9601_v4  ;;  %v2722_v16 = vand.u32 4294901760, %v2721_v44  ;;  %v11218_v30 = vand.u32 4294901760, %v9366_v28  ;;  %v11219_v20 = vand.u32 4294901760, %v9368_v27  ;;  %v10899_v0 = vand.u32 4294901760, %v9629_v52 }
 0x34d   : > { %7067 = vmatpush3.bf16.msra.mxu1 %v9611_v50  ;;  %v3501_v58 = vand.u32 4294901760, %v3500_v25  ;;  %v3508_v56 = vand.u32 4294901760, %v3507_v33  ;;  %v10898_v4 = vand.u32 4294901760, %v9634_v57 }
 0x34e   : > { %v9641_v32 = vsub.f32 %v9366_v28, %v11218_v30  ;;  %v9646_v9 = vsub.f32 %v9368_v27, %v11219_v20  ;;  %v9651_v36 = vpack.c.bf16 %v2722_v16, %v2715_v31  ;;  %v11220_v30 = vand.u32 4294901760, %v9370_v48 }
 0x34f   : > { %v9660_v27 = vpack.c.bf16 %v3508_v56, %v3501_v58  ;;  %v2728_v20 = vsub.f32 %v9629_v52, %v10899_v0  ;;  %v2735_v31 = vsub.f32 %v9634_v57, %v10898_v4  ;;  %v11222_v16 = vand.u32 4294901760, %v9380_v24 }
 0x350   : > { %v10900_v44 = vand.u32 4294901760, %v9641_v32  ;;  %v10903_v28 = vand.u32 4294901760, %v9646_v9  ;;  %v9658_v45 = vsub.f32 %v9370_v48, %v11220_v30  ;;  %6877 = vmatprep.subr.bf16.mxu0 %v9651_v36  ;;  %v11224_v56 = vand.u32 4294901760, %v9383_v42 }
 0x351   : > { %v9671_v25 = vsub.f32 %v9380_v24, %v11222_v16  ;;  %7069 = vmatprep.subr.bf16.mxu1 %v9660_v27  ;;  %v2729_v24 = vand.u32 4294901760, %v2728_v20  ;;  %v2736_v16 = vand.u32 4294901760, %v2735_v31  ;;  %v11226_v0 = vand.u32 4294901760, %v9385_v62 }
 0x352   : > { %11221 = vst [vmem:[#allocation25_spill] sm:$0xff] %v9658_v45  ;;  %v3514_v48 = vsub.f32 %v9641_v32, %v10900_v44  ;;  %v3521_v33 = vsub.f32 %v9646_v9, %v10903_v28  ;;  %v10909_v58 = vand.u32 4294901760, %v9658_v45  ;;  %v9684_v30 = vsub.f32 %v9383_v42, %v11224_v56 }
 0x353   : > { %11223 = vst [vmem:[#allocation26_spill] sm:$0xff] %v9671_v25  ;;  %v10908_v4 = vand.u32 4294901760, %v9671_v25  ;;  %v9691_v44 = vsub.f32 %v9385_v62, %v11226_v0  ;;  %v9697_v56 = vpack.c.bf16 %v2736_v16, %v2729_v24  ;;  %v9706_v62 = vsub.f32 %v9430_v12, %v11228_v39 }
 0x354   : > { %11225 = vst [vmem:[#allocation29_spill] sm:$0xff] %v9684_v30  ;;  %v3515_v50 = vand.u32 4294901760, %v3514_v48  ;;  %v3522_v28 = vand.u32 4294901760, %v3521_v33  ;;  %v2742_v15 = vsub.f32 %v9658_v45, %v10909_v58  ;;  %v10910_v42 = vand.u32 4294901760, %v9684_v30 }
 0x355   : > { %11227 = vst [vmem:[#allocation38_spill] sm:$0xff] %v9691_v44  ;;  %v2749_v20 = vsub.f32 %v9671_v25, %v10908_v4  ;;  %v10911_v31 = vand.u32 4294901760, %v9691_v44  ;;  %11229 = vst [vmem:[#allocation50_spill] sm:$0xff] %v9706_v62  ;;  %v11230_v24 = vand.u32 4294901760, %v9432_v26  ;;  %v11237_v54 = vand.u32 4294901760, %v9706_v62 }
 0x356   : > { %v9708_v0 = vpack.c.bf16 %v3522_v28, %v3515_v50  ;;  %v2743_v48 = vand.u32 4294901760, %v2742_v15  ;;  %v3528_v33 = vsub.f32 %v9684_v30, %v10910_v42  ;;  %v11232_v50 = vand.u32 4294901760, %v9434_v55 }
 0x357   : > { %v9716_v16 = vsub.f32 %v9432_v26, %v11230_v24  ;;  %v2750_v4 = vand.u32 4294901760, %v2749_v20  ;;  %v3535_v58 = vsub.f32 %v9691_v44, %v10911_v31  ;;  %v11233_v42 = vand.u32 4294901760, %v9438_v19 }
 0x358   : > { %v9725_v39 = vsub.f32 %v9434_v55, %v11232_v50  ;;  %v3529_v15 = vand.u32 4294901760, %v3528_v33  ;;  %v11235_v20 = vand.u32 4294901760, %v9461_v41  ;;  %v2756_v55 = vsub.f32 %v9706_v62, %v11237_v54 }
 0x359   : > { %11231 = vst [vmem:[#allocation30_spill] sm:$0xff] %v9716_v16  ;;  %v10914_v28 = vand.u32 4294901760, %v9716_v16  ;;  %v9731_v26 = vsub.f32 %v9438_v19, %v11233_v42  ;;  %v9738_v31 = vpack.c.bf16 %v2750_v4, %v2743_v48  ;;  %v3536_v12 = vand.u32 4294901760, %v3535_v58 }
 0x35a   : > { %v9736_v24 = vsub.f32 %v9461_v41, %v11235_v20  ;;  %v10919_v33 = vand.u32 4294901760, %v9725_v39  ;;  %v11238_v41 = vand.u32 4294901760, %v9463_v3  ;;  %v2757_v48 = vand.u32 4294901760, %v2756_v55 }
 0x35b   : > { %11234 = vst [vmem:[#allocation31_spill] sm:$0xff] %v9731_v26  ;;  %v2763_v50 = vsub.f32 %v9716_v16, %v10914_v28  ;;  %v9754_v58 = vpack.c.bf16 %v3536_v12, %v3529_v15  ;;  %v11240_v20 = vand.u32 4294901760, %v9468_v51  ;;  %v5272_v19 = vpop.f32.mrb[24].mxu1  ;;  %v11242_v42 = vand.u32 4294901760, %v9731_v26 }
 0x35c   : > { %11236 = vst [vmem:[#allocation34_spill] sm:$0xff] %v9736_v24  ;;  %v9752_v4 = vsub.f32 %v9463_v3, %v11238_v41  ;;  %v3542_v54 = vsub.f32 %v9725_v39, %v10919_v33  ;;  %v11243_v3 = vand.u32 4294901760, %v9736_v24  ;;  %v5273_v55 = vpop.f32.mrb[25].mxu1 }
 0x35d   : > { %v9762_v28 = vsub.f32 %v9468_v51, %v11240_v20  ;;  %v2764_v8 = vand.u32 4294901760, %v2763_v50  ;;  %v3549_v53 = vsub.f32 %v9731_v26, %v11242_v42  ;;  %v9775_v51 = vsub.f32 %v9470_v38, %v11244_v17 }
 0x35e   : > { %11239 = vst [vmem:[#allocation32_spill] sm:$0xff] %v9752_v4  ;;  %v2770_v12 = vsub.f32 %v9736_v24, %v11243_v3  ;;  %v10929_v15 = vand.u32 4294901760, %v9752_v4  ;;  %v3543_v41 = vand.u32 4294901760, %v3542_v54  ;;  %v11246_v50 = vand.u32 4294901760, %v9493_v1 }
 0x35f   : > { %11241 = vst [vmem:[#allocation33_spill] sm:$0xff] %v9762_v28  ;;  %v10928_v33 = vand.u32 4294901760, %v9762_v28  ;;  %11245 = vst [vmem:[#allocation35_spill] sm:$0xff] %v9775_v51  ;;  %v5274_v42 = vadd.f32 %v5273_v55, %v5272_v19  ;;  %v9782_v14 = vpack.c.bf16 %v2764_v8, %v2757_v48  ;;  %v3550_v3 = vand.u32 4294901760, %v3549_v53  ;;  %v5275_v19 = vpop.f32.mrb[26].mxu1 }
 0x360   : > { %v9780_v20 = vsub.f32 %v9493_v1, %v11246_v50  ;;  %v2771_v13 = vand.u32 4294901760, %v2770_v12  ;;  %v2777_v54 = vsub.f32 %v9752_v4, %v10929_v15  ;;  %v10930_v17 = vand.u32 4294901760, %v9775_v51  ;;  %v5276_v50 = vpop.f32.mrb[27].mxu1 }
 0x361   : > { %v3556_v22 = vsub.f32 %v9762_v28, %v10928_v33  ;;  %v9793_v1 = vadd.f32 %v5274_v42, %v9485_v11  ;;  %v9795_v8 = vpack.c.bf16 %v3550_v3, %v3543_v41  ;;  %v11248_v53 = vand.u32 4294901760, %v9495_v5 }
 0x362   : > { %11247 = vst [vmem:[#allocation36_spill] sm:$0xff] %v9780_v20  ;;  %v10933_v38 = vand.u32 4294901760, %v9780_v20  ;;  %v11250_v12 = vand.u32 4294901760, %v9497_v2  ;;  %v2778_v33 = vand.u32 4294901760, %v2777_v54  ;;  %v3563_v11 = vsub.f32 %v9775_v51, %v10930_v17 }
 0x363   : > { %v9800_v48 = vsub.f32 %v9495_v5, %v11248_v53  ;;  %v3557_v15 = vand.u32 4294901760, %v3556_v22  ;;  %v5277_v42 = vadd.f32 %v5276_v50, %v5275_v19  ;;  %v11252_v53 = vand.u32 4294901760, %v9502_v21  ;;  %v5278_v50 = vpop.f32.mrb[28].mxu1 }
 0x364   : > { %v9805_v55 = vsub.f32 %v9497_v2, %v11250_v12  ;;  %v2784_v41 = vsub.f32 %v9780_v20, %v10933_v38  ;;  %v9820_v54 = vpack.c.bf16 %v2778_v33, %v2771_v13  ;;  %v3564_v22 = vand.u32 4294901760, %v3563_v11  ;;  %v5279_v33 = vpop.f32.mrb[29].mxu1 }
 0x365   : > { %11249 = vst [vmem:[#allocation37_spill] sm:$0xff] %v9800_v48  ;;  %v10934_v5 = vand.u32 4294901760, %v9800_v48  ;;  %v9818_v2 = vsub.f32 %v9502_v21, %v11252_v53  ;;  %v11254_v17 = vand.u32 4294901760, %v9525_v34  ;;  %v9828_v19 = vadd.f32 %v5277_v42, %v9517_v40 }
 0x366   : > { %11251 = vst [vmem:[#allocation51_spill] sm:$0xff] %v9805_v55  ;;  %v10935_v3 = vand.u32 4294901760, %v9805_v55  ;;  %v2785_v12 = vand.u32 4294901760, %v2784_v41  ;;  %v9837_v11 = vpack.c.bf16 %v3564_v22, %v3557_v15  ;;  %v11258_v41 = vand.u32 4294901760, %v9529_v37 }
 0x367   : > { %11253 = vst [vmem:[#allocation52_spill] sm:$0xff] %v9818_v2  ;;  %v9825_v60 = vsub.f32 %v9525_v34, %v11254_v17  ;;  %v2791_v38 = vsub.f32 %v9800_v48, %v10934_v5  ;;  %v10938_v21 = vand.u32 4294901760, %v9818_v2  ;;  %v11256_v17 = vand.u32 4294901760, %v9527_v18 }
 0x368   : > { %v3570_v13 = vsub.f32 %v9805_v55, %v10935_v3  ;;  %v9848_v42 = vsub.f32 %v9529_v37, %v11258_v41  ;;  %v5280_v53 = vadd.f32 %v5279_v33, %v5278_v50  ;;  %v5281_v50 = vpop.f32.mrb[30].mxu1  ;;  %v11263_v41 = vand.u32 4294901760, %v9572_v49 }
 0x369   : > { %11255 = vst [vmem:[#allocation53_spill] sm:$0xff] %v9825_v60  ;;  %v10939_v34 = vand.u32 4294901760, %v9825_v60  ;;  %v9843_v40 = vsub.f32 %v9527_v18, %v11256_v17  ;;  %v2792_v5 = vand.u32 4294901760, %v2791_v38  ;;  %v3577_v15 = vsub.f32 %v9818_v2, %v10938_v21 }
 0x36a   : > { %11259 = vst [vmem:[#allocation55_spill] sm:$0xff] %v9848_v42  ;;  %v3571_v3 = vand.u32 4294901760, %v3570_v13  ;;  %v11260_v17 = vand.u32 4294901760, %v9534_v35  ;;  %v2102_v38 = vadd.f32 %v5280_v53, %v9564_v10  ;;  %v9869_v21 = vsub.f32 %v9572_v49, %v11263_v41 }
 0x36b   : > { %11257 = vst [vmem:[#allocation54_spill] sm:$0xff] %v9843_v40  ;;  %v2798_v22 = vsub.f32 %v9825_v60, %v10939_v34  ;;  %v9864_v13 = vpack.c.bf16 %v2792_v5, %v2785_v12  ;;  %v3578_v33 = vand.u32 4294901760, %v3577_v15  ;;  %v5282_v34 = vpop.f32.mrb[31].mxu1  ;;  %v11265_v18 = vand.u32 4294901760, %v9843_v40 }
 0x36c   : > { %v9861_v37 = vsub.f32 %v9534_v35, %v11260_v17  ;;  %11264 = vst [vmem:[#allocation58_spill] sm:$0xff] %v9869_v21  ;;  %v11266_v35 = vand.u32 4294901760, %v9848_v42  ;;  %v5283_v5 = vadd.f32 %v5282_v34, %v5281_v50  ;;  %v10943_v53 = vand.u32 4294901760, %v9869_v21 }
 0x36d   : > { %11262 = vst [vmem:[#allocation57_spill] sm:$0xff] %v9864_v13  ;;  %v2799_v46 = vand.u32 4294901760, %v2798_v22  ;;  %v2805_v47 = vsub.f32 %v9843_v40, %v11265_v18  ;;  %v9878_v12 = vpack.c.bf16 %v3578_v33, %v3571_v3  ;;  %v11267_v49 = vand.u32 4294901760, %v9574_v63 }
 0x36e   : > { %11261 = vst [vmem:[#allocation56_spill] sm:$0xff] %v9861_v37  ;;  %v3584_v17 = vsub.f32 %v9848_v42, %v11266_v35  ;;  %v10947_v10 = vand.u32 4294901760, %v9861_v37  ;;  %v11269_v35 = vand.u32 4294901760, %v9576_v6  ;;  %v2111_v3 = vadd.f32 %v5283_v5, %v9605_v7 }
 0x36f   : > { %v9884_v15 = vsub.f32 %v9574_v63, %v11267_v49  ;;  %v2806_v22 = vand.u32 4294901760, %v2805_v47  ;;  %v2812_v34 = vsub.f32 %v9869_v21, %v10943_v53  ;;  %v11271_v47 = vand.u32 4294901760, %v9588_v59 }
 0x370   : > { %v3585_v41 = vand.u32 4294901760, %v3584_v17  ;;  %v3591_v18 = vsub.f32 %v9861_v37, %v10947_v10  ;;  %v9892_v13 = vsub.f32 %v9576_v6, %v11269_v35 }
 0x371   : > { %11268 = vst [vmem:[#allocation59_spill] sm:$0xff] %v9884_v15  ;;  %v10946_v63 = vand.u32 4294901760, %v9884_v15  ;;  %v9902_v50 = vsub.f32 %v9588_v59, %v11271_v47  ;;  %v9904_v33 = vpack.c.bf16 %v2806_v22, %v2799_v46  ;;  %v2813_v6 = vand.u32 4294901760, %v2812_v34 }
 0x372   : > { %11270 = vst [vmem:[#allocation60_spill] sm:$0xff] %v9892_v13  ;;  %v3592_v17 = vand.u32 4294901760, %v3591_v18  ;;  %v10945_v49 = vand.u32 4294901760, %v9892_v13  ;;  %v9921_v22 = vpack.c.bf16 %v9557_v43, %v9552_v23  ;;  %v9925_v18 = vpack.c.bf16 %v9581_v29, %v9562_v61 }
 0x373   : > { %11272 = vst [vmem:[#allocation61_spill] sm:$0xff] %v9902_v50  ;;  %v2819_v7 = vsub.f32 %v9884_v15, %v10946_v63  ;;  %v10944_v5 = vand.u32 4294901760, %v9902_v50 }
 0x374   : > { %v9911_v35 = vpack.c.bf16 %v3592_v17, %v3585_v41  ;;  %v3598_v53 = vsub.f32 %v9892_v13, %v10945_v49  ;;  %v9941_v49 = vpack.c.bf16 %v9671_v25, %v9658_v45  ;;  %v9958_v25 = vpack.c.bf16 %v9752_v4, %v9736_v24 }
 0x375   : > { %v2820_v59 = vand.u32 4294901760, %v2819_v7  ;;  %v3605_v46 = vsub.f32 %v9902_v50, %v10944_v5  ;;  %v9933_v7 = vpack.c.bf16 %v9634_v57, %v9629_v52  ;;  %v9937_v5 = vpack.c.bf16 %v9646_v9, %v9641_v32 }
 0x376   : > { %v3599_v34 = vand.u32 4294901760, %v3598_v53  ;;  %v9945_v53 = vpack.c.bf16 %v9691_v44, %v9684_v30  ;;  %v9962_v44 = vpack.c.bf16 %v9775_v51, %v9762_v28  ;;  %v9975_v51 = vpack.c.bf16 %v9843_v40, %v9825_v60 }
 0x377   : > { %v9927_v41 = vpack.c.bf16 %v2820_v59, %v2813_v6  ;;  %v3606_v47 = vand.u32 4294901760, %v3605_v46  ;;  %v9949_v59 = vpack.c.bf16 %v9716_v16, %v9706_v62  ;;  %v9953_v46 = vpack.c.bf16 %v9731_v26, %v9725_v39 }
 0x378   : > { %v9967_v26 = vpack.c.bf16 %v9800_v48, %v9780_v20  ;;  %v9983_v48 = vpack.c.bf16 %v9884_v15, %v9869_v21 }
 0x379   : > { %v9929_v17 = vpack.c.bf16 %v3606_v47, %v3599_v34 }
 0x37b   : > { %v5316_v6 = vpop.f32.mrb[32].mxu1 }
 0x37c   : > { %v5317_v34 = vpop.f32.mrb[33].mxu1 }
 0x37d   : > { %v5318_v47 = vadd.f32 %v5317_v34, %v5316_v6 }
 0x37f   : > { %v2219_v63 = vadd.f32 %v5318_v47, %v9793_v1  ;;  %v5319_v10 = vpop.f32.mrb[34].mxu1  ;;  %v9971_v1 = vpack.c.bf16 %v9818_v2, %v9805_v55 }
 0x380   : > { %v5320_v30 = vpop.f32.mrb[35].mxu1 }
 0x381   : > { %v5321_v16 = vadd.f32 %v5320_v30, %v5319_v10  ;;  %v9979_v30 = vpack.c.bf16 %v9861_v37, %v9848_v42 }
 0x383   : > { %v2230_v62 = vadd.f32 %v5321_v16, %v9828_v19  ;;  %v5322_v45 = vpop.f32.mrb[36].mxu1 }
 0x384   : > { %v5323_v6 = vpop.f32.mrb[37].mxu1 }
 0x385   : > { %v5324_v34 = vadd.f32 %v5323_v6, %v5322_v45  ;;  %v9987_v45 = vpack.c.bf16 %v9902_v50, %v9892_v13 }
 0x387   : > { %v2241_v47 = vadd.f32 %v5324_v34, %v2102_v38  ;;  %v5325_v4 = vpop.f32.mrb[38].mxu1 }
 0x388   : > { %v5326_v16 = vpop.f32.mrb[39].mxu1 }
 0x389   : > { %v5327_v19 = vadd.f32 %v5326_v16, %v5325_v4 }
 0x38b   : > { %v2252_v10 = vadd.f32 %v5327_v19, %v2111_v3 }
 0x39b   : > { %v5360_v38 = vpop.f32.mrb[40].mxu1 }
 0x39c   : > { %v5361_v6 = vpop.f32.mrb[41].mxu1 }
 0x39d   : > { %v5362_v34 = vadd.f32 %v5361_v6, %v5360_v38  ;;  %v450_v38 = vld [vmem:[%s8290_s13] sm:$0xff] }
 0x39f   : > { %v2420_v40 = vadd.f32 %v5362_v34, %v2219_v63  ;;  %v5363_v60 = vpop.f32.mrb[42].mxu1 }
 0x3a0   : > { %v5364_v2 = vpop.f32.mrb[43].mxu1 }
 0x3a1   : > { %v5365_v37 = vadd.f32 %v5364_v2, %v5363_v60 }
 0x3a3   : > { %v2427_v42 = vadd.f32 %v5365_v37, %v2230_v62  ;;  %v5366_v55 = vpop.f32.mrb[44].mxu1  ;;  %v451_v62 = vld [vmem:[%s8290_s13 + $0x8] sm:$0xff] }
 0x3a4   : > { %v5367_v4 = vpop.f32.mrb[45].mxu1 }
 0x3a5   : > { %v5368_v3 = vadd.f32 %v5367_v4, %v5366_v55  ;;  %v452_v4 = vld [vmem:[%s8290_s13 + $0x10] sm:$0xff] }
 0x3a7   : > { %v2434_v16 = vadd.f32 %v5368_v3, %v2241_v47  ;;  %v5369_v19 = vpop.f32.mrb[46].mxu1 }
 0x3a8   : > { %v5370_v15 = vpop.f32.mrb[47].mxu1 }
 0x3a9   : > { %v5371_v21 = vadd.f32 %v5370_v15, %v5369_v19 }
 0x3ab   : > { %v2441_v20 = vadd.f32 %v5371_v21, %v2252_v10 }
 0x3bb   : > { %v5404_v50 = vpop.f32.mrb[48].mxu1 }
 0x3bc   : > { %v5405_v13 = vpop.f32.mrb[49].mxu1 }
 0x3bd   : > { %v5406_v28 = vadd.f32 %v5405_v13, %v5404_v50 }
 0x3bf   : > { %v2545_v63 = vadd.f32 %v5406_v28, %v2420_v40  ;;  %v5407_v6 = vpop.f32.mrb[50].mxu1 }
 0x3c0   : > { %v5408_v34 = vpop.f32.mrb[51].mxu1 }
 0x3c1   : > { %v2569_v24 = vmul.f32 %v2545_v63, %v450_v38  ;;  %v5409_v60 = vadd.f32 %v5408_v34, %v5407_v6  ;;  %v453_v63 = vld [vmem:[%s8290_s13 + $0x18] sm:$0xff]  ;;  %s4977_s13 = sshll.u32 %s435_s2, 4  ;;  %s10666_s13 = int_to_ptr.vmem [resolvable:$true] %s4977_s13 }
 0x3c2   : > { %s7857_s14 = scalar_lea.vmem %s10666_s13, 512  ;;  %p7864_p0 = scmp.lt.s32.totalorder %s10666_s13, %s7862_s6 }
 0x3c3   : > { %v9991_v2 = vand.u32 4294901760, %v2569_v24  ;;  %v2552_v37 = vadd.f32 %v5409_v60, %v2427_v42  ;;  %v5410_v55 = vpop.f32.mrb[52].mxu1  ;;  %p7858_p2 = scmp.ne.s32.totalorder %s10666_s13, %s7857_s14  ;;  %p7865_p4 = scmp.lt.s32.totalorder %s7863_s26, %s7857_s14 }
 0x3c4   : > { %v5411_v47 = vpop.f32.mrb[53].mxu1 }
 0x3c5   : > { %v9994_v15 = vsub.f32 %v2569_v24, %v9991_v2  ;;  %v2570_v21 = vmul.f32 %v2552_v37, %v451_v62  ;;  %v5412_v10 = vadd.f32 %v5411_v47, %v5410_v55  ;;  %p7859_p5 = pnand %p7858_p2, %p11361_p13  ;;  %p7866_p6 = por %p7865_p4, %p7864_p0 }
 0x3c7   : > { %v9997_v13 = vand.u32 4294901760, %v2570_v21  ;;  %v2559_v28 = vadd.f32 %v5412_v10, %v2434_v16  ;;  %v5413_v40 = vpop.f32.mrb[54].mxu1  ;;  %v10000_v50 = vand.u32 4294901760, %v9994_v15  ;;  %p7860_p8 = pneg %p7859_p5 }
 0x3c8   : > { %v5414_v3 = vpop.f32.mrb[55].mxu1 }
 0x3c9   : > { %v10003_v19 = vsub.f32 %v2570_v21, %v9997_v13  ;;  %v2571_v42 = vmul.f32 %v2559_v28, %v452_v4  ;;  %v5415_v38 = vadd.f32 %v5414_v3, %v5413_v40  ;;  %v2673_v24 = vsub.f32 %v9994_v15, %v10000_v50  ;;  %p7867_p7 = pnand %p7866_p6, %p7860_p8 }
 0x3cb   : > { %v10009_v6 = vand.u32 4294901760, %v10003_v19  ;;  %v10011_v34 = vand.u32 4294901760, %v2571_v42  ;;  %v2566_v16 = vadd.f32 %v5415_v38, %v2441_v20  ;;  %v2674_v60 = vand.u32 4294901760, %v2673_v24 }
 0x3cd   : > { %v10014_v62 = vsub.f32 %v2571_v42, %v10011_v34  ;;  %v2572_v37 = vmul.f32 %v2566_v16, %v453_v63  ;;  %5808 = vmatprep.mubr.f32.mxu0 %v2674_v60  ;;  %6036 = vmatprep.mubr.f32.mxu1 %v2674_v60  ;;  %v2683_v55 = vsub.f32 %v10003_v19, %v10009_v6  ;;  %v11308_v42 = vld [vmem:[#allocation30_spill] sm:$0xff]  ;;  %v11310_v63 = vand.u32 4294901760, %v9725_v39  ;;  %v11321_v39 = vld [vmem:[#allocation36_spill] sm:$0xff] }
 0x3ce   : > { %v11309_v38 = vand.u32 4294901760, %v11308_v42  ;;  %v11343_v42 = vld [vmem:[#allocation61_spill] sm:$0xff] }
 0x3cf   : > { %v10018_v47 = vand.u32 4294901760, %v2572_v37  ;;  %v2684_v21 = vand.u32 4294901760, %v2683_v55  ;;  %v10021_v10 = vand.u32 4294901760, %v10014_v62  ;;  %v11315_v55 = vld [vmem:[#allocation32_spill] sm:$0xff] }
 0x3d1   : > { %v10024_v4 = vsub.f32 %v2572_v37, %v10018_v47  ;;  %5809 = vmatmul.mubr.f32.vlgmr.msra.gmra.mrb[8].mxu0 %v2684_v21  ;;  %6037 = vmatmul.mubr.f32.vlgmr.msra.gmra.mrb[56].mxu1 %v2684_v21  ;;  %v2693_v20 = vsub.f32 %v10014_v62, %v10021_v10  ;;  %v11316_v21 = vand.u32 4294901760, %v11315_v55  ;;  %v4164_v55 = vld [vmem:[#allocation13 + $0x58] sm:$0xff] }
 0x3d2   : > { %6879 = vmatpush3.bf16.msra.mxu0 %v9651_v36  ;;  %7071 = vmatpush3.bf16.msra.mxu1 %v9660_v27  ;;  %v11273_v27 = vld [vmem:[#allocation57_spill] sm:$0xff] }
 0x3d3   : > { %6881 = vmatprep.subr.bf16.mxu0 %v9697_v56  ;;  %7073 = vmatprep.subr.bf16.mxu1 %v9708_v0  ;;  %v2694_v28 = vand.u32 4294901760, %v2693_v20  ;;  %v10033_v40 = vand.u32 4294901760, %v10024_v4 }
 0x3d5   : > { %5811 = vmatprep.mubr.f32.mxu0 %v2694_v28  ;;  %6039 = vmatprep.mubr.f32.mxu1 %v2694_v28  ;;  %v2703_v3 = vsub.f32 %v10024_v4, %v10033_v40  ;;  %v11319_v28 = vld [vmem:[#allocation35_spill] sm:$0xff] }
 0x3d6   : > { %6883 = vmatpush3.bf16.msra.mxu0 %v9697_v56  ;;  %7075 = vmatpush3.bf16.msra.mxu1 %v9708_v0  ;;  %v11277_v56 = vld [vmem:[#allocation44_spill] sm:$0xff]  ;;  %v11279_v0 = vld [vmem:[#allocation46_spill] sm:$0xff] }
 0x3d7   : > { %6885 = vmatprep.subr.bf16.mxu0 %v9738_v31  ;;  %7077 = vmatprep.subr.bf16.mxu1 %v9754_v58  ;;  %v2704_v36 = vand.u32 4294901760, %v2703_v3 }
 0x3d9   : > { %5812 = vmatmul.mubr.f32.gmra.mrb[10].mxu0 %v2704_v36  ;;  %6040 = vmatmul.mubr.f32.gmra.mrb[58].mxu1 %v2704_v36  ;;  %v11322_v36 = vand.u32 4294901760, %v11321_v39 }
 0x3da   : > { %6887 = vmatpush3.bf16.msra.mxu0 %v9738_v31  ;;  %7079 = vmatpush3.bf16.msra.mxu1 %v9754_v58  ;;  %v11278_v31 = vld [vmem:[#allocation42_spill] sm:$0xff]  ;;  %v11281_v58 = vld [vmem:[#allocation47_spill] sm:$0xff] }
 0x3db   : > { %5846 = vmatprep.mubr.f32.mxu0 %v9991_v2  ;;  %6074 = vmatprep.mubr.f32.mxu1 %v9991_v2 }
 0x3dc   : > { %6889 = vmatprep.subr.bf16.mxu0 %v9782_v14  ;;  %7081 = vmatprep.subr.bf16.mxu1 %v9795_v8 }
 0x3de   : > { %6891 = vmatpush3.bf16.msra.mxu0 %v9782_v14  ;;  %7083 = vmatpush3.bf16.msra.mxu1 %v9795_v8  ;;  %v11274_v14 = vld [vmem:[#allocation39_spill] sm:$0xff]  ;;  %v11283_v8 = vld [vmem:[#allocation49_spill] sm:$0xff] }
 0x3df   : > { %6893 = vmatprep.subr.bf16.mxu0 %v9820_v54  ;;  %7085 = vmatprep.subr.bf16.mxu1 %v9837_v11 }
 0x3e2   : > { %6895 = vmatpush3.bf16.msra.mxu0 %v9820_v54  ;;  %7087 = vmatpush3.bf16.msra.mxu1 %v9837_v11  ;;  %v11285_v54 = vld [vmem:[#allocation23_spill] sm:$0xff]  ;;  %v11286_v11 = vld [vmem:[#allocation22_spill] sm:$0xff] }
 0x3e3   : > { %6897 = vmatprep.subr.bf16.mxu0 %v11273_v27  ;;  %7089 = vmatprep.subr.bf16.mxu1 %v9878_v12 }
 0x3e6   : > { %6899 = vmatpush3.bf16.msra.mxu0 %v11273_v27  ;;  %7091 = vmatpush3.bf16.msra.mxu1 %v9878_v12  ;;  %v11287_v12 = vld [vmem:[#allocation24_spill] sm:$0xff]  ;;  %v11323_v27 = vld [vmem:[#allocation37_spill] sm:$0xff] }
 0x3e7   : > { %6901 = vmatprep.subr.bf16.mxu0 %v9904_v33  ;;  %7093 = vmatprep.subr.bf16.mxu1 %v9911_v35 }
 0x3ea   : > { %6903 = vmatpush3.bf16.msra.mxu0 %v9904_v33  ;;  %7095 = vmatpush3.bf16.msra.mxu1 %v9911_v35  ;;  %v11288_v33 = vld [vmem:[#allocation27_spill] sm:$0xff] }
 0x3eb   : > { %6905 = vmatprep.subr.bf16.mxu0 %v9927_v41  ;;  %7097 = vmatprep.subr.bf16.mxu1 %v9929_v17 }
 0x3ee   : > { %6907 = vmatpush3.bf16.msra.mxu0 %v9927_v41  ;;  %7099 = vmatpush3.bf16.msra.mxu1 %v9929_v17  ;;  %v11293_v41 = vand.u32 4294901760, %v9581_v29  ;;  %v11298_v29 = vld [vmem:[#allocation25_spill] sm:$0xff] }
 0x3ef   : > { %6909 = vmatprep.subr.bf16.mxu0 %v9921_v22  ;;  %7101 = vmatprep.subr.bf16.mxu1 %v9925_v18 }
 0x3f1   : > { %5847 = vmatmul.mubr.f32.vlgmr.msra.gmra.mrb[8].mxu0 %v9997_v13  ;;  %6075 = vmatmul.mubr.f32.vlgmr.msra.gmra.mrb[56].mxu1 %v9997_v13 }
 0x3f2   : > { %5849 = vmatprep.mubr.f32.mxu0 %v10011_v34  ;;  %6911 = vmatpush3.bf16.msra.mxu0 %v9921_v22  ;;  %v11291_v22 = vld [vmem:[#allocation28_spill] sm:$0xff] }
 0x3f3   : > { %6077 = vmatprep.mubr.f32.mxu1 %v10011_v34  ;;  %7103 = vmatpush3.bf16.msra.mxu1 %v9925_v18  ;;  %v11292_v18 = vand.u32 4294901760, %v9562_v61  ;;  %v11297_v61 = vand.u32 4294901760, %v9646_v9 }
 0x3f4   : > { %6913 = vmatprep.subr.bf16.mxu0 %v9933_v7  ;;  %7105 = vmatprep.subr.bf16.mxu1 %v9937_v5 }
 0x3f5   : > { %5850 = vmatmul.mubr.f32.gmra.mrb[10].mxu0 %v10018_v47  ;;  %6078 = vmatmul.mubr.f32.gmra.mrb[58].mxu1 %v10018_v47  ;;  %v7164_v17 = vpack.c.bf16 %v11293_v41, %v11292_v18  ;;  %v11327_v41 = vld [vmem:[#allocation52_spill] sm:$0xff] }
 0x3f6   : > { %6915 = vmatpush3.bf16.msra.mxu0 %v9933_v7  ;;  %5884 = vmatprep.mubr.f32.mxu0 %v9994_v15  ;;  %v11294_v7 = vand.u32 4294901760, %v9629_v52  ;;  %v11299_v52 = vand.u32 4294901760, %v11298_v29  ;;  %v11333_v29 = vld [vmem:[#allocation55_spill] sm:$0xff] }
 0x3f7   : > { %7107 = vmatpush3.bf16.msra.mxu1 %v9937_v5  ;;  %6112 = vmatprep.mubr.f32.mxu1 %v9994_v15  ;;  %v11290_v5 = vand.u32 4294901760, %v9557_v43  ;;  %v11296_v43 = vand.u32 4294901760, %v9641_v32  ;;  %v11302_v32 = vld [vmem:[#allocation29_spill] sm:$0xff] }
 0x3f8   : > { %6917 = vmatprep.subr.bf16.mxu0 %v9941_v49  ;;  %7109 = vmatprep.subr.bf16.mxu1 %v9945_v53  ;;  %v11303_v9 = vand.u32 4294901760, %v11302_v32  ;;  %v11337_v32 = vld [vmem:[#allocation58_spill] sm:$0xff] }
 0x3fa   : > { %6919 = vmatpush3.bf16.msra.mxu0 %v9941_v49  ;;  %v11289_v49 = vand.u32 4294901760, %v9552_v23  ;;  %v11295_v23 = vand.u32 4294901760, %v9634_v57  ;;  %v11300_v57 = vld [vmem:[#allocation26_spill] sm:$0xff] }
 0x3fb   : > { %7111 = vmatpush3.bf16.msra.mxu1 %v9945_v53  ;;  %6921 = vmatprep.subr.bf16.mxu0 %v9949_v59 }
 0x3fc   : > { %7113 = vmatprep.subr.bf16.mxu1 %v9953_v46  ;;  %v6972_v35 = vpack.c.bf16 %v11290_v5, %v11289_v49  ;;  %v6976_v53 = vpack.c.bf16 %v11295_v23, %v11294_v7  ;;  %v11324_v49 = vand.u32 4294901760, %v11323_v27  ;;  %v11329_v23 = vld [vmem:[#allocation53_spill] sm:$0xff] }
 0x3fe   : > { %6923 = vmatpush3.bf16.msra.mxu0 %v9949_v59  ;;  %v7168_v59 = vpack.c.bf16 %v11297_v61, %v11296_v43  ;;  %v6992_v5 = vpack.c.bf16 %v11324_v49, %v11322_v36  ;;  %v11331_v43 = vld [vmem:[#allocation54_spill] sm:$0xff]  ;;  %v4167_v49 = vld [vmem:[#allocation13 + $0x70] sm:$0xff] }
 0x3ff   : > { %7115 = vmatpush3.bf16.msra.mxu1 %v9953_v46  ;;  %6925 = vmatprep.subr.bf16.mxu0 %v9958_v25  ;;  %v11301_v46 = vand.u32 4294901760, %v11300_v57  ;;  %v11332_v61 = vand.u32 4294901760, %v11331_v43  ;;  %v11335_v57 = vld [vmem:[#allocation56_spill] sm:$0xff] }
 0x400   : > { %7117 = vmatprep.subr.bf16.mxu1 %v9962_v44 }
 0x402   : > { %6927 = vmatpush3.bf16.msra.mxu0 %v9958_v25  ;;  %v11276_v25 = vld [vmem:[#allocation40_spill] sm:$0xff] }
 0x403   : > { %7119 = vmatpush3.bf16.msra.mxu1 %v9962_v44  ;;  %6929 = vmatprep.subr.bf16.mxu0 %v9967_v26  ;;  %v11275_v44 = vld [vmem:[#allocation41_spill] sm:$0xff] }
 0x404   : > { %7121 = vmatprep.subr.bf16.mxu1 %v9971_v1 }
 0x406   : > { %6931 = vmatpush3.bf16.msra.mxu0 %v9967_v26  ;;  %v11280_v26 = vld [vmem:[#allocation45_spill] sm:$0xff] }
 0x407   : > { %7123 = vmatpush3.bf16.msra.mxu1 %v9971_v1  ;;  %6933 = vmatprep.subr.bf16.mxu0 %v9975_v51  ;;  %v6980_v1 = vpack.c.bf16 %v11301_v46, %v11299_v52  ;;  %v11334_v52 = vand.u32 4294901760, %v11333_v29  ;;  %v11336_v46 = vand.u32 4294901760, %v11335_v57 }
 0x408   : > { %7125 = vmatprep.subr.bf16.mxu1 %v9979_v30 }
 0x40a   : > { %6935 = vmatpush3.bf16.msra.mxu0 %v9975_v51  ;;  %v11282_v51 = vld [vmem:[#allocation43_spill] sm:$0xff] }
 0x40b   : > { %7127 = vmatpush3.bf16.msra.mxu1 %v9979_v30  ;;  %6937 = vmatprep.subr.bf16.mxu0 %v9983_v48  ;;  %v11304_v30 = vld [vmem:[#allocation38_spill] sm:$0xff] }
 0x40c   : > { %7129 = vmatprep.subr.bf16.mxu1 %v9987_v45 }
 0x40e   : > { %6939 = vmatpush3.bf16.msra.mxu0 %v9983_v48  ;;  %v11284_v48 = vld [vmem:[#allocation48_spill] sm:$0xff] }
 0x40f   : > { %7131 = vmatpush3.bf16.msra.mxu1 %v9987_v45  ;;  %6941 = vmatprep.subr.bf16.mxu0 %v11274_v14  ;;  %v11305_v45 = vand.u32 4294901760, %v11304_v30  ;;  %v11339_v30 = vld [vmem:[#allocation59_spill] sm:$0xff] }
 0x410   : > { %7133 = vmatprep.subr.bf16.mxu1 %v11275_v44 }
 0x411   : > { %5885 = vmatmul.mubr.f32.vlgmr.msra.gmra.mrb[8].mxu0 %v10003_v19  ;;  %v7172_v15 = vpack.c.bf16 %v11305_v45, %v11303_v9  ;;  %v11338_v9 = vand.u32 4294901760, %v11337_v32  ;;  %v11340_v45 = vand.u32 4294901760, %v11339_v30 }
 0x412   : > { %6113 = vmatmul.mubr.f32.vlgmr.msra.gmra.mrb[56].mxu1 %v10003_v19  ;;  %5887 = vmatprep.mubr.f32.mxu0 %v10014_v62 }
 0x413   : > { %6943 = vmatpush3.bf16.msra.mxu0 %v11274_v14  ;;  %6115 = vmatprep.mubr.f32.mxu1 %v10014_v62  ;;  %v11313_v62 = vld [vmem:[#allocation34_spill] sm:$0xff] }
 0x414   : > { %7135 = vmatpush3.bf16.msra.mxu1 %v11275_v44  ;;  %6945 = vmatprep.subr.bf16.mxu0 %v11276_v25  ;;  %v11314_v37 = vand.u32 4294901760, %v11313_v62 }
 0x415   : > { %5888 = vmatmul.mubr.f32.gmra.mrb[10].mxu0 %v10024_v4  ;;  %7137 = vmatprep.subr.bf16.mxu1 %v11277_v56 }
 0x416   : > { %6116 = vmatmul.mubr.f32.gmra.mrb[58].mxu1 %v10024_v4  ;;  %5922 = vmatprep.mubr.f32.mxu0 %v10000_v50  ;;  %v11317_v4 = vld [vmem:[#allocation33_spill] sm:$0xff] }
 0x417   : > { %6947 = vmatpush3.bf16.msra.mxu0 %v11276_v25  ;;  %6150 = vmatprep.mubr.f32.mxu1 %v10000_v50  ;;  %v11306_v50 = vld [vmem:[#allocation50_spill] sm:$0xff]  ;;  %v11318_v20 = vand.u32 4294901760, %v11317_v4 }
 0x418   : > { %7139 = vmatpush3.bf16.msra.mxu1 %v11277_v56  ;;  %6949 = vmatprep.subr.bf16.mxu0 %v11278_v31  ;;  %v11307_v19 = vand.u32 4294901760, %v11306_v50  ;;  %v11341_v50 = vld [vmem:[#allocation60_spill] sm:$0xff] }
 0x419   : > { %7141 = vmatprep.subr.bf16.mxu1 %v11279_v0 }
 0x41a   : > { %v6984_v24 = vpack.c.bf16 %v11309_v38, %v11307_v19  ;;  %v11342_v19 = vand.u32 4294901760, %v11341_v50  ;;  %v11344_v38 = vand.u32 4294901760, %v11343_v42 }
 0x41b   : > { %6951 = vmatpush3.bf16.msra.mxu0 %v11278_v31 }
 0x41c   : > { %7143 = vmatpush3.bf16.msra.mxu1 %v11279_v0  ;;  %6953 = vmatprep.subr.bf16.mxu0 %v11280_v26 }
 0x41d   : > { %7145 = vmatprep.subr.bf16.mxu1 %v11281_v58 }
 0x41f   : > { %6955 = vmatpush3.bf16.msra.mxu0 %v11280_v26 }
 0x420   : > { %7147 = vmatpush3.bf16.msra.mxu1 %v11281_v58  ;;  %6957 = vmatprep.subr.bf16.mxu0 %v11282_v51 }
 0x421   : > { %7149 = vmatprep.subr.bf16.mxu1 %v11283_v8 }
 0x423   : > { %6959 = vmatpush3.bf16.msra.mxu0 %v11282_v51 }
 0x424   : > { %7151 = vmatpush3.bf16.msra.mxu1 %v11283_v8  ;;  %6961 = vmatprep.subr.bf16.mxu0 %v11284_v48 }
 0x425   : > { %7153 = vmatprep.subr.bf16.mxu1 %v11285_v54 }
 0x427   : > { %6963 = vmatpush3.bf16.msra.mxu0 %v11284_v48 }
 0x428   : > { %7155 = vmatpush3.bf16.msra.mxu1 %v11285_v54  ;;  %6965 = vmatprep.subr.bf16.mxu0 %v11286_v11 }
 0x429   : > { %7157 = vmatprep.subr.bf16.mxu1 %v11287_v12 }
 0x42b   : > { %6967 = vmatpush3.bf16.msra.mxu0 %v11286_v11 }
 0x42c   : > { %7159 = vmatpush3.bf16.msra.mxu1 %v11287_v12  ;;  %6969 = vmatprep.subr.bf16.mxu0 %v11288_v33 }
 0x42d   : > { %7161 = vmatprep.subr.bf16.mxu1 %v11291_v22 }
 0x42f   : > { %6971 = vmatpush3.bf16.msra.mxu0 %v11288_v33 }
 0x430   : > { %7163 = vmatpush3.bf16.msra.mxu1 %v11291_v22  ;;  %6973 = vmatprep.subr.bf16.mxu0 %v6972_v35 }
 0x431   : > { %7165 = vmatprep.subr.bf16.mxu1 %v7164_v17 }
 0x432   : > { %5923 = vmatmul.mubr.f32.vlgmr.msra.gmra.mrb[8].mxu0 %v10009_v6 }
 0x433   : > { %6151 = vmatmul.mubr.f32.vlgmr.msra.gmra.mrb[56].mxu1 %v10009_v6  ;;  %5925 = vmatprep.mubr.f32.mxu0 %v10021_v10  ;;  %v11311_v6 = vld [vmem:[#allocation31_spill] sm:$0xff] }
 0x434   : > { %6975 = vmatpush3.bf16.msra.mxu0 %v6972_v35  ;;  %6153 = vmatprep.mubr.f32.mxu1 %v10021_v10  ;;  %v11312_v16 = vand.u32 4294901760, %v11311_v6  ;;  %v6988_v10 = vpack.c.bf16 %v11316_v21, %v11314_v37  ;;  %v11325_v35 = vld [vmem:[#allocation51_spill] sm:$0xff]  ;;  %v4163_v37 = vld [vmem:[#allocation13 + $0x50] sm:$0xff] }
 0x435   : > { %7167 = vmatpush3.bf16.msra.mxu1 %v7164_v17  ;;  %6977 = vmatprep.subr.bf16.mxu0 %v6976_v53  ;;  %v11326_v18 = vand.u32 4294901760, %v11325_v35  ;;  %v11328_v17 = vand.u32 4294901760, %v11327_v41  ;;  %v4200_v21 = vand.u32 4294901760, %v4163_v37  ;;  %v4212_v35 = vand.u32 4294901760, %v4167_v49 }
 0x436   : > { %5926 = vmatmul.mubr.f32.gmra.mrb[10].mxu0 %v10033_v40  ;;  %7169 = vmatprep.subr.bf16.mxu1 %v7168_v59  ;;  %v7176_v60 = vpack.c.bf16 %v11312_v16, %v11310_v63  ;;  %v10287_v63 = vld [vmem:[#allocation13 + $0x38] sm:$0xff]  ;;  %v4162_v16 = vld [vmem:[#allocation13 + $0x48] sm:$0xff] }
 0x437   : > { %6154 = vmatmul.mubr.f32.gmra.mrb[58].mxu1 %v10033_v40  ;;  %5960 = vmatprep.mubr.f32.mxu0 %v9991_v2  ;;  %v11320_v40 = vand.u32 4294901760, %v11319_v28  ;;  %v7184_v7 = vpack.c.bf16 %v11328_v17, %v11326_v18  ;;  %v4191_v6 = vand.u32 4294901760, %v10287_v63  ;;  %v4166_v28 = vld [vmem:[#allocation13 + $0x68] sm:$0xff] }
 0x438   : > { %6979 = vmatpush3.bf16.msra.mxu0 %v6976_v53  ;;  %6188 = vmatprep.mubr.f32.mxu1 %v9991_v2  ;;  %v11330_v53 = vand.u32 4294901760, %v11329_v23 }
 0x439   : > { %7171 = vmatpush3.bf16.msra.mxu1 %v7168_v59  ;;  %6981 = vmatprep.subr.bf16.mxu0 %v6980_v1  ;;  %v7180_v3 = vpack.c.bf16 %v11320_v40, %v11318_v20  ;;  %v4165_v20 = vld [vmem:[#allocation13 + $0x60] sm:$0xff] }
 0x43a   : > { %7173 = vmatprep.subr.bf16.mxu1 %v7172_v15  ;;  %v6996_v59 = vpack.c.bf16 %v11332_v61, %v11330_v53  ;;  %v4206_v40 = vand.u32 4294901760, %v4165_v20 }
 0x43c   : > { %6983 = vmatpush3.bf16.msra.mxu0 %v6980_v1  ;;  %v7188_v1 = vpack.c.bf16 %v11336_v46, %v11334_v52 }
 0x43d   : > { %7175 = vmatpush3.bf16.msra.mxu1 %v7172_v15  ;;  %6985 = vmatprep.subr.bf16.mxu0 %v6984_v24  ;;  %v7000_v15 = vpack.c.bf16 %v11340_v45, %v11338_v9  ;;  %v10360_v9 = vsub.f32 %v4163_v37, %v4200_v21  ;;  %v10385_v37 = vsub.f32 %v4167_v49, %v4212_v35 }
 0x43e   : > { %7177 = vmatprep.subr.bf16.mxu1 %v7176_v60 }
 0x43f   : > { %v10976_v50 = vand.u32 4294901760, %v10360_v9 }
 0x440   : > { %6987 = vmatpush3.bf16.msra.mxu0 %v6984_v24  ;;  %v7192_v24 = vpack.c.bf16 %v11344_v38, %v11342_v19 }
 0x441   : > { %7179 = vmatpush3.bf16.msra.mxu1 %v7176_v60  ;;  %6989 = vmatprep.subr.bf16.mxu0 %v6988_v10  ;;  %v4364_v38 = vsub.f32 %v10360_v9, %v10976_v50 }
 0x442   : > { %7181 = vmatprep.subr.bf16.mxu1 %v7180_v3 }
 0x444   : > { %6991 = vmatpush3.bf16.msra.mxu0 %v6988_v10  ;;  %v4203_v10 = vand.u32 4294901760, %v4164_v55 }
 0x445   : > { %7183 = vmatpush3.bf16.msra.mxu1 %v7180_v3  ;;  %6993 = vmatprep.subr.bf16.mxu0 %v6992_v5  ;;  %v4209_v3 = vand.u32 4294901760, %v4166_v28 }
 0x446   : > { %7185 = vmatprep.subr.bf16.mxu1 %v7184_v7  ;;  %v10319_v4 = vpack.c.bf16 %v4203_v10, %v4200_v21  ;;  %v10362_v30 = vsub.f32 %v4164_v55, %v4203_v10 }
 0x447   : > { %v10323_v39 = vpack.c.bf16 %v4209_v3, %v4206_v40 }
 0x448   : > { %6995 = vmatpush3.bf16.msra.mxu0 %v6992_v5  ;;  %v4168_v5 = vld [vmem:[#allocation13 + $0x78] sm:$0xff]  ;;  %v10975_v19 = vand.u32 4294901760, %v10362_v30 }
 0x449   : > { %7187 = vmatpush3.bf16.msra.mxu1 %v7184_v7  ;;  %6997 = vmatprep.subr.bf16.mxu0 %v6996_v59  ;;  %v4215_v18 = vand.u32 4294901760, %v4168_v5 }
 0x44a   : > { %7189 = vmatprep.subr.bf16.mxu1 %v7188_v1 }
 0x44b   : > { %v10335_v7 = vpack.c.bf16 %v4215_v18, %v4212_v35  ;;  %v10387_v55 = vsub.f32 %v4168_v5, %v4215_v18 }
 0x44c   : > { %6999 = vmatpush3.bf16.msra.mxu0 %v6996_v59 }
 0x44d   : > { %7191 = vmatpush3.bf16.msra.mxu1 %v7188_v1  ;;  %7001 = vmatprep.subr.bf16.mxu0 %v7000_v15 }
 0x44e   : > { %7193 = vmatprep.subr.bf16.mxu1 %v7192_v24 }
 0x450   : > { %7003 = vmatpush3.bf16.msra.mxu0 %v7000_v15 }
 0x451   : > { %7195 = vmatpush3.bf16.msra.mxu1 %v7192_v24  ;;  %7005 = vmatprep.subr.bf16.mxu0 %v11274_v14  ;;  %v4371_v24 = vsub.f32 %v10362_v30, %v10975_v19 }
 0x452   : > { %7197 = vmatprep.subr.bf16.mxu1 %v11275_v44 }
 0x453   : > { %5961 = vmatmul.mubr.f32.vlgmr.msra.gmra.mrb[8].mxu0 %v9997_v13 }
 0x454   : > { %6189 = vmatmul.mubr.f32.vlgmr.msra.gmra.mrb[56].mxu1 %v9997_v13  ;;  %5963 = vmatprep.mubr.f32.mxu0 %v10011_v34 }
 0x455   : > { %7007 = vmatpush3.bf16.msra.mxu0 %v11274_v14  ;;  %6191 = vmatprep.mubr.f32.mxu1 %v10011_v34  ;;  %v10249_v14 = vld [vmem:[#allocation13 + $0x8] sm:$0xff] }
 0x456   : > { %7199 = vmatpush3.bf16.msra.mxu1 %v11275_v44  ;;  %7009 = vmatprep.subr.bf16.mxu0 %v11276_v25 }
 0x457   : > { %5964 = vmatmul.mubr.f32.gmra.mrb[10].mxu0 %v10018_v47  ;;  %7201 = vmatprep.subr.bf16.mxu1 %v11277_v56 }
 0x458   : > { %6192 = vmatmul.mubr.f32.gmra.mrb[58].mxu1 %v10018_v47  ;;  %5998 = vmatprep.mubr.f32.mxu0 %v9991_v2 }
 0x459   : > { %7011 = vmatpush3.bf16.msra.mxu0 %v11276_v25  ;;  %6226 = vmatprep.mubr.f32.mxu1 %v9991_v2  ;;  %v10247_v2 = vld [vmem:[#allocation13] sm:$0xff]  ;;  %v4173_v25 = vand.u32 4294901760, %v10249_v14 }
 0x45a   : > { %7203 = vmatpush3.bf16.msra.mxu1 %v11277_v56  ;;  %7013 = vmatprep.subr.bf16.mxu0 %v11278_v31  ;;  %v4170_v44 = vand.u32 4294901760, %v10247_v2  ;;  %v10257_v56 = vld [vmem:[#allocation13 + $0x10] sm:$0xff] }
 0x45b   : > { %7205 = vmatprep.subr.bf16.mxu1 %v11279_v0  ;;  %v10329_v27 = vsub.f32 %v10249_v14, %v4173_v25  ;;  %v10376_v14 = vsub.f32 %v4166_v28, %v4209_v3  ;;  %v10971_v28 = vand.u32 4294901760, %v10387_v55 }
 0x45c   : > { %v10326_v36 = vsub.f32 %v10247_v2, %v4170_v44  ;;  %v10374_v2 = vsub.f32 %v4165_v20, %v4206_v40  ;;  %v10972_v20 = vand.u32 4294901760, %v10385_v37 }
 0x45d   : > { %7015 = vmatpush3.bf16.msra.mxu0 %v11278_v31  ;;  %v10259_v31 = vld [vmem:[#allocation13 + $0x18] sm:$0xff]  ;;  %v10984_v17 = vand.u32 4294901760, %v10329_v27  ;;  %v4399_v49 = vsub.f32 %v10387_v55, %v10971_v28 }
 0x45e   : > { %7207 = vmatpush3.bf16.msra.mxu1 %v11279_v0  ;;  %7017 = vmatprep.subr.bf16.mxu0 %v11280_v26  ;;  %v10264_v0 = vpack.c.bf16 %v4173_v25, %v4170_v44  ;;  %v10985_v41 = vand.u32 4294901760, %v10326_v36  ;;  %v4365_v44 = vand.u32 4294901760, %v4364_v38  ;;  %v4372_v25 = vand.u32 4294901760, %v4371_v24 }
 0x45f   : > { %7209 = vmatprep.subr.bf16.mxu1 %v11281_v58  ;;  %v4301_v53 = vsub.f32 %v10329_v27, %v10984_v17  ;;  %v4392_v3 = vsub.f32 %v10385_v37, %v10972_v20  ;;  %v4400_v18 = vand.u32 4294901760, %v4399_v49 }
 0x460   : > { %v4294_v23 = vsub.f32 %v10326_v36, %v10985_v41 }
 0x461   : > { %7019 = vmatpush3.bf16.msra.mxu0 %v11280_v26  ;;  %v4176_v26 = vand.u32 4294901760, %v10257_v56  ;;  %v4302_v61 = vand.u32 4294901760, %v4301_v53  ;;  %v4393_v35 = vand.u32 4294901760, %v4392_v3  ;;  %v10406_v53 = vpack.c.bf16 %v10329_v27, %v10326_v36 }
 0x462   : > { %7211 = vmatpush3.bf16.msra.mxu1 %v11281_v58  ;;  %7021 = vmatprep.subr.bf16.mxu0 %v11282_v51  ;;  %v4179_v58 = vand.u32 4294901760, %v10259_v31  ;;  %v4295_v43 = vand.u32 4294901760, %v4294_v23 }
 0x463   : > { %7213 = vmatprep.subr.bf16.mxu1 %v11283_v8  ;;  %v10402_v23 = vpack.c.bf16 %v4400_v18, %v4393_v35  ;;  %v10433_v24 = vsub.f32 %v10257_v56, %v4176_v26 }
 0x464   : > { %v10345_v59 = vpack.c.bf16 %v4302_v61, %v4295_v43  ;;  %v10414_v61 = vpack.c.bf16 %v10362_v30, %v10360_v9 }
 0x465   : > { %7023 = vmatpush3.bf16.msra.mxu0 %v11282_v51  ;;  %v10269_v51 = vld [vmem:[#allocation13 + $0x20] sm:$0xff]  ;;  %v10983_v28 = vand.u32 4294901760, %v10433_v24 }
 0x466   : > { %7215 = vmatpush3.bf16.msra.mxu1 %v11283_v8  ;;  %7025 = vmatprep.subr.bf16.mxu0 %v11284_v48  ;;  %v10271_v8 = vld [vmem:[#allocation13 + $0x28] sm:$0xff] }
 0x467   : > { %7217 = vmatprep.subr.bf16.mxu1 %v11285_v54 }
 0x469   : > { %7027 = vmatpush3.bf16.msra.mxu0 %v11284_v48  ;;  %v10280_v48 = vpack.c.bf16 %v4179_v58, %v4176_v26 }
 0x46a   : > { %7219 = vmatpush3.bf16.msra.mxu1 %v11285_v54  ;;  %7029 = vmatprep.subr.bf16.mxu0 %v11286_v11  ;;  %v4182_v54 = vand.u32 4294901760, %v10269_v51 }
 0x46b   : > { %7221 = vmatprep.subr.bf16.mxu1 %v11287_v12 }
 0x46d   : > { %7031 = vmatpush3.bf16.msra.mxu0 %v11286_v11  ;;  %v4185_v11 = vand.u32 4294901760, %v10271_v8 }
 0x46e   : > { %7223 = vmatpush3.bf16.msra.mxu1 %v11287_v12  ;;  %7033 = vmatprep.subr.bf16.mxu0 %v11288_v33  ;;  %v10285_v12 = vld [vmem:[#allocation13 + $0x30] sm:$0xff] }
 0x46f   : > { %7225 = vmatprep.subr.bf16.mxu1 %v11291_v22 }
 0x471   : > { %7035 = vmatpush3.bf16.msra.mxu0 %v11288_v33  ;;  %v10298_v33 = vpack.c.bf16 %v4185_v11, %v4182_v54 }
 0x472   : > { %7227 = vmatpush3.bf16.msra.mxu1 %v11291_v22  ;;  %7229 = vmatprep.subr.bf16.mxu0 %v10264_v0  ;;  %v4188_v22 = vand.u32 4294901760, %v10285_v12 }
 0x474   : > { %5999 = vmatmul.mubr.f32.vlgmr.msra.gmra.mrb[8].mxu0 %v9997_v13 }
 0x475   : > { %6227 = vmatmul.mubr.f32.vlgmr.msra.gmra.mrb[56].mxu1 %v9997_v13  ;;  %6001 = vmatprep.mubr.f32.mxu0 %v10011_v34  ;;  %v10310_v13 = vpack.c.bf16 %v4191_v6, %v4188_v22 }
 0x476   : > { %6229 = vmatprep.mubr.f32.mxu1 %v10011_v34  ;;  %7231 = vmatpush3.bf16.msra.mxu0 %v10264_v0  ;;  %v4161_v34 = vld [vmem:[#allocation13 + $0x40] sm:$0xff] }
 0x477   : > { %7233 = vmatprep.subr.bf16.mxu0 %v10280_v48  ;;  %v4194_v60 = vand.u32 4294901760, %v4161_v34 }
 0x478   : > { %6002 = vmatmul.mubr.f32.gmra.mrb[10].mxu0 %v10018_v47 }
 0x479   : > { %6230 = vmatmul.mubr.f32.gmra.mrb[58].mxu1 %v10018_v47  ;;  %v4197_v47 = vand.u32 4294901760, %v4162_v16  ;;  %v10348_v29 = vsub.f32 %v4161_v34, %v4194_v60  ;;  %v10974_v34 = vand.u32 4294901760, %v10374_v2 }
 0x47a   : > { %7235 = vmatpush3.bf16.msra.mxu0 %v10280_v48 }
 0x47b   : > { %7237 = vmatprep.subr.bf16.mxu0 %v10298_v33  ;;  %v10315_v62 = vpack.c.bf16 %v4197_v47, %v4194_v60  ;;  %v10350_v52 = vsub.f32 %v4162_v16, %v4197_v47  ;;  %v10978_v57 = vand.u32 4294901760, %v10348_v29  ;;  %v10973_v16 = vand.u32 4294901760, %v10376_v14 }
 0x47c   : > { %v10380_v60 = vpack.c.bf16 %v4372_v25, %v4365_v44  ;;  %v4378_v47 = vsub.f32 %v10374_v2, %v10974_v34  ;;  %v10438_v44 = vsub.f32 %v10259_v31, %v4179_v58  ;;  %v10449_v58 = vsub.f32 %v10269_v51, %v4182_v54 }
 0x47d   : > { %v10977_v46 = vand.u32 4294901760, %v10350_v52  ;;  %v4350_v1 = vsub.f32 %v10348_v29, %v10978_v57  ;;  %v4385_v21 = vsub.f32 %v10376_v14, %v10973_v16  ;;  %v10410_v43 = vpack.c.bf16 %v10350_v52, %v10348_v29 }
 0x47e   : > { %7239 = vmatpush3.bf16.msra.mxu0 %v10298_v33  ;;  %v4379_v10 = vand.u32 4294901760, %v4378_v47  ;;  %v10981_v56 = vand.u32 4294901760, %v10438_v44  ;;  %v4308_v51 = vsub.f32 %v10433_v24, %v10983_v28 }
 0x47f   : > { %7241 = vmatprep.subr.bf16.mxu0 %v10310_v13  ;;  %v4357_v32 = vsub.f32 %v10350_v52, %v10977_v46  ;;  %v4351_v45 = vand.u32 4294901760, %v4350_v1  ;;  %v4386_v40 = vand.u32 4294901760, %v4385_v21  ;;  %v10418_v1 = vpack.c.bf16 %v10376_v14, %v10374_v2 }
 0x480   : > { %v4309_v34 = vand.u32 4294901760, %v4308_v51 }
 0x481   : > { %v4358_v15 = vand.u32 4294901760, %v4357_v32  ;;  %v10400_v5 = vpack.c.bf16 %v4386_v40, %v4379_v10  ;;  %v10422_v32 = vpack.c.bf16 %v10387_v55, %v10385_v37 }
 0x482   : > { %7243 = vmatpush3.bf16.msra.mxu0 %v10310_v13 }
 0x483   : > { %7245 = vmatprep.subr.bf16.mxu0 %v10315_v62  ;;  %v10366_v42 = vpack.c.bf16 %v4358_v15, %v4351_v45  ;;  %v440_v45 = vld [vmem:[%s10716_s7 + $0x1] ss:$0 sm:$0xff]  ;;  %v441_v15 = vld [vmem:[%s10716_s7 + $0x2] ss:$0 sm:$0xff] }
 0x486   : > { %7247 = vmatpush3.bf16.msra.mxu0 %v10315_v62 }
 0x487   : > { %7249 = vmatprep.subr.bf16.mxu0 %v10319_v4 }
 0x48a   : > { %7251 = vmatpush3.bf16.msra.mxu0 %v10319_v4 }
 0x48b   : > { %7253 = vmatprep.subr.bf16.mxu0 %v10323_v39 }
 0x48e   : > { %7255 = vmatpush3.bf16.msra.mxu0 %v10323_v39 }
 0x48f   : > { %7257 = vmatprep.subr.bf16.mxu0 %v10335_v7 }
 0x492   : > { %7259 = vmatpush3.bf16.msra.mxu0 %v10335_v7 }
 0x493   : > { %7261 = vmatprep.subr.bf16.mxu0 %v10345_v59 }
 0x547   : > { %v6000_v38 = vpop.f32.mrb[8].mxu0 }
 0x548   : > { %v7436_v25 = vadd.f32 %v6000_v38, %v440_v45  ;;  %v6228_v47 = vpop.f32.mrb[56].mxu1  ;;  %v3337_v21 = vpop.f32.mrb[9].mxu0  ;;  %v10454_v38 = vsub.f32 %v10271_v8, %v4185_v11  ;;  %v4315_v8 = vsub.f32 %v10438_v44, %v10981_v56 }
 0x549   : > { %v7440_v10 = vadd.f32 %v6228_v47, %v441_v15  ;;  %v7437_v40 = vadd.f32 %v3337_v21, %v440_v45  ;;  %v4123_v3 = vpop.f32.mrb[57].mxu1 }
 0x54a   : > { %v7441_v49 = vadd.f32 %v4123_v3, %v441_v15  ;;  %v4316_v19 = vand.u32 4294901760, %v4315_v8 }
 0x54b   : > { %v10440_v35 = vsub.f32 %v7436_v25, %v7440_v10  ;;  %v6003_v18 = vpop.f32.mrb[10].mxu0 }
 0x54c   : > { %v10444_v26 = vsub.f32 %v7437_v40, %v7441_v49  ;;  %v7438_v20 = vadd.f32 %v6003_v18, %v440_v45  ;;  %v6231_v16 = vpop.f32.mrb[58].mxu1  ;;  %v3349_v31 = vpop.f32.mrb[11].mxu0 }
 0x54d   : > { %v4150_v25 = vmul.f32 %v10440_v35, %v10440_v35  ;;  %v7442_v47 = vadd.f32 %v6231_v16, %v441_v15  ;;  %v7439_v21 = vadd.f32 %v3349_v31, %v440_v45  ;;  %v4135_v10 = vpop.f32.mrb[59].mxu1  ;;  %v10979_v16 = vand.u32 4294901760, %v10449_v58 }
 0x54e   : > { %v4149_v40 = vmul.f32 %v10444_v26, %v10444_v26  ;;  %v7443_v3 = vadd.f32 %v4135_v10, %v441_v15  ;;  %v10980_v45 = vand.u32 4294901760, %v10454_v38  ;;  %v10484_v31 = vsub.f32 %v10285_v12, %v4188_v22 }
 0x54f   : > { %v10460_v49 = vand.u32 4294901760, %v4150_v25  ;;  %v10462_v18 = vsub.f32 %v7438_v20, %v7442_v47  ;;  %v10489_v47 = vsub.f32 %v10287_v63, %v4191_v6  ;;  %v4322_v63 = vsub.f32 %v10449_v58, %v10979_v16 }
 0x550   : > { %v10470_v54 = vand.u32 4294901760, %v4149_v40  ;;  %v10472_v11 = vsub.f32 %v7439_v21, %v7443_v3  ;;  %v4329_v22 = vsub.f32 %v10454_v38, %v10980_v45  ;;  %v4335_v51 = vand.u32 4294901760, %v10484_v31 }
 0x551   : > { %v10477_v15 = vsub.f32 %v4150_v25, %v10460_v49  ;;  %v4152_v20 = vmul.f32 %v10462_v18, %v10462_v18  ;;  %v4342_v8 = vand.u32 4294901760, %v10489_v47  ;;  %v7264_v16 = vpack.c.bf16 %v4316_v19, %v4309_v34 }
 0x552   : > { %v10492_v21 = vsub.f32 %v4149_v40, %v10470_v54  ;;  %v4151_v25 = vmul.f32 %v10472_v11, %v10472_v11  ;;  %v4323_v28 = vand.u32 4294901760, %v4322_v63 }
 0x553   : > { %v10982_v10 = vand.u32 4294901760, %v10477_v15  ;;  %v10497_v3 = vand.u32 4294901760, %v4152_v20  ;;  %v4343_v19 = vsub.f32 %v10489_v47, %v4342_v8 }
 0x554   : > { %v10499_v50 = vand.u32 4294901760, %v4151_v25  ;;  %v4252_v12 = vand.u32 4294901760, %v10492_v21 }
 0x555   : > { %v4263_v6 = vsub.f32 %v10477_v15, %v10982_v10  ;;  %v10512_v40 = vsub.f32 %v4152_v20, %v10497_v3  ;;  %v4330_v20 = vand.u32 4294901760, %v4329_v22 }
 0x556   : > { %v10517_v46 = vsub.f32 %v4151_v25, %v10499_v50  ;;  %v4253_v57 = vsub.f32 %v10492_v21, %v4252_v12  ;;  %v4336_v25 = vsub.f32 %v10484_v31, %v4335_v51 }
 0x557   : > { %v10986_v45 = vand.u32 4294901760, %v10512_v40  ;;  %v4264_v17 = vand.u32 4294901760, %v4263_v6  ;;  %v7268_v22 = vpack.c.bf16 %v4330_v20, %v4323_v28 }
 0x558   : > { %v4254_v56 = vand.u32 4294901760, %v4253_v57  ;;  %v4272_v10 = vand.u32 4294901760, %v10517_v46  ;;  %v4337_v6 = vand.u32 4294901760, %v4336_v25 }
 0x559   : > { %v4283_v41 = vsub.f32 %v10512_v40, %v10986_v45  ;;  %v4344_v45 = vand.u32 4294901760, %v4343_v19 }
 0x55a   : > { %6264 = vmatprep.mubr.f32.mxu0 %v4254_v56  ;;  %v4273_v57 = vsub.f32 %v10517_v46, %v4272_v10 }
 0x55b   : > { %6265 = vmatmul.mubr.f32.vlgmr.msra.gmra.mrb[12].mxu0 %v4264_v17  ;;  %v4284_v63 = vand.u32 4294901760, %v4283_v41  ;;  %v7272_v56 = vpack.c.bf16 %v4344_v45, %v4337_v6  ;;  %v7296_v41 = vpack.c.bf16 %v10438_v44, %v10433_v24  ;;  %v7300_v17 = vpack.c.bf16 %v10454_v38, %v10449_v58 }
 0x55c   : > { %7263 = vmatpush3.bf16.msra.mxu0 %v10345_v59  ;;  %v4274_v34 = vand.u32 4294901760, %v4273_v57  ;;  %v7304_v59 = vpack.c.bf16 %v10489_v47, %v10484_v31  ;;  %v11357_v45 = vand.u32 4294901760, %v10374_v2 }
 0x55d   : > { %7265 = vmatprep.subr.bf16.mxu0 %v7264_v16 }
 0x55e   : > { %6267 = vmatprep.mubr.f32.mxu0 %v4274_v34 }
 0x55f   : > { %6268 = vmatmul.mubr.f32.gmra.mrb[14].mxu0 %v4284_v63 }
 0x560   : > { %7267 = vmatpush3.bf16.msra.mxu0 %v7264_v16  ;;  %6302 = vmatprep.mubr.f32.mxu0 %v10470_v54 }
 0x561   : > { %7269 = vmatprep.subr.bf16.mxu0 %v7268_v22 }
 0x564   : > { %7271 = vmatpush3.bf16.msra.mxu0 %v7268_v22 }
 0x565   : > { %7273 = vmatprep.subr.bf16.mxu0 %v7272_v56 }
 0x568   : > { %7275 = vmatpush3.bf16.msra.mxu0 %v7272_v56 }
 0x569   : > { %7277 = vmatprep.subr.bf16.mxu0 %v10366_v42 }
 0x56c   : > { %7279 = vmatpush3.bf16.msra.mxu0 %v10366_v42  ;;  %v11345_v42 = vand.u32 4294901760, %v10326_v36  ;;  %v11350_v36 = vand.u32 4294901760, %v10449_v58  ;;  %v11355_v58 = vand.u32 4294901760, %v10360_v9 }
 0x56d   : > { %7281 = vmatprep.subr.bf16.mxu0 %v10380_v60 }
 0x570   : > { %7283 = vmatpush3.bf16.msra.mxu0 %v10380_v60  ;;  %v11346_v60 = vand.u32 4294901760, %v10329_v27  ;;  %v11351_v27 = vand.u32 4294901760, %v10454_v38  ;;  %v11356_v38 = vand.u32 4294901760, %v10362_v30 }
 0x571   : > { %7285 = vmatprep.subr.bf16.mxu0 %v10400_v5 }
 0x572   : > { %v7356_v28 = vpack.c.bf16 %v11346_v60, %v11345_v42  ;;  %v7376_v16 = vpack.c.bf16 %v11356_v38, %v11355_v58 }
 0x574   : > { %7287 = vmatpush3.bf16.msra.mxu0 %v10400_v5  ;;  %v11347_v5 = vand.u32 4294901760, %v10433_v24  ;;  %v11354_v24 = vand.u32 4294901760, %v10350_v52  ;;  %v11360_v52 = vand.u32 4294901760, %v10387_v55 }
 0x575   : > { %7289 = vmatprep.subr.bf16.mxu0 %v10402_v23 }
 0x578   : > { %7291 = vmatpush3.bf16.msra.mxu0 %v10402_v23  ;;  %v11348_v23 = vand.u32 4294901760, %v10438_v44 }
 0x579   : > { %7293 = vmatprep.subr.bf16.mxu0 %v10406_v53 }
 0x57b   : > { %6303 = vmatmul.mubr.f32.vlgmr.msra.gmra.mrb[12].mxu0 %v10460_v49 }
 0x57c   : > { %6305 = vmatprep.mubr.f32.mxu0 %v10499_v50  ;;  %7295 = vmatpush3.bf16.msra.mxu0 %v10406_v53  ;;  %v7360_v53 = vpack.c.bf16 %v11348_v23, %v11347_v5 }
 0x57d   : > { %7297 = vmatprep.subr.bf16.mxu0 %v7296_v41 }
 0x57f   : > { %6306 = vmatmul.mubr.f32.gmra.mrb[14].mxu0 %v10497_v3 }
 0x580   : > { %7299 = vmatpush3.bf16.msra.mxu0 %v7296_v41  ;;  %6340 = vmatprep.mubr.f32.mxu0 %v10492_v21 }
 0x581   : > { %7301 = vmatprep.subr.bf16.mxu0 %v7300_v17 }
 0x584   : > { %7303 = vmatpush3.bf16.msra.mxu0 %v7300_v17 }
 0x585   : > { %7305 = vmatprep.subr.bf16.mxu0 %v7304_v59 }
 0x588   : > { %7307 = vmatpush3.bf16.msra.mxu0 %v7304_v59 }
 0x589   : > { %7309 = vmatprep.subr.bf16.mxu0 %v10410_v43 }
 0x58c   : > { %7311 = vmatpush3.bf16.msra.mxu0 %v10410_v43  ;;  %v11349_v43 = vand.u32 4294901760, %v10477_v15 }
 0x58d   : > { %7313 = vmatprep.subr.bf16.mxu0 %v10414_v61 }
 0x590   : > { %7315 = vmatpush3.bf16.msra.mxu0 %v10414_v61  ;;  %v7364_v61 = vpack.c.bf16 %v11351_v27, %v11350_v36 }
 0x591   : > { %7317 = vmatprep.subr.bf16.mxu0 %v10418_v1 }
 0x594   : > { %7319 = vmatpush3.bf16.msra.mxu0 %v10418_v1  ;;  %v11352_v1 = vand.u32 4294901760, %v10512_v40 }
 0x595   : > { %7321 = vmatprep.subr.bf16.mxu0 %v10422_v32 }
 0x598   : > { %7323 = vmatpush3.bf16.msra.mxu0 %v10422_v32  ;;  %v11353_v32 = vand.u32 4294901760, %v10348_v29  ;;  %v11359_v29 = vand.u32 4294901760, %v10385_v37 }
 0x599   : > { %7325 = vmatprep.subr.bf16.mxu0 %v10264_v0 }
 0x59a   : > { %v7372_v44 = vpack.c.bf16 %v11354_v24, %v11353_v32  ;;  %v7384_v47 = vpack.c.bf16 %v11360_v52, %v11359_v29 }
 0x59b   : > { %6341 = vmatmul.mubr.f32.vlgmr.msra.gmra.mrb[12].mxu0 %v10477_v15  ;;  %v11358_v15 = vand.u32 4294901760, %v10376_v14  ;;  %v443_v14 = vld [vmem:[%s10716_s7 + $0x4] ss:$0 sm:$0xff] }
 0x59c   : > { %6343 = vmatprep.mubr.f32.mxu0 %v10517_v46  ;;  %7327 = vmatpush3.bf16.msra.mxu0 %v10264_v0  ;;  %v7368_v46 = vpack.c.bf16 %v4342_v8, %v4335_v51 }
 0x59d   : > { %7329 = vmatprep.subr.bf16.mxu0 %v10280_v48  ;;  %v7380_v31 = vpack.c.bf16 %v11358_v15, %v11357_v45 }
 0x59f   : > { %6344 = vmatmul.mubr.f32.gmra.mrb[14].mxu0 %v10512_v40 }
 0x5a0   : > { %7331 = vmatpush3.bf16.msra.mxu0 %v10280_v48  ;;  %6378 = vmatprep.mubr.f32.mxu0 %v4252_v12 }
 0x5a1   : > { %7333 = vmatprep.subr.bf16.mxu0 %v10298_v33 }
 0x5a4   : > { %7335 = vmatpush3.bf16.msra.mxu0 %v10298_v33 }
 0x5a5   : > { %7337 = vmatprep.subr.bf16.mxu0 %v10310_v13 }
 0x5a8   : > { %7339 = vmatpush3.bf16.msra.mxu0 %v10310_v13 }
 0x5a9   : > { %7341 = vmatprep.subr.bf16.mxu0 %v10315_v62 }
 0x5ac   : > { %7343 = vmatpush3.bf16.msra.mxu0 %v10315_v62 }
 0x5ad   : > { %7345 = vmatprep.subr.bf16.mxu0 %v10319_v4 }
 0x5b0   : > { %7347 = vmatpush3.bf16.msra.mxu0 %v10319_v4 }
 0x5b1   : > { %7349 = vmatprep.subr.bf16.mxu0 %v10323_v39 }
 0x5b4   : > { %7351 = vmatpush3.bf16.msra.mxu0 %v10323_v39 }
 0x5b5   : > { %7353 = vmatprep.subr.bf16.mxu0 %v10335_v7 }
 0x5b8   : > { %7355 = vmatpush3.bf16.msra.mxu0 %v10335_v7 }
 0x5b9   : > { %7357 = vmatprep.subr.bf16.mxu0 %v7356_v28 }
 0x5bb   : > { %6379 = vmatmul.mubr.f32.vlgmr.msra.gmra.mrb[12].mxu0 %v11349_v43 }
 0x5bc   : > { %6381 = vmatprep.mubr.f32.mxu0 %v4272_v10  ;;  %7359 = vmatpush3.bf16.msra.mxu0 %v7356_v28 }
 0x5bd   : > { %7361 = vmatprep.subr.bf16.mxu0 %v7360_v53 }
 0x5bf   : > { %6382 = vmatmul.mubr.f32.gmra.mrb[14].mxu0 %v11352_v1 }
 0x5c0   : > { %7363 = vmatpush3.bf16.msra.mxu0 %v7360_v53  ;;  %6416 = vmatprep.mubr.f32.mxu0 %v10470_v54 }
 0x5c1   : > { %7365 = vmatprep.subr.bf16.mxu0 %v7364_v61 }
 0x5c4   : > { %7367 = vmatpush3.bf16.msra.mxu0 %v7364_v61 }
 0x5c5   : > { %7369 = vmatprep.subr.bf16.mxu0 %v7368_v46 }
 0x5c8   : > { %7371 = vmatpush3.bf16.msra.mxu0 %v7368_v46 }
 0x5c9   : > { %7373 = vmatprep.subr.bf16.mxu0 %v7372_v44 }
 0x5cc   : > { %7375 = vmatpush3.bf16.msra.mxu0 %v7372_v44 }
 0x5cd   : > { %7377 = vmatprep.subr.bf16.mxu0 %v7376_v16 }
 0x5d0   : > { %7379 = vmatpush3.bf16.msra.mxu0 %v7376_v16 }
 0x5d1   : > { %7381 = vmatprep.subr.bf16.mxu0 %v7380_v31 }
 0x5d4   : > { %7383 = vmatpush3.bf16.msra.mxu0 %v7380_v31 }
 0x5d5   : > { %7385 = vmatprep.subr.bf16.mxu0 %v7384_v47 }
 0x5d8   : > { %7387 = vmatpush3.bf16.msra.mxu0 %v7384_v47 }
 0x5d9   : > { %7389 = vmatprep.subr.bf16.mxu0 %v10264_v0 }
 0x5db   : > { %6417 = vmatmul.mubr.f32.vlgmr.msra.gmra.mrb[12].mxu0 %v10460_v49 }
 0x5dc   : > { %6419 = vmatprep.mubr.f32.mxu0 %v10499_v50  ;;  %7391 = vmatpush3.bf16.msra.mxu0 %v10264_v0 }
 0x5dd   : > { %7393 = vmatprep.subr.bf16.mxu0 %v10280_v48 }
 0x5df   : > { %6420 = vmatmul.mubr.f32.gmra.mrb[14].mxu0 %v10497_v3 }
 0x5e0   : > { %7395 = vmatpush3.bf16.msra.mxu0 %v10280_v48  ;;  %6454 = vmatprep.mubr.f32.mxu0 %v10470_v54 }
 0x5e1   : > { %7397 = vmatprep.subr.bf16.mxu0 %v10298_v33 }
 0x5e4   : > { %7399 = vmatpush3.bf16.msra.mxu0 %v10298_v33 }
 0x5e5   : > { %7401 = vmatprep.subr.bf16.mxu0 %v10310_v13 }
 0x5e8   : > { %7403 = vmatpush3.bf16.msra.mxu0 %v10310_v13 }
 0x5e9   : > { %7405 = vmatprep.subr.bf16.mxu0 %v10315_v62 }
 0x5ec   : > { %7407 = vmatpush3.bf16.msra.mxu0 %v10315_v62 }
 0x5ed   : > { %7409 = vmatprep.subr.bf16.mxu0 %v10319_v4 }
 0x5f0   : > { %7411 = vmatpush3.bf16.msra.mxu0 %v10319_v4 }
 0x5f1   : > { %7413 = vmatprep.subr.bf16.mxu0 %v10323_v39 }
 0x5f4   : > { %7415 = vmatpush3.bf16.msra.mxu0 %v10323_v39 }
 0x5f5   : > { %7417 = vmatprep.subr.bf16.mxu0 %v10335_v7 }
 0x5f8   : > { %7419 = vmatpush3.bf16.msra.mxu0 %v10335_v7  ;;  %v442_v7 = vld [vmem:[%s10716_s7 + $0x3] ss:$0 sm:$0xff] }
 0x5fb   : > { %6455 = vmatmul.mubr.f32.vlgmr.msra.gmra.mrb[12].mxu0 %v10460_v49 }
 0x5fc   : > { %6457 = vmatprep.mubr.f32.mxu0 %v10499_v50 }
 0x5ff   : > { %6458 = vmatmul.mubr.f32.gmra.mrb[14].mxu0 %v10497_v3 }
 0x6ce   : > { %v6456_v0 = vpop.f32.mrb[12].mxu0 }
 0x6cf   : > { %v7444_v48 = vadd.f32 1e-05, %v6456_v0  ;;  %v4917_v33 = vpop.f32.mrb[13].mxu0 }
 0x6d0   : > { %v7445_v13 = vadd.f32 1e-05, %v4917_v33 }
 0x6d1   : > { %7649 = vrsqrt.f32 %v7444_v48 }
 0x6d2   : > { %7651 = vrsqrt.f32 %v7445_v13  ;;  %v6459_v62 = vpop.f32.mrb[14].mxu0 }
 0x6d3   : > { %v7446_v4 = vadd.f32 1e-05, %v6459_v62  ;;  %v4929_v9 = vpop.f32.mrb[15].mxu0 }
 0x6d4   : > { %v7447_v39 = vadd.f32 1e-05, %v4929_v9 }
 0x6d5   : > { %7653 = vrsqrt.f32 %v7446_v4 }
 0x6d6   : > { %7655 = vrsqrt.f32 %v7447_v39 }
 0x6db   : > { %v7650_v30 = vpop.eup %7649 }
 0x6dc   : > { %v7652_v50 = vpop.eup %7651  ;;  %v4944_v2 = vmul.f32 %v7650_v30, %v10440_v35 }
 0x6dd   : > { %v4943_v37 = vmul.f32 %v7652_v50, %v10444_v26 }
 0x6de   : > { %v4948_v55 = vmul.f32 %v4944_v2, %v442_v7 }
 0x6df   : > { %v7654_v49 = vpop.eup %7653  ;;  %v4947_v54 = vmul.f32 %v4943_v37, %v442_v7 }
 0x6e0   : > { %v7656_v21 = vpop.eup %7655  ;;  %v4952_v10 = vadd.f32 %v4948_v55, %v443_v14  ;;  %v4946_v3 = vmul.f32 %v7654_v49, %v10462_v18 }
 0x6e1   : > { %v4951_v12 = vadd.f32 %v4947_v54, %v443_v14  ;;  %v4945_v40 = vmul.f32 %v7656_v21, %v10472_v11 }
 0x6e2   : > { %v4956_v51 = vmax.f32 %v4952_v10, 0.0  ;;  %v4950_v8 = vmul.f32 %v4946_v3, %v442_v7 }
 0x6e3   : > { %v4955_v35 = vmax.f32 %v4951_v12, 0.0  ;;  %v4949_v20 = vmul.f32 %v4945_v40, %v442_v7 }
 0x6e4   : > { %4960 = vst [vmem:[%s435_s2 + $0x8] sm:$0xff] %v4956_v51  ;;  %v4954_v26 = vadd.f32 %v4950_v8, %v443_v14 }
 0x6e5   : > { %4959 = vst [vmem:[%s435_s2] sm:$0xff] %v4955_v35  ;;  %v4953_v25 = vadd.f32 %v4949_v20, %v443_v14 }
 0x6e6   : > { %v4958_v19 = vmax.f32 %v4954_v26, 0.0 }
 0x6e7   : > { %v4957_v18 = vmax.f32 %v4953_v25, 0.0 }
 0x6e8   : > { %4962 = vst [vmem:[%s435_s2 + $0x18] sm:$0xff] %v4958_v19 }
 0x6e9   : > { %4961 = vst [vmem:[%s435_s2 + $0x10] sm:$0xff] %v4957_v18 }
 0x6ea   : > { %7870 = shalt.err (!%p7867_p7)
}
 0x6eb   : > { %s7871_s16 = scalar_lea.hbm %s10664_s4, 512  ;;  %s7875_s3 = scalar_lea.hbm %s10717_s8, 2048 }
 0x6ec   : > { %p7872_p9 = scmp.ne.s32.totalorder %s10664_s4, %s7871_s16  ;;  %p7876_p1 = scmp.lt.u32.totalorder %s10664_s4, %s10717_s8 }
 0x6ed   : > { %p7877_p11 = scmp.lt.u32.totalorder %s7875_s3, %s7871_s16  ;;  %p7879_p2 = scmp.lt.u32.totalorder %s7871_s16, %s10664_s4 }
 0x6ee   : > { %p7873_p3 = pnand %p7872_p9, %p11361_p13 }
 0x6ef   : > { %p7878_p12 = por %p7877_p11, %p7876_p1 }
 0x6f0   : > { %p7874_p10 = pneg %p7873_p3 }
 0x6f1   : > { %p7880_p5 = por %p7879_p2, %p7878_p12 }
 0x6f3   : > { %p7881_p8 = pnand %p7880_p5, %p7874_p10 }
 0x6f5   : > { %7884 = shalt.err (!%p7881_p8)
}
 0x6f6   : > { %s7954_s25 = smov 128   ;;  %s7955_s19 = smov 8  }
 0x6f7   : > { %7564 = dma.vmem_to_hbm [thread:$0]  (%p11361_p13), %s10666_s13, 512, %s10664_s4, %s4964_s11, %s7954_s25, %s7954_s25, %s7955_s19  }
 0x6f8 PF: > { %p7604_p0 = scmp.ge.s32.totalorder %s7939_s30, 2  ;;  %s4992_s15 = sand.u32 1, %s7927_s27  }
 0x6f9   : > { %p11362_p4 = scmp.ne.s32.totalorder %s11005_s24, 0  ;;  %s4993_s0 = scalar_lea.sflag [#allocation4], %s4992_s15 }
 0x6fb   : > { %p7590_p6 = pnand %p7604_p0, %p11362_p4 }
 0x6fd   : > { %7922 = dma.done.wait (!%p7590_p6), %s4993_s0, 512  }
 0x6fe   : > { %7924 = vsyncadd (!%p7590_p6), %s4993_s0, 4294966784  ;;  %s11363_s2 = sld [smem:[#allocation21_spill]]  ;;  %p26_p7 = scmp.ge.s32.totalorder %s8166_s23, 6  }
 0x6ff   : > { %s11364_s27 = smov %s7931_s28  ;;  %s11365_s28 = smov %s7935_s29 }
 0x700   : > { %s11367_s30 = smov %s8166_s23  ;;  %28 = sbr.rel (!%p26_p7) target bundleno = 16 (0x10), region = 131 }
 0x704   : > { %s11366_s29 = smov %s11363_s2 }
 0x707   :  { %4998 = vsyncpa [#allocation3], 1 }
 0x708   :  { %5000 = vsyncpa [#allocation3 + $0x1], 1 }
 0x709   :  { %5001 = vsyncpa [#allocation6], 1 }
 0x70a   :  { %5003 = vsyncpa [#allocation6 + $0x1], 1 }
 0x70b   :  { %5004 = vsyncpa [#allocation9], 1 }
 0x70c   :  { %5005 = vsyncpa [#allocation12], 1 }
 0x70d   :  { %5006 = vsyncpa [#allocation4], 1 }
 0x70e   :  { %5008 = vsyncpa [#allocation4 + $0x1], 1 }

// kernel: tpu_custom_call.1
= control target key start
LH: loop header
LB: loop body
LE: loop exit
PB: predicated region body
PF: predicated region fallthrough
CT: control target
= control target key end

     0   :  { %s2489_s0 = inlined_call_operand.hbm [shape: f32[128,128], index: 0, kind: input, shape index: {}]   ;;  %s2490_s1 = inlined_call_operand.hbm [shape: f32[128,128], index: 1, kind: input, shape index: {}]   ;;  %s2491_s2 = inlined_call_operand.hbm [shape: f32[128,256], index: 2, kind: input, shape index: {}]   ;;  %s2492_s3 = inlined_call_operand.hbm [shape: f32[256,128], index: 3, kind: input, shape index: {}]   ;;  %s2493_s4 = inlined_call_operand.hbm [shape: f32[128,128], index: 4, kind: input, shape index: {}]   ;;  %s2494_s5 = inlined_call_operand.hbm [shape: f32[128,128], index: 5, kind: input, shape index: {}]   ;;  %s2495_s6 = inlined_call_operand.hbm [shape: f32[128,128], index: 6, kind: input, shape index: {}]   ;;  %s2496_s7 = inlined_call_operand.vmem [shape: f32[8,256], index: 7, kind: input, shape index: {}]   ;;  %s2497_s8 = inlined_call_operand.hbm [shape: f32[128,128], index: 8, kind: output, shape index: {}]  }
   0x1   :  { %2505 = sst [smem:[#allocation22_spill]] %s2489_s0 }
   0x2   :  { %2506 = sst [smem:[#allocation23_spill]] %s2491_s2 }
   0x3   :  { %2507 = sst [smem:[#allocation24_spill]] %s2492_s3 }
   0x4   :  { %2508 = sst [smem:[#allocation25_spill]] %s2493_s4 }
   0x5   :  { %2509 = sst [smem:[#allocation26_spill]] %s2494_s5 }
   0x6   :  { %2510 = sst [smem:[#allocation27_spill]] %s2495_s6 }
   0x7   :  { %13 = vsyncpa [#allocation3], 0 }
   0x8   :  { %15 = vsyncpa [#allocation3 + $0x1], 0 }
   0x9   :  { %16 = vsyncpa [#allocation6], 0 }
   0xa   :  { %18 = vsyncpa [#allocation6 + $0x1], 0 }
   0xb   :  { %19 = vsyncpa [#allocation9], 0 }
   0xc   :  { %20 = vsyncpa [#allocation12], 0 }
   0xd   :  { %21 = vsyncpa [#allocation4], 0 }
   0xe   :  { %23 = vsyncpa [#allocation4 + $0x1], 0  ;;  %s2094_s27 = smov 0   ;;  %s2096_s28 = smov 0  }
   0xf   :  { %s2098_s29 = smov 0   ;;  %s2100_s30 = smov 0  }
  0x10 LB: > { %s2034_s9 = smov [#allocation7]   ;;  %s2115_s11 = sadd.s32 4294967295, %s2032_s30   ;;  %s2032_s30 = sphi %s2100_s30, %s2541_s30   ;;  %s2028_s29 = sphi %s2098_s29, %s2540_s29   ;;  %s2024_s28 = sphi %s2096_s28, %s2539_s28   ;;  %s2020_s27 = sphi %s2094_s27, %s2538_s27  }
  0x11   : > { %s250_s10 = sshll.u32 %s2034_s9, 4  ;;  %p1208_p0 = scmp.ge.s32.totalorder %s2032_s30, 1  ;;  %s2120_s10 = int_to_ptr.vmem [resolvable:$true] %s250_s10 }
  0x12   : > { %p2498_p1 = scmp.eq.s32.totalorder %s2115_s11, 0  ;;  %p238_p2 = scmp.lt.s32.totalorder %s2032_s30, 5 }
  0x13   : > { %s2035_s13 = smov [#allocation8]   ;;  %s2036_s16 = smov [#allocation11]  }
  0x14   : > { %p2122_p3 = pnand %p1208_p0, %p238_p2  ;;  %s263_s14 = sshll.u32 %s2035_s13, 4  ;;  %s2134_s14 = int_to_ptr.vmem [resolvable:$true] %s263_s14 }
  0x15   : > { %s2136_s17 = sshll.u32 %s2036_s16, 4  ;;  %s2513_s2 = sld [smem:[#allocation23_spill]]  ;;  %s290_s17 = int_to_ptr.vmem [resolvable:$true] %s2136_s17 }
  0x16   : > { %s2511_s12 = scalar_select %p2122_p3, 1, 0 }
  0x17   : > { %p1659_p4 = pneg %p2122_p3 }
  0x19   : > { %p2130_p5 = pnand %p1659_p4, %p2498_p1 }
  0x1b   : > { %s1750_s20 = scalar_lea.hbm %s2513_s2, 4096  ;;  %p2146_p7 = pneg %p2130_p5 }
  0x1c   : > { %p1751_p6 = scmp.ne.s32.totalorder %s2513_s2, %s1750_s20  ;;  %p1757_p10 = scmp.lt.u32.totalorder %s1750_s20, %s2513_s2 }
  0x1e   : > { %p1753_p8 = pnand %p2146_p7, %p1751_p6 }
  0x20   : > { %p1754_p9 = pneg %p1753_p8 }
  0x22   : > { %p1759_p11 = pnand %p1757_p10, %p1754_p9 }
  0x24   : > { %1762 = shalt.err (!%p1759_p11)
}
  0x25   : > { %s1763_s26 = scalar_lea.vmem %s2120_s10, 4096  ;;  %p1771_p2 = scmp.lt.s32.totalorder %s2120_s10, %s2120_s10 }
  0x26   : > { %p1764_p12 = scmp.ne.s32.totalorder %s2120_s10, %s1763_s26  ;;  %p1772_p4 = scmp.lt.s32.totalorder %s1763_s26, %s1763_s26 }
  0x28   : > { %p1766_p13 = pnand %p1764_p12, %p2146_p7  ;;  %p1773_p6 = por %p1772_p4, %p1771_p2 }
  0x2a   : > { %p1767_p0 = pneg %p1766_p13 }
  0x2c   : > { %p1774_p8 = pnand %p1773_p6, %p1767_p0 }
  0x2e   : > { %1777 = shalt.err (!%p1774_p8)
}
  0x2f   : > { %s2037_s9 = smov 256   ;;  %s2038_s13 = smov 16  }
  0x30   : > { %1662 = dma.hbm_to_vmem [thread:$0]  (!%p2130_p5), %s2513_s2, 4096, %s2120_s10, [#allocation6], %s2037_s9, %s2037_s9, %s2038_s13  }
  0x31   : > { %s2515_s3 = sld [smem:[#allocation24_spill]] }
  0x37   : > { %s1778_s21 = scalar_lea.hbm %s2515_s3, 4096 }
  0x38   : > { %p1779_p9 = scmp.ne.s32.totalorder %s2515_s3, %s1778_s21  ;;  %p1785_p12 = scmp.lt.u32.totalorder %s1778_s21, %s2515_s3 }
  0x3a   : > { %p1781_p10 = pnand %p1779_p9, %p2146_p7 }
  0x3c   : > { %p1782_p11 = pneg %p1781_p10 }
  0x3e   : > { %p1787_p13 = pnand %p1785_p12, %p1782_p11 }
  0x40   : > { %1790 = shalt.err (!%p1787_p13)
}
  0x41   : > { %s1791_s10 = scalar_lea.vmem %s2134_s14, 4096  ;;  %p1799_p6 = scmp.lt.s32.totalorder %s2134_s14, %s2134_s14 }
  0x42   : > { %p1792_p0 = scmp.ne.s32.totalorder %s2134_s14, %s1791_s10  ;;  %p1800_p8 = scmp.lt.s32.totalorder %s1791_s10, %s1791_s10 }
  0x44   : > { %p1794_p2 = pnand %p1792_p0, %p2146_p7  ;;  %p1801_p9 = por %p1800_p8, %p1799_p6 }
  0x46   : > { %p1795_p4 = pneg %p1794_p2 }
  0x48   : > { %p1802_p10 = pnand %p1801_p9, %p1795_p4 }
  0x4a   : > { %1805 = shalt.err (!%p1802_p10)
}
  0x4b   : > { %s2500_s9 = smov 128   ;;  %s2502_s13 = smov 8  }
  0x4c   : > { %1665 = dma.hbm_to_vmem [thread:$0]  (!%p2130_p5), %s2515_s3, 4096, %s2134_s14, [#allocation9], %s2500_s9, %s2500_s9, %s2502_s13  }
  0x4d   : > { %s2516_s5 = sld [smem:[#allocation26_spill]] }
  0x53   : > { %s1806_s21 = scalar_lea.hbm %s2516_s5, 2048 }
  0x54   : > { %p1807_p11 = scmp.ne.s32.totalorder %s2516_s5, %s1806_s21  ;;  %p1813_p0 = scmp.lt.u32.totalorder %s1806_s21, %s2516_s5 }
  0x56   : > { %p1809_p12 = pnand %p1807_p11, %p2146_p7 }
  0x58   : > { %p1810_p13 = pneg %p1809_p12 }
  0x5a   : > { %p1815_p2 = pnand %p1813_p0, %p1810_p13 }
  0x5c   : > { %1818 = shalt.err (!%p1815_p2)
}
  0x5d   : > { %s1819_s10 = scalar_lea.vmem %s290_s17, 2048  ;;  %p1827_p9 = scmp.lt.s32.totalorder %s290_s17, %s290_s17 }
  0x5e   : > { %p1820_p4 = scmp.ne.s32.totalorder %s290_s17, %s1819_s10  ;;  %p1828_p10 = scmp.lt.s32.totalorder %s1819_s10, %s1819_s10 }
  0x60   : > { %p1822_p6 = pnand %p1820_p4, %p2146_p7  ;;  %p1829_p1 = por %p1828_p10, %p1827_p9 }
  0x62   : > { %p1823_p8 = pneg %p1822_p6 }
  0x64   : > { %p1830_p3 = pnand %p1829_p1, %p1823_p8 }
  0x66   : > { %1833 = shalt.err (!%p1830_p3)
}
  0x67   : > { %1671 = dma.hbm_to_vmem [thread:$0]  (!%p2130_p5), %s2516_s5, 2048, %s290_s17, [#allocation12], %s2500_s9, %s2500_s9, %s2502_s13  }
  0x68   : > { %s2041_s18 = smov [#allocation10]   ;;  %s2042_s20 = smov [#allocation13]  }
  0x69   : > { %s276_s19 = sshll.u32 %s2041_s18, 4  ;;  %s302_s21 = sshll.u32 %s2042_s20, 4  ;;  %s277_s19 = int_to_ptr.vmem [resolvable:$true] %s276_s19  ;;  %s303_s21 = int_to_ptr.vmem [resolvable:$true] %s302_s21 }
  0x6a   : > { %s2517_s4 = sld [smem:[#allocation25_spill]] }
  0x70   : > { %s1834_s25 = scalar_lea.hbm %s2517_s4, 2048 }
  0x71   : > { %p1835_p1 = scmp.ne.s32.totalorder %s2517_s4, %s1834_s25  ;;  %p1841_p12 = scmp.lt.u32.totalorder %s1834_s25, %s2517_s4 }
  0x73   : > { %p1837_p3 = pnand %p1835_p1, %p2146_p7 }
  0x75   : > { %p1838_p11 = pneg %p1837_p3 }
  0x77   : > { %p1843_p13 = pnand %p1841_p12, %p1838_p11 }
  0x79   : > { %1846 = shalt.err (!%p1843_p13)
}
  0x7a   : > { %s1847_s17 = scalar_lea.vmem %s277_s19, 2048  ;;  %p1855_p6 = scmp.lt.s32.totalorder %s277_s19, %s277_s19 }
  0x7b   : > { %p1848_p0 = scmp.ne.s32.totalorder %s277_s19, %s1847_s17  ;;  %p1856_p8 = scmp.lt.s32.totalorder %s1847_s17, %s1847_s17 }
  0x7d   : > { %p1850_p2 = pnand %p1848_p0, %p2146_p7  ;;  %p1857_p9 = por %p1856_p8, %p1855_p6 }
  0x7f   : > { %p1851_p4 = pneg %p1850_p2 }
  0x81   : > { %p1858_p10 = pnand %p1857_p9, %p1851_p4 }
  0x83   : > { %1861 = shalt.err (!%p1858_p10)
}
  0x84   : > { %1668 = dma.hbm_to_vmem [thread:$0]  (!%p2130_p5), %s2517_s4, 2048, %s277_s19, [#allocation9], %s2500_s9, %s2500_s9, %s2502_s13  }
  0x85   : > { %s2518_s6 = sld [smem:[#allocation27_spill]] }
  0x8b   : > { %s1862_s22 = scalar_lea.hbm %s2518_s6, 2048 }
  0x8c   : > { %p1863_p1 = scmp.ne.s32.totalorder %s2518_s6, %s1862_s22  ;;  %p1869_p12 = scmp.lt.u32.totalorder %s1862_s22, %s2518_s6 }
  0x8e   : > { %p1865_p3 = pnand %p1863_p1, %p2146_p7 }
  0x90   : > { %p1866_p11 = pneg %p1865_p3 }
  0x92   : > { %p1871_p13 = pnand %p1869_p12, %p1866_p11 }
  0x94   : > { %1874 = shalt.err (!%p1871_p13)
}
  0x95   : > { %s1875_s14 = scalar_lea.vmem %s303_s21, 2048  ;;  %p1883_p6 = scmp.lt.s32.totalorder %s303_s21, %s303_s21 }
  0x96   : > { %p1876_p0 = scmp.ne.s32.totalorder %s303_s21, %s1875_s14  ;;  %p1884_p8 = scmp.lt.s32.totalorder %s1875_s14, %s1875_s14 }
  0x98   : > { %p1878_p2 = pnand %p1876_p0, %p2146_p7  ;;  %p1885_p9 = por %p1884_p8, %p1883_p6 }
  0x9a   : > { %p1879_p4 = pneg %p1878_p2 }
  0x9c   : > { %p1886_p10 = pnand %p1885_p9, %p1879_p4 }
  0x9e   : > { %1889 = shalt.err (!%p1886_p10)
}
  0x9f   : > { %1674 = dma.hbm_to_vmem [thread:$0]  (!%p2130_p5), %s2518_s6, 2048, %s303_s21, [#allocation12], %s2500_s9, %s2500_s9, %s2502_s13  }
  0xa0   : > { %s1207_s15 = sadd.s32 4294967294, %s2032_s30   ;;  %s2259_s23 = sadd.s32 1, %s2032_s30  }
  0xa1   : > { %s36_s2 = sadd.s32 1, %s2028_s29  ;;  %s33_s16 = ssub.s32 %s2032_s30, %s2259_s23 }
  0xa2   : > { %p43_p7 = scmp.ne.s32.totalorder %s2028_s29, %s2024_s28  ;;  %p34_p1 = scmp.eq.s32.totalorder %s33_s16, 0 }
  0xa3   : > { %p44_p3 = scmp.eq.s32.totalorder %s2032_s30, 0  ;;  %p49_p11 = scmp.ne.s32.totalorder %s2024_s28, %s2020_s27 }
  0xa4   : > { %p225_p12 = scmp.eq.s32.totalorder %s2115_s11, 3  ;;  %p2520_p0 = scmp.eq.s32.totalorder %s2115_s11, 0 }
  0xa5   : > { %s2271_s18 = scalar_select %p34_p1, %s2028_s29, %s36_s2  }
  0xa6   : > { %p45_p13 = por %p44_p3, %p43_p7  ;;  %p2275_p2 = por %p2520_p0, %p49_p11 }
  0xa7   : > { %2519 = sst [smem:[#allocation21_spill]] %s2271_s18  ;;  %p2279_p5 = por %p225_p12, %p43_p7 }
  0xa8   : > { %p231_p4 = scmp.eq.s32.totalorder %s1207_s15, 3  ;;  %p1691_p6 = scmp.lt.s32.totalorder %s2032_s30, 4 }
  0xa9   : > { %s2522_s21 = scalar_select %p2279_p5, 1, 0 }
  0xaa   : > { %s319_s22 = sand.u32 1, %s2028_s29   ;;  %p2285_p8 = por %p231_p4, %p49_p11 }
  0xab   : > { %s2289_s25 = sshll.u32 %s319_s22, 5  ;;  %s1236_s26 = sshll.u32 %s2032_s30, 9 }
  0xac   : > { %s2523_s24 = scalar_select %p2285_p8, 1, 0 }
  0xad   : > { %s2524_s0 = sld [smem:[#allocation22_spill]]  ;;  %s323_s17 = scalar_lea.vmem [#allocation2], %s2289_s25 }
  0xae   : > { %s330_s15 = sshll.u32 %s323_s17, 4  ;;  %p2298_p9 = pnand %p1691_p6, %p45_p13  ;;  %s2302_s15 = int_to_ptr.vmem [resolvable:$true] %s330_s15 }
  0xaf   : > { %s2307_s10 = scalar_lea.hbm %s2490_s1, %s1236_s26  ;;  %s2309_s14 = scalar_lea.sflag [#allocation3], %s319_s22 }
  0xb0   : > { %p1892_p7 = pneg %p2298_p9 }
  0xb3   : > { %s2295_s19 = scalar_lea.hbm %s2524_s0, %s1236_s26  ;;  %s1895_s4 = scalar_lea.hbm %s2524_s0, 2048 }
  0xb4   : > { %s1890_s13 = scalar_lea.hbm %s2295_s19, 512  ;;  %p1896_p11 = scmp.lt.u32.totalorder %s2295_s19, %s2524_s0 }
  0xb5   : > { %p1891_p10 = scmp.ne.s32.totalorder %s2295_s19, %s1890_s13  ;;  %p1897_p12 = scmp.lt.u32.totalorder %s1895_s4, %s1890_s13 }
  0xb6   : > { %p1899_p0 = scmp.lt.u32.totalorder %s1890_s13, %s2295_s19 }
  0xb7   : > { %p1893_p1 = pnand %p1892_p7, %p1891_p10  ;;  %p1898_p13 = por %p1897_p12, %p1896_p11 }
  0xb9   : > { %p1894_p3 = pneg %p1893_p1  ;;  %p1900_p4 = por %p1899_p0, %p1898_p13 }
  0xbb   : > { %p1901_p6 = pnand %p1900_p4, %p1894_p3 }
  0xbd   : > { %1904 = shalt.err (!%p1901_p6)
}
  0xbe   : > { %s1905_s9 = scalar_lea.vmem %s2302_s15, 512  ;;  %s2043_s3 = smov [#allocation2]  }
  0xbf   : > { %p1906_p10 = scmp.ne.s32.totalorder %s2302_s15, %s1905_s9  ;;  %s1910_s22 = sshll.u32 %s2043_s3, 4  ;;  %s1911_s22 = int_to_ptr.vmem [resolvable:$false] %s1910_s22 }
  0xc0   : > { %s1912_s5 = scalar_lea.vmem %s1911_s22, 1024  ;;  %p1913_p5 = scmp.lt.s32.totalorder %s2302_s15, %s1911_s22 }
  0xc1   : > { %p1908_p1 = pnand %p1906_p10, %p1892_p7  ;;  %p1914_p11 = scmp.lt.s32.totalorder %s1912_s5, %s1905_s9 }
  0xc3   : > { %p1909_p8 = pneg %p1908_p1  ;;  %p1915_p12 = por %p1914_p11, %p1913_p5 }
  0xc5   : > { %p1916_p13 = pnand %p1915_p12, %p1909_p8 }
  0xc7   : > { %1919 = shalt.err (!%p1916_p13)
}
  0xc8   : > { %s2526_s4 = smov 8   ;;  %s2527_s6 = smov 128  }
  0xc9   : > { %1678 = dma.hbm_to_vmem [thread:$0]  (!%p2298_p9), %s2295_s19, 512, %s2302_s15, %s2309_s14, %s2527_s6, %s2527_s6, %s2526_s4  }
  0xca   : > { %s344_s13 = scalar_lea.vmem [#allocation5], %s2289_s25  ;;  %s340_s16 = sand.u32 1, %s2032_s30  }
  0xcb   : > { %s351_s26 = sshll.u32 %s344_s13, 4  ;;  %s2344_s17 = scalar_lea.sflag [#allocation6], %s340_s16  ;;  %s2342_s26 = int_to_ptr.vmem [resolvable:$true] %s351_s26 }
  0xcc   : > { %s1920_s9 = scalar_lea.hbm %s2307_s10, 512  ;;  %s1925_s5 = scalar_lea.hbm %s2490_s1, 2048 }
  0xcd   : > { %p1921_p5 = scmp.ne.s32.totalorder %s2307_s10, %s1920_s9  ;;  %p1926_p0 = scmp.lt.u32.totalorder %s2307_s10, %s2490_s1 }
  0xce   : > { %p1927_p4 = scmp.lt.u32.totalorder %s1925_s5, %s1920_s9  ;;  %p1929_p10 = scmp.lt.u32.totalorder %s1920_s9, %s2307_s10 }
  0xcf   : > { %p1923_p8 = pnand %p1921_p5, %p1892_p7 }
  0xd0   : > { %p1928_p6 = por %p1927_p4, %p1926_p0 }
  0xd1   : > { %p1924_p3 = pneg %p1923_p8 }
  0xd2   : > { %p1930_p1 = por %p1929_p10, %p1928_p6 }
  0xd4   : > { %p1931_p11 = pnand %p1930_p1, %p1924_p3 }
  0xd6   : > { %1934 = shalt.err (!%p1931_p11)
}
  0xd7   : > { %s1935_s25 = scalar_lea.vmem %s2342_s26, 512  ;;  %s2044_s19 = smov [#allocation5]  }
  0xd8   : > { %p1936_p12 = scmp.ne.s32.totalorder %s2342_s26, %s1935_s25  ;;  %s1940_s15 = sshll.u32 %s2044_s19, 4  ;;  %s1941_s15 = int_to_ptr.vmem [resolvable:$false] %s1940_s15 }
  0xd9   : > { %s1942_s0 = scalar_lea.vmem %s1941_s15, 1024  ;;  %p1943_p8 = scmp.lt.s32.totalorder %s2342_s26, %s1941_s15 }
  0xda   : > { %p1938_p13 = pnand %p1936_p12, %p1892_p7  ;;  %p1944_p0 = scmp.lt.s32.totalorder %s1942_s0, %s1935_s25 }
  0xdc   : > { %p1939_p5 = pneg %p1938_p13  ;;  %p1945_p4 = por %p1944_p0, %p1943_p8 }
  0xde   : > { %p1946_p6 = pnand %p1945_p4, %p1939_p5 }
  0xe0   : > { %1949 = shalt.err (!%p1946_p6)
}
  0xe1   : > { %1681 = dma.hbm_to_vmem [thread:$0]  (!%p2298_p9), %s2307_s10, 512, %s2342_s26, %s2344_s17, %s2527_s6, %s2527_s6, %s2526_s4  }
  0xe2   : > { %p2528_p7 = scmp.ne.s32.totalorder %s2511_s12, 0 }
  0xe3   : > { %s2376_s18 = sand.u32 (!%p2528_p7), 1, %s2024_s28  }
  0xe4   : > { %363 = sbr.rel (%p2528_p7) target bundleno = 1202 (0x4b2), region = 52  ;;  %s2379_s14 = sshll.u32 (!%p2528_p7), %s2376_s18, 5 }
  0xe5   : > { %s366_s2 = scalar_lea.sflag (!%p2528_p7), [#allocation3], %s2376_s18  ;;  %s2383_s13 = scalar_lea.vmem (!%p2528_p7), [#allocation2], %s2379_s14 }
  0xeb   : > { %1995 = dma.done.wait (%p2275_p2), %s366_s2, 512  }
  0xec   : > { %1997 = vsyncadd (%p2275_p2), %s366_s2, 4294966784  ;;  %s374_s12 = sand.u32 1, %s2115_s11   ;;  %s2391_s4 = scalar_lea.vmem [#allocation5], %s2379_s14 }
  0xed   : > { %s375_s10 = scalar_lea.sflag [#allocation6], %s374_s12 }
  0xee   : > { %1999 = dma.done.wait (%p2275_p2), %s375_s10, 512  }
  0xef   : > { %2001 = vsyncadd (%p2275_p2), %s375_s10, 4294966784  ;;  %p2529_p9 = scmp.eq.s32.totalorder %s2115_s11, 0 }
  0xf1   : > { %2003 = dma.done.wait (%p2529_p9), [#allocation6], 4096   ;;  %p2530_p3 = pmov %p2529_p9 }
  0xf3   : > { %2005 = vsyncadd (%p2530_p3), [#allocation6], 4294963200  ;;  %p2531_p10 = pmov %p2530_p3 }
  0xf4   : > { %p2532_p1 = pmov %p2530_p3 }
  0xf5   : > { %2007 = dma.done.wait (%p2531_p10), [#allocation9], 6144  }
  0xf6   : > { %2009 = vsyncadd (%p2532_p1), [#allocation9], 4294961152  ;;  %p2533_p11 = pmov %p2532_p1 }
  0xf7   : > { %p2534_p12 = pmov %p2532_p1 }
  0xf8   : > { %2011 = dma.done.wait (%p2533_p11), [#allocation12], 4096  }
  0xf9   : > { %2013 = vsyncadd (%p2534_p12), [#allocation12], 4294963200  ;;  %v2045_v0 = vmov 0.0   ;;  %v455_v1 = vld [vmem:[#allocation7 + $0x8] sm:$0xff]  ;;  %v457_v2 = vld [vmem:[#allocation7 + $0x18] sm:$0xff]  ;;  %s435_s0 = scalar_lea.vmem [#allocation14], %s2379_s14 }
  0xfa   : > { %561 = vmatprep.mubr.f32.mxu0 %v2045_v0  ;;  %v454_v3 = vld [vmem:[#allocation7] sm:$0xff]  ;;  %v1457_v4 = vpack.c.bf16 %v457_v2, %v455_v1  ;;  %v456_v5 = vld [vmem:[#allocation7 + $0x10] sm:$0xff]  ;;  %v459_v6 = vld [vmem:[#allocation7 + $0x28] sm:$0xff]  ;;  %s1238_s2 = sshll.u32 %s2115_s11, 9  ;;  %s1051_s14 = scalar_lea.sflag [#allocation4], %s2376_s18 }
  0xfb   : > { %v461_v7 = vld [vmem:[#allocation7 + $0x38] sm:$0xff]  ;;  %v1459_v8 = vpack.c.bf16 %v456_v5, %v454_v3  ;;  %v458_v10 = vld [vmem:[#allocation7 + $0x20] sm:$0xff]  ;;  %v460_v11 = vld [vmem:[#allocation7 + $0x30] sm:$0xff]  ;;  %p2535_p13 = scmp.ne.s32.totalorder %s2522_s21, 0  ;;  %s2046_s11 = smov [#allocation14]  }
  0xfc   : > { %v1461_v9 = vpack.c.bf16 %v461_v7, %v459_v6  ;;  %v463_v12 = vld [vmem:[#allocation7 + $0x48] sm:$0xff]  ;;  %1458 = vmatprep.subr.bf16.mxu0 %v1457_v4  ;;  %v465_v13 = vld [vmem:[#allocation7 + $0x58] sm:$0xff]  ;;  %v1463_v14 = vpack.c.bf16 %v460_v11, %v458_v10  ;;  %v462_v16 = vld [vmem:[#allocation7 + $0x40] sm:$0xff]  ;;  %s1954_s6 = sshll.u32 %s2046_s11, 4  ;;  %s1955_s6 = int_to_ptr.vmem [resolvable:$false] %s1954_s6 }
  0xfd   : > { %1460 = vmatpush1.bf16.msra.mxu0 %v1459_v8  ;;  %v1465_v15 = vpack.c.bf16 %v465_v13, %v463_v12  ;;  %v464_v17 = vld [vmem:[#allocation7 + $0x50] sm:$0xff]  ;;  %v467_v18 = vld [vmem:[#allocation7 + $0x68] sm:$0xff]  ;;  %v469_v19 = vld [vmem:[#allocation7 + $0x78] sm:$0xff]  ;;  %s1956_s26 = scalar_lea.vmem %s1955_s6, 1024 }
  0xfe   : > { %1462 = vmatprep.subr.bf16.mxu0 %v1461_v9  ;;  %v1467_v20 = vpack.c.bf16 %v464_v17, %v462_v16  ;;  %v1469_v21 = vpack.c.bf16 %v469_v19, %v467_v18  ;;  %v466_v22 = vld [vmem:[#allocation7 + $0x60] sm:$0xff]  ;;  %v468_v23 = vld [vmem:[#allocation7 + $0x70] sm:$0xff]  ;;  %v471_v24 = vld [vmem:[#allocation7 + $0x88] sm:$0xff] }
  0xff   : > { %v473_v25 = vld [vmem:[#allocation7 + $0x98] sm:$0xff]  ;;  %v470_v26 = vld [vmem:[#allocation7 + $0x80] sm:$0xff]  ;;  %v472_v27 = vld [vmem:[#allocation7 + $0x90] sm:$0xff]  ;;  %v1471_v28 = vpack.c.bf16 %v468_v23, %v466_v22 }
 0x100   : > { %v475_v29 = vld [vmem:[#allocation7 + $0xa8] sm:$0xff]  ;;  %v477_v30 = vld [vmem:[#allocation7 + $0xb8] sm:$0xff]  ;;  %v610_v31 = vld [vmem:[#allocation8 + $0x80] sm:$0xff]  ;;  %v1473_v34 = vpack.c.bf16 %v473_v25, %v471_v24  ;;  %v1475_v45 = vpack.c.bf16 %v472_v27, %v470_v26 }
 0x101   : > { %1464 = vmatpush1.bf16.msra.mxu0 %v1463_v14  ;;  %v611_v32 = vld [vmem:[#allocation8 + $0x88] sm:$0xff]  ;;  %v594_v33 = vld [vmem:[#allocation8] sm:$0xff]  ;;  %v612_v37 = vld [vmem:[#allocation8 + $0x90] sm:$0xff]  ;;  %v1477_v49 = vpack.c.bf16 %v477_v30, %v475_v29 }
 0x102   : > { %1466 = vmatprep.subr.bf16.mxu0 %v1465_v15  ;;  %v1489_v35 = vpack.c.bf16 %v611_v32, %v610_v31  ;;  %v595_v36 = vld [vmem:[#allocation8 + $0x8] sm:$0xff]  ;;  %v613_v38 = vld [vmem:[#allocation8 + $0x98] sm:$0xff]  ;;  %v596_v41 = vld [vmem:[#allocation8 + $0x10] sm:$0xff] }
 0x103   : > { %v1491_v39 = vpack.c.bf16 %v595_v36, %v594_v33  ;;  %v1493_v40 = vpack.c.bf16 %v613_v38, %v612_v37  ;;  %v597_v42 = vld [vmem:[#allocation8 + $0x18] sm:$0xff]  ;;  %v614_v43 = vld [vmem:[#allocation8 + $0xa0] sm:$0xff]  ;;  %v615_v44 = vld [vmem:[#allocation8 + $0xa8] sm:$0xff] }
 0x104   : > { %1490 = vmatprep.subr.bf16.mxu1 %v1489_v35  ;;  %v474_v46 = vld [vmem:[#allocation7 + $0xa0] sm:$0xff]  ;;  %v476_v47 = vld [vmem:[#allocation7 + $0xb0] sm:$0xff]  ;;  %v1495_v48 = vpack.c.bf16 %v597_v42, %v596_v41  ;;  %v479_v50 = vld [vmem:[#allocation7 + $0xc8] sm:$0xff]  ;;  %v1497_v51 = vpack.c.bf16 %v615_v44, %v614_v43 }
 0x105   : > { %1468 = vmatpush1.bf16.msra.mxu0 %v1467_v20  ;;  %1492 = vmatpush3.bf16.msra.mxu1 %v1491_v39  ;;  %v598_v52 = vld [vmem:[#allocation8 + $0x20] sm:$0xff]  ;;  %v599_v53 = vld [vmem:[#allocation8 + $0x28] sm:$0xff]  ;;  %v481_v54 = vld [vmem:[#allocation7 + $0xd8] sm:$0xff]  ;;  %v1479_v57 = vpack.c.bf16 %v476_v47, %v474_v46 }
 0x106   : > { %1470 = vmatprep.subr.bf16.mxu0 %v1469_v21  ;;  %1494 = vmatprep.subr.bf16.mxu1 %v1493_v40  ;;  %v616_v55 = vld [vmem:[#allocation8 + $0xb0] sm:$0xff]  ;;  %v617_v56 = vld [vmem:[#allocation8 + $0xb8] sm:$0xff]  ;;  %v478_v58 = vld [vmem:[#allocation7 + $0xc0] sm:$0xff]  ;;  %v1499_v60 = vpack.c.bf16 %v599_v53, %v598_v52  ;;  %v1481_v61 = vpack.c.bf16 %v481_v54, %v479_v50 }
 0x107   : > { %v480_v59 = vld [vmem:[#allocation7 + $0xd0] sm:$0xff]  ;;  %v483_v62 = vld [vmem:[#allocation7 + $0xe8] sm:$0xff]  ;;  %v1501_v63 = vpack.c.bf16 %v617_v56, %v616_v55  ;;  %v601_v2 = vld [vmem:[#allocation8 + $0x38] sm:$0xff]  ;;  %v487_v55 = vlaneseq }
 0x108   : > { %v600_v1 = vld [vmem:[#allocation8 + $0x30] sm:$0xff]  ;;  %v485_v3 = vld [vmem:[#allocation7 + $0xf8] sm:$0xff]  ;;  %v618_v4 = vld [vmem:[#allocation8 + $0xc0] sm:$0xff]  ;;  %v1483_v6 = vpack.c.bf16 %v480_v59, %v478_v58 }
 0x109   : > { %1472 = vmatpush1.bf16.msra.mxu0 %v1471_v28  ;;  %1496 = vmatpush3.bf16.msra.mxu1 %v1495_v48  ;;  %v619_v5 = vld [vmem:[#allocation8 + $0xc8] sm:$0xff]  ;;  %v482_v7 = vld [vmem:[#allocation7 + $0xe0] sm:$0xff]  ;;  %v1503_v8 = vpack.c.bf16 %v601_v2, %v600_v1  ;;  %v1485_v9 = vpack.c.bf16 %v485_v3, %v483_v62  ;;  %v484_v10 = vld [vmem:[#allocation7 + $0xf0] sm:$0xff]  ;;  %v488_v56 = vshrl.u32 %v487_v55, 7 }
 0x10a   : > { %1474 = vmatprep.subr.bf16.mxu0 %v1473_v34  ;;  %1498 = vmatprep.subr.bf16.mxu1 %v1497_v51  ;;  %v1505_v11 = vpack.c.bf16 %v619_v5, %v618_v4  ;;  %v602_v12 = vld [vmem:[#allocation8 + $0x40] sm:$0xff]  ;;  %v603_v13 = vld [vmem:[#allocation8 + $0x48] sm:$0xff]  ;;  %v620_v14 = vld [vmem:[#allocation8 + $0xd0] sm:$0xff]  ;;  %v1487_v16 = vpack.c.bf16 %v484_v10, %v482_v7 }
 0x10b   : > { %v621_v15 = vld [vmem:[#allocation8 + $0xd8] sm:$0xff]  ;;  %v1507_v17 = vpack.c.bf16 %v603_v13, %v602_v12  ;;  %v604_v19 = vld [vmem:[#allocation8 + $0x50] sm:$0xff]  ;;  %v622_v21 = vld [vmem:[#allocation8 + $0xe0] sm:$0xff]  ;;  %v493_v59 = vsub.s32 1, %v488_v56 }
 0x10c   : > { %v1509_v18 = vpack.c.bf16 %v621_v15, %v620_v14  ;;  %v605_v20 = vld [vmem:[#allocation8 + $0x58] sm:$0xff]  ;;  %v623_v22 = vld [vmem:[#allocation8 + $0xe8] sm:$0xff]  ;;  %v446_v23 = vld [vmem:[%s2391_s4] sm:$0xff] }
 0x10d   : > { %1476 = vmatpush1.bf16.msra.mxu0 %v1475_v45  ;;  %1500 = vmatpush3.bf16.msra.mxu1 %v1499_v60  ;;  %v1511_v24 = vpack.c.bf16 %v605_v20, %v604_v19  ;;  %v1513_v25 = vpack.c.bf16 %v623_v22, %v622_v21  ;;  %v447_v26 = vld [vmem:[%s2391_s4 + $0x8] sm:$0xff]  ;;  %v448_v27 = vld [vmem:[%s2391_s4 + $0x10] sm:$0xff]  ;;  %v449_v28 = vld [vmem:[%s2391_s4 + $0x18] sm:$0xff]  ;;  %s2444_s4 = scalar_lea.hbm %s2497_s8, %s1238_s2 }
 0x10e   : > { %1478 = vmatprep.subr.bf16.mxu0 %v1477_v49  ;;  %1502 = vmatprep.subr.bf16.mxu1 %v1501_v63  ;;  %v606_v29 = vld [vmem:[#allocation8 + $0x60] sm:$0xff]  ;;  %v607_v30 = vld [vmem:[#allocation8 + $0x68] sm:$0xff]  ;;  %v624_v32 = vld [vmem:[#allocation8 + $0xf0] sm:$0xff] }
 0x10f   : > { %v1515_v31 = vpack.c.bf16 %v607_v30, %v606_v29  ;;  %v625_v33 = vld [vmem:[#allocation8 + $0xf8] sm:$0xff]  ;;  %v608_v35 = vld [vmem:[#allocation8 + $0x70] sm:$0xff]  ;;  %v715_v38 = vld [vmem:[#allocation10] sm:$0xff] }
 0x110   : > { %v1517_v34 = vpack.c.bf16 %v625_v33, %v624_v32  ;;  %v609_v36 = vld [vmem:[#allocation8 + $0x78] sm:$0xff]  ;;  %v716_v39 = vld [vmem:[#allocation10 + $0x8] sm:$0xff]  ;;  %v816_v40 = vld [vmem:[#allocation11] sm:$0xff] }
 0x111   : > { %1480 = vmatpush1.bf16.msra.mxu0 %v1479_v57  ;;  %1504 = vmatpush3.bf16.msra.mxu1 %v1503_v8  ;;  %v1519_v37 = vpack.c.bf16 %v609_v36, %v608_v35  ;;  %v1521_v41 = vpack.c.bf16 %v716_v39, %v715_v38  ;;  %v817_v42 = vld [vmem:[#allocation11 + $0x8] sm:$0xff]  ;;  %v718_v43 = vld [vmem:[#allocation10 + $0x18] sm:$0xff]  ;;  %v719_v46 = vld [vmem:[#allocation10 + $0x20] sm:$0xff]  ;;  %v489_v57 = vsub.s32 0, %v488_v56 }
 0x112   : > { %1482 = vmatprep.subr.bf16.mxu0 %v1481_v61  ;;  %1506 = vmatprep.subr.bf16.mxu1 %v1505_v11  ;;  %v1553_v44 = vpack.c.bf16 %v817_v42, %v816_v40  ;;  %v720_v47 = vld [vmem:[#allocation10 + $0x28] sm:$0xff]  ;;  %v721_v49 = vld [vmem:[#allocation10 + $0x30] sm:$0xff]  ;;  %v722_v50 = vld [vmem:[#allocation10 + $0x38] sm:$0xff] }
 0x113   : > { %v1529_v48 = vpack.c.bf16 %v720_v47, %v719_v46  ;;  %v1533_v51 = vpack.c.bf16 %v722_v50, %v721_v49  ;;  %v723_v52 = vld [vmem:[#allocation10 + $0x40] sm:$0xff]  ;;  %v724_v53 = vld [vmem:[#allocation10 + $0x48] sm:$0xff]  ;;  %v818_v3 = vld [vmem:[#allocation11 + $0x10] sm:$0xff] }
 0x114   : > { %v1537_v54 = vpack.c.bf16 %v724_v53, %v723_v52  ;;  %v1230_v58 = vld [vmem:[%s2496_s7 + $0x5] ss:$8 sm:$0x3]  ;;  %v819_v4 = vld [vmem:[#allocation11 + $0x18] sm:$0xff]  ;;  %v822_v21 = vld [vmem:[#allocation11 + $0x30] sm:$0xff] }
 0x115   : > { %1484 = vmatpush1.bf16.msra.mxu0 %v1483_v6  ;;  %1508 = vmatpush3.bf16.msra.mxu1 %v1507_v17  ;;  %v490_v60 = vrot.slane %v1230_v58, %v489_v57  ;;  %v494_v61 = vrot.slane %v1230_v58, %v493_v59  ;;  %v1557_v10 = vpack.c.bf16 %v819_v4, %v818_v3  ;;  %v820_v12 = vld [vmem:[#allocation11 + $0x20] sm:$0xff]  ;;  %v821_v13 = vld [vmem:[#allocation11 + $0x28] sm:$0xff]  ;;  %v823_v22 = vld [vmem:[#allocation11 + $0x38] sm:$0xff] }
 0x116   : > { %1486 = vmatprep.subr.bf16.mxu0 %v1485_v9  ;;  %1510 = vmatprep.subr.bf16.mxu1 %v1509_v18  ;;  %v1561_v19 = vpack.c.bf16 %v821_v13, %v820_v12  ;;  %v824_v30 = vld [vmem:[#allocation11 + $0x40] sm:$0xff]  ;;  %v725_v35 = vld [vmem:[#allocation10 + $0x50] sm:$0xff]  ;;  %v726_v36 = vld [vmem:[#allocation10 + $0x58] sm:$0xff] }
 0x117   : > { %v1541_v38 = vpack.c.bf16 %v726_v36, %v725_v35  ;;  %v827_v39 = vld [vmem:[#allocation11 + $0x58] sm:$0xff]  ;;  %v728_v42 = vld [vmem:[#allocation10 + $0x68] sm:$0xff]  ;;  %v729_v46 = vld [vmem:[#allocation10 + $0x70] sm:$0xff] }
 0x118   : > { %v730_v47 = vld [vmem:[#allocation10 + $0x78] sm:$0xff]  ;;  %v830_v49 = vld [vmem:[#allocation11 + $0x70] sm:$0xff]  ;;  %v925_v52 = vld [vmem:[#allocation13] sm:$0xff] }
 0x119   : > { %1488 = vmatpush1.bf16.msra.mxu0 %v1487_v16  ;;  %1512 = vmatpush3.bf16.msra.mxu1 %v1511_v24  ;;  %v831_v50 = vld [vmem:[#allocation11 + $0x78] sm:$0xff]  ;;  %v926_v53 = vld [vmem:[#allocation13 + $0x8] sm:$0xff]  ;;  %v439_v56 = vld [vmem:[%s2496_s7] ss:$0 sm:$0xff] }
 0x11a   : > { %1514 = vmatprep.subr.bf16.mxu1 %v1513_v25  ;;  %1522 = vmatprep.subr.bf16.mxu0 %v1521_v41  ;;  %v450_v59 = vld [vmem:[%s2383_s13] sm:$0xff]  ;;  %v927_v3 = vld [vmem:[#allocation13 + $0x10] sm:$0xff]  ;;  %v928_v4 = vld [vmem:[#allocation13 + $0x18] sm:$0xff] }
 0x11b   : > { %v929_v12 = vld [vmem:[#allocation13 + $0x20] sm:$0xff]  ;;  %v930_v13 = vld [vmem:[#allocation13 + $0x28] sm:$0xff]  ;;  %v939_v35 = vld [vmem:[#allocation13 + $0x70] sm:$0xff] }
 0x11c   : > { %562 = vmatmul.mubr.f32.vlgmr.msra.gmra.mrb[0].mxu0 %v446_v23  ;;  %v940_v36 = vld [vmem:[#allocation13 + $0x78] sm:$0xff] }
 0x11d   : > { %567 = vmatprep.mubr.f32.mxu0 %v2045_v0  ;;  %1516 = vmatpush3.bf16.msra.mxu1 %v1515_v31  ;;  %v825_v31 = vld [vmem:[#allocation11 + $0x48] sm:$0xff] }
 0x11e   : > { %1518 = vmatprep.subr.bf16.mxu1 %v1517_v34  ;;  %1524 = vmatpush3.bf16.msra.mxu0 %v1521_v41  ;;  %v1569_v34 = vpack.c.bf16 %v825_v31, %v824_v30  ;;  %v727_v41 = vld [vmem:[#allocation10 + $0x60] sm:$0xff]  ;;  %v936_v30 = vld [vmem:[#allocation13 + $0x58] sm:$0xff] }
 0x120   : > { %568 = vmatmul.mubr.f32.gmra.mrb[2].mxu0 %v447_v26 }
 0x121   : > { %573 = vmatprep.mubr.f32.mxu0 %v2045_v0  ;;  %1520 = vmatpush3.bf16.msra.mxu1 %v1519_v37  ;;  %v826_v37 = vld [vmem:[#allocation11 + $0x50] sm:$0xff] }
 0x122   : > { %1554 = vmatprep.subr.bf16.mxu1 %v1553_v44  ;;  %v1573_v40 = vpack.c.bf16 %v827_v39, %v826_v37  ;;  %v1613_v37 = vpack.c.bf16 %v940_v36, %v939_v35  ;;  %v441_v39 = vld [vmem:[%s2496_s7 + $0x2] ss:$0 sm:$0xff] }
 0x124   : > { %574 = vmatmul.mubr.f32.gmra.mrb[4].mxu0 %v448_v27 }
 0x125   : > { %579 = vmatprep.mubr.f32.mxu0 %v2045_v0  ;;  %v717_v0 = vld [vmem:[#allocation10 + $0x10] sm:$0xff] }
 0x126   : > { %v1525_v45 = vpack.c.bf16 %v718_v43, %v717_v0  ;;  %v828_v0 = vld [vmem:[#allocation11 + $0x60] sm:$0xff]  ;;  %v1545_v43 = vpack.c.bf16 %v728_v42, %v727_v41 }
 0x128   : > { %580 = vmatmul.mubr.f32.gmra.mrb[6].mxu0 %v449_v28  ;;  %1526 = vmatprep.subr.bf16.mxu0 %v1525_v45  ;;  %v1565_v28 = vpack.c.bf16 %v823_v22, %v822_v21  ;;  %v931_v21 = vld [vmem:[#allocation13 + $0x30] sm:$0xff]  ;;  %v932_v22 = vld [vmem:[#allocation13 + $0x38] sm:$0xff] }
 0x129   : > { %1528 = vmatpush3.bf16.msra.mxu0 %v1525_v45 }
 0x12a   : > { %1530 = vmatprep.subr.bf16.mxu0 %v1529_v48 }
 0x12d   : > { %1532 = vmatpush3.bf16.msra.mxu0 %v1529_v48  ;;  %v1549_v48 = vpack.c.bf16 %v730_v47, %v729_v46 }
 0x12e   : > { %1534 = vmatprep.subr.bf16.mxu0 %v1533_v51 }
 0x131   : > { %1536 = vmatpush3.bf16.msra.mxu0 %v1533_v51  ;;  %v1581_v51 = vpack.c.bf16 %v831_v50, %v830_v49 }
 0x132   : > { %1538 = vmatprep.subr.bf16.mxu0 %v1537_v54 }
 0x135   : > { %1540 = vmatpush3.bf16.msra.mxu0 %v1537_v54  ;;  %v1585_v54 = vpack.c.bf16 %v926_v53, %v925_v52 }
 0x136   : > { %1542 = vmatprep.subr.bf16.mxu0 %v1541_v38 }
 0x139   : > { %1544 = vmatpush3.bf16.msra.mxu0 %v1541_v38  ;;  %v440_v38 = vld [vmem:[%s2496_s7 + $0x1] ss:$0 sm:$0xff] }
 0x13a   : > { %1546 = vmatprep.subr.bf16.mxu0 %v1545_v43 }
 0x13d   : > { %1548 = vmatpush3.bf16.msra.mxu0 %v1545_v43 }
 0x13e   : > { %1550 = vmatprep.subr.bf16.mxu0 %v1549_v48 }
 0x141   : > { %1552 = vmatpush3.bf16.msra.mxu0 %v1549_v48 }
 0x142   : > { %1586 = vmatprep.subr.bf16.mxu0 %v1585_v54 }
 0x1ef   : > { %v563_v62 = vpop.f32.mrb[0].mxu0 }
 0x1f0   : > { %v564_v63 = vadd.f32 %v563_v62, %v490_v60  ;;  %v565_v1 = vpop.f32.mrb[1].mxu0 }
 0x1f1   : > { %v566_v2 = vadd.f32 %v565_v1, %v494_v61 }
 0x1f2   : > { %v586_v7 = vmax.f32 %v564_v63, 0.0 }
 0x1f3   : > { %v569_v5 = vpop.f32.mrb[2].mxu0  ;;  %v587_v6 = vmax.f32 %v566_v2, 0.0  ;;  %v451_v2 = vld [vmem:[%s2383_s13 + $0x8] sm:$0xff] }
 0x1f4   : > { %v570_v8 = vadd.f32 %v569_v5, %v490_v60  ;;  %v571_v9 = vpop.f32.mrb[3].mxu0 }
 0x1f5   : > { %v572_v11 = vadd.f32 %v571_v9, %v494_v61  ;;  %690 = vmatprep.mubr.f32.mxu1 %v587_v6 }
 0x1f6   : > { %691 = vmatmul.mubr.f32.vlgmr.msra.gmra.mrb[0].mxu1 %v586_v7  ;;  %v588_v16 = vmax.f32 %v570_v8, 0.0 }
 0x1f7   : > { %v589_v14 = vmax.f32 %v572_v11, 0.0  ;;  %v575_v15 = vpop.f32.mrb[4].mxu0  ;;  %1556 = vmatpush3.bf16.msra.mxu1 %v1553_v44  ;;  %v829_v44 = vld [vmem:[#allocation11 + $0x68] sm:$0xff]  ;;  %v452_v11 = vld [vmem:[%s2383_s13 + $0x10] sm:$0xff] }
 0x1f8   : > { %v576_v17 = vadd.f32 %v575_v15, %v490_v60  ;;  %v577_v18 = vpop.f32.mrb[5].mxu0  ;;  %1558 = vmatprep.subr.bf16.mxu1 %v1557_v10  ;;  %v1577_v45 = vpack.c.bf16 %v829_v44, %v828_v0 }
 0x1f9   : > { %v578_v20 = vadd.f32 %v577_v18, %v494_v61  ;;  %695 = vmatprep.mubr.f32.mxu1 %v589_v14 }
 0x1fa   : > { %696 = vmatmul.mubr.f32.gmra.mrb[2].mxu1 %v588_v16  ;;  %v590_v25 = vmax.f32 %v576_v17, 0.0 }
 0x1fb   : > { %v591_v23 = vmax.f32 %v578_v20, 0.0  ;;  %v581_v24 = vpop.f32.mrb[6].mxu0  ;;  %1560 = vmatpush3.bf16.msra.mxu1 %v1557_v10  ;;  %v1589_v10 = vpack.c.bf16 %v928_v4, %v927_v3  ;;  %v453_v20 = vld [vmem:[%s2383_s13 + $0x18] sm:$0xff]  ;;  %s1064_s13 = sshll.u32 %s435_s0, 4  ;;  %s2446_s13 = int_to_ptr.vmem [resolvable:$true] %s1064_s13 }
 0x1fc   : > { %v582_v26 = vadd.f32 %v581_v24, %v490_v60  ;;  %v583_v27 = vpop.f32.mrb[7].mxu0  ;;  %1562 = vmatprep.subr.bf16.mxu1 %v1561_v19  ;;  %s1950_s20 = scalar_lea.vmem %s2446_s13, 512  ;;  %p1957_p0 = scmp.lt.s32.totalorder %s2446_s13, %s1955_s6 }
 0x1fd   : > { %v584_v29 = vadd.f32 %v583_v27, %v494_v61  ;;  %700 = vmatprep.mubr.f32.mxu1 %v591_v23  ;;  %v934_v27 = vld [vmem:[#allocation13 + $0x48] sm:$0xff]  ;;  %p1951_p2 = scmp.ne.s32.totalorder %s2446_s13, %s1950_s20  ;;  %p1958_p4 = scmp.lt.s32.totalorder %s1956_s26, %s1950_s20 }
 0x1fe   : > { %701 = vmatmul.mubr.f32.gmra.mrb[4].mxu1 %v590_v25  ;;  %v592_v33 = vmax.f32 %v582_v26, 0.0  ;;  %v1597_v25 = vpack.c.bf16 %v932_v22, %v931_v21  ;;  %v933_v26 = vld [vmem:[#allocation13 + $0x40] sm:$0xff] }
 0x1ff   : > { %v593_v32 = vmax.f32 %v584_v29, 0.0  ;;  %1564 = vmatpush3.bf16.msra.mxu1 %v1561_v19  ;;  %v1593_v19 = vpack.c.bf16 %v930_v13, %v929_v12  ;;  %v935_v29 = vld [vmem:[#allocation13 + $0x50] sm:$0xff]  ;;  %v443_v12 = vld [vmem:[%s2496_s7 + $0x4] ss:$0 sm:$0xff]  ;;  %p1952_p5 = pnand %p1951_p2, %p2535_p13  ;;  %p1959_p6 = por %p1958_p4, %p1957_p0 }
 0x200   : > { %1566 = vmatprep.subr.bf16.mxu1 %v1565_v28  ;;  %v1605_v31 = vpack.c.bf16 %v936_v30, %v935_v29 }
 0x201   : > { %705 = vmatprep.mubr.f32.mxu1 %v593_v32  ;;  %v937_v32 = vld [vmem:[#allocation13 + $0x60] sm:$0xff]  ;;  %p1953_p8 = pneg %p1952_p5 }
 0x202   : > { %706 = vmatmul.mubr.f32.gmra.mrb[6].mxu1 %v592_v33  ;;  %v938_v33 = vld [vmem:[#allocation13 + $0x68] sm:$0xff] }
 0x203   : > { %1568 = vmatpush3.bf16.msra.mxu1 %v1565_v28  ;;  %v1601_v28 = vpack.c.bf16 %v934_v27, %v933_v26  ;;  %p1960_p7 = pnand %p1959_p6, %p1953_p8 }
 0x204   : > { %1570 = vmatprep.subr.bf16.mxu1 %v1569_v34 }
 0x207   : > { %1572 = vmatpush3.bf16.msra.mxu1 %v1569_v34  ;;  %v1609_v34 = vpack.c.bf16 %v938_v33, %v937_v32 }
 0x208   : > { %1574 = vmatprep.subr.bf16.mxu1 %v1573_v40 }
 0x20b   : > { %1576 = vmatpush3.bf16.msra.mxu1 %v1573_v40 }
 0x20c   : > { %1578 = vmatprep.subr.bf16.mxu1 %v1577_v45 }
 0x20f   : > { %1580 = vmatpush3.bf16.msra.mxu1 %v1577_v45 }
 0x210   : > { %1582 = vmatprep.subr.bf16.mxu1 %v1581_v51 }
 0x213   : > { %1584 = vmatpush3.bf16.msra.mxu1 %v1581_v51 }
 0x214   : > { %1617 = vmatprep.subr.bf16.mxu1 %v1585_v54 }
 0x2c9   : > { %v1271_v55 = vpop.f32.mrb[0].mxu1 }
 0x2ca   : > { %v1272_v57 = vpop.f32.mrb[1].mxu1 }
 0x2cb   : > { %v1273_v58 = vadd.f32 %v1272_v57, %v1271_v55 }
 0x2cd   : > { %v693_v60 = vadd.f32 %v1273_v58, %v439_v56  ;;  %v1274_v61 = vpop.f32.mrb[2].mxu1 }
 0x2ce   : > { %v1275_v62 = vpop.f32.mrb[3].mxu1 }
 0x2cf   : > { %v1276_v63 = vadd.f32 %v1275_v62, %v1274_v61  ;;  %v711_v1 = vmul.f32 %v693_v60, %v450_v59 }
 0x2d1   : > { %v698_v5 = vadd.f32 %v1276_v63, %v439_v56  ;;  %v1277_v6 = vpop.f32.mrb[4].mxu1  ;;  %1375 = vmatprep.mubr.f32.mxu0 %v711_v1  ;;  %1413 = vmatprep.mubr.f32.mxu1 %v711_v1 }
 0x2d2   : > { %v1278_v7 = vpop.f32.mrb[5].mxu1 }
 0x2d3   : > { %v712_v8 = vmul.f32 %v698_v5, %v451_v2  ;;  %v1279_v9 = vadd.f32 %v1278_v7, %v1277_v6 }
 0x2d5   : > { %v703_v14 = vadd.f32 %v1279_v9, %v439_v56  ;;  %v1280_v15 = vpop.f32.mrb[6].mxu1  ;;  %1376 = vmatmul.mubr.f32.vlgmr.msra.gmra.mrb[8].mxu0 %v712_v8  ;;  %1414 = vmatmul.mubr.f32.vlgmr.msra.gmra.mrb[8].mxu1 %v712_v8  ;;  %v442_v9 = vld [vmem:[%s2496_s7 + $0x3] ss:$0 sm:$0xff] }
 0x2d6   : > { %v1281_v16 = vpop.f32.mrb[7].mxu1  ;;  %1588 = vmatpush3.bf16.msra.mxu0 %v1585_v54  ;;  %1625 = vmatpush3.bf16.msra.mxu1 %v1585_v54 }
 0x2d7   : > { %v1282_v17 = vadd.f32 %v1281_v16, %v1280_v15  ;;  %v713_v18 = vmul.f32 %v703_v14, %v452_v11  ;;  %1590 = vmatprep.subr.bf16.mxu0 %v1589_v10  ;;  %1618 = vmatprep.subr.bf16.mxu1 %v1589_v10 }
 0x2d9   : > { %v708_v23 = vadd.f32 %v1282_v17, %v439_v56  ;;  %1378 = vmatprep.mubr.f32.mxu0 %v713_v18  ;;  %1416 = vmatprep.mubr.f32.mxu1 %v713_v18 }
 0x2da   : > { %1592 = vmatpush3.bf16.msra.mxu0 %v1589_v10  ;;  %1626 = vmatpush3.bf16.msra.mxu1 %v1589_v10 }
 0x2db   : > { %v714_v24 = vmul.f32 %v708_v23, %v453_v20  ;;  %1594 = vmatprep.subr.bf16.mxu0 %v1593_v19  ;;  %1619 = vmatprep.subr.bf16.mxu1 %v1593_v19 }
 0x2dd   : > { %1379 = vmatmul.mubr.f32.gmra.mrb[10].mxu0 %v714_v24  ;;  %1417 = vmatmul.mubr.f32.gmra.mrb[10].mxu1 %v714_v24 }
 0x2de   : > { %1596 = vmatpush3.bf16.msra.mxu0 %v1593_v19  ;;  %1627 = vmatpush3.bf16.msra.mxu1 %v1593_v19 }
 0x2df   : > { %1598 = vmatprep.subr.bf16.mxu0 %v1597_v25  ;;  %1620 = vmatprep.subr.bf16.mxu1 %v1597_v25 }
 0x2e2   : > { %1600 = vmatpush3.bf16.msra.mxu0 %v1597_v25  ;;  %1628 = vmatpush3.bf16.msra.mxu1 %v1597_v25 }
 0x2e3   : > { %1602 = vmatprep.subr.bf16.mxu0 %v1601_v28  ;;  %1621 = vmatprep.subr.bf16.mxu1 %v1601_v28 }
 0x2e6   : > { %1604 = vmatpush3.bf16.msra.mxu0 %v1601_v28  ;;  %1629 = vmatpush3.bf16.msra.mxu1 %v1601_v28 }
 0x2e7   : > { %1606 = vmatprep.subr.bf16.mxu0 %v1605_v31  ;;  %1622 = vmatprep.subr.bf16.mxu1 %v1605_v31 }
 0x2ea   : > { %1608 = vmatpush3.bf16.msra.mxu0 %v1605_v31  ;;  %1630 = vmatpush3.bf16.msra.mxu1 %v1605_v31 }
 0x2eb   : > { %1610 = vmatprep.subr.bf16.mxu0 %v1609_v34  ;;  %1623 = vmatprep.subr.bf16.mxu1 %v1609_v34 }
 0x2ee   : > { %1612 = vmatpush3.bf16.msra.mxu0 %v1609_v34  ;;  %1631 = vmatpush3.bf16.msra.mxu1 %v1609_v34 }
 0x2ef   : > { %1614 = vmatprep.subr.bf16.mxu0 %v1613_v37  ;;  %1624 = vmatprep.subr.bf16.mxu1 %v1613_v37 }
 0x2f2   : > { %1616 = vmatpush3.bf16.msra.mxu0 %v1613_v37  ;;  %1632 = vmatpush3.bf16.msra.mxu1 %v1613_v37 }
 0x3a8   : > { %v1377_v40 = vpop.f32.mrb[8].mxu0  ;;  %v1415_v41 = vpop.f32.mrb[8].mxu1 }
 0x3a9   : > { %v803_v42 = vadd.f32 %v1377_v40, %v440_v38  ;;  %v904_v0 = vadd.f32 %v1415_v41, %v441_v39  ;;  %v797_v43 = vpop.f32.mrb[9].mxu0  ;;  %v898_v44 = vpop.f32.mrb[9].mxu1 }
 0x3aa   : > { %v798_v45 = vadd.f32 %v797_v43, %v440_v38  ;;  %v899_v46 = vadd.f32 %v898_v44, %v441_v39 }
 0x3ab   : > { %v918_v47 = vsub.f32 %v803_v42, %v904_v0 }
 0x3ac   : > { %v917_v48 = vsub.f32 %v798_v45, %v899_v46 }
 0x3ad   : > { %v922_v50 = vmul.f32 %v918_v47, %v918_v47 }
 0x3ae   : > { %v921_v49 = vmul.f32 %v917_v48, %v917_v48 }
 0x3b0   : > { %v1380_v51 = vpop.f32.mrb[10].mxu0  ;;  %v1418_v52 = vpop.f32.mrb[10].mxu1  ;;  %1451 = vmatprep.mubr.f32.mxu0 %v921_v49 }
 0x3b1   : > { %v813_v53 = vadd.f32 %v1380_v51, %v440_v38  ;;  %v914_v54 = vadd.f32 %v1418_v52, %v441_v39  ;;  %v807_v55 = vpop.f32.mrb[11].mxu0  ;;  %v908_v56 = vpop.f32.mrb[11].mxu1  ;;  %1452 = vmatmul.mubr.f32.vlgmr.msra.gmra.mrb[12].mxu0 %v922_v50 }
 0x3b2   : > { %v808_v57 = vadd.f32 %v807_v55, %v440_v38  ;;  %v909_v58 = vadd.f32 %v908_v56, %v441_v39 }
 0x3b3   : > { %v920_v59 = vsub.f32 %v813_v53, %v914_v54 }
 0x3b4   : > { %v919_v60 = vsub.f32 %v808_v57, %v909_v58 }
 0x3b5   : > { %v924_v62 = vmul.f32 %v920_v59, %v920_v59 }
 0x3b6   : > { %v923_v61 = vmul.f32 %v919_v60, %v919_v60 }
 0x3b8   : > { %1454 = vmatprep.mubr.f32.mxu1 %v923_v61 }
 0x3b9   : > { %1455 = vmatmul.mubr.f32.vlgmr.msra.gmra.mrb[12].mxu1 %v924_v62 }
 0x484   : > { %v1453_v63 = vpop.f32.mrb[12].mxu0 }
 0x485   : > { %v1013_v1 = vadd.f32 1e-05, %v1453_v63  ;;  %v1007_v2 = vpop.f32.mrb[13].mxu0 }
 0x486   : > { %v1008_v3 = vadd.f32 1e-05, %v1007_v2 }
 0x487   : > { %1742 = vrsqrt.f32 %v1013_v1 }
 0x488   : > { %1744 = vrsqrt.f32 %v1008_v3 }
 0x48c   : > { %v1456_v4 = vpop.f32.mrb[12].mxu1 }
 0x48d   : > { %v1023_v5 = vadd.f32 1e-05, %v1456_v4  ;;  %v1017_v6 = vpop.f32.mrb[13].mxu1 }
 0x48e   : > { %v1018_v7 = vadd.f32 1e-05, %v1017_v6 }
 0x48f   : > { %1746 = vrsqrt.f32 %v1023_v5 }
 0x490   : > { %1748 = vrsqrt.f32 %v1018_v7 }
 0x491   : > { %v1743_v8 = vpop.eup %1742 }
 0x492   : > { %v1745_v10 = vpop.eup %1744  ;;  %v1031_v11 = vmul.f32 %v1743_v8, %v918_v47 }
 0x493   : > { %v1030_v13 = vmul.f32 %v1745_v10, %v917_v48 }
 0x494   : > { %v1035_v14 = vmul.f32 %v1031_v11, %v442_v9 }
 0x495   : > { %v1034_v15 = vmul.f32 %v1030_v13, %v442_v9 }
 0x496   : > { %v1039_v16 = vadd.f32 %v1035_v14, %v443_v12 }
 0x497   : > { %v1038_v17 = vadd.f32 %v1034_v15, %v443_v12 }
 0x498   : > { %v1043_v18 = vmax.f32 %v1039_v16, 0.0 }
 0x499   : > { %v1747_v19 = vpop.eup %1746  ;;  %v1042_v20 = vmax.f32 %v1038_v17, 0.0 }
 0x49a   : > { %v1749_v21 = vpop.eup %1748  ;;  %1047 = vst [vmem:[%s435_s0 + $0x8] sm:$0xff] %v1043_v18  ;;  %v1033_v22 = vmul.f32 %v1747_v19, %v920_v59 }
 0x49b   : > { %1046 = vst [vmem:[%s435_s0] sm:$0xff] %v1042_v20  ;;  %v1032_v23 = vmul.f32 %v1749_v21, %v919_v60 }
 0x49c   : > { %v1037_v24 = vmul.f32 %v1033_v22, %v442_v9 }
 0x49d   : > { %v1036_v25 = vmul.f32 %v1032_v23, %v442_v9 }
 0x49e   : > { %v1041_v26 = vadd.f32 %v1037_v24, %v443_v12 }
 0x49f   : > { %v1040_v27 = vadd.f32 %v1036_v25, %v443_v12 }
 0x4a0   : > { %v1045_v28 = vmax.f32 %v1041_v26, 0.0 }
 0x4a1   : > { %v1044_v29 = vmax.f32 %v1040_v27, 0.0 }
 0x4a2   : > { %1049 = vst [vmem:[%s435_s0 + $0x18] sm:$0xff] %v1045_v28 }
 0x4a3   : > { %1048 = vst [vmem:[%s435_s0 + $0x10] sm:$0xff] %v1044_v29 }
 0x4a4   : > { %1963 = shalt.err (!%p1960_p7)
}
 0x4a5   : > { %s1964_s16 = scalar_lea.hbm %s2444_s4, 512  ;;  %s1968_s3 = scalar_lea.hbm %s2497_s8, 2048 }
 0x4a6   : > { %p1965_p9 = scmp.ne.s32.totalorder %s2444_s4, %s1964_s16  ;;  %p1969_p1 = scmp.lt.u32.totalorder %s2444_s4, %s2497_s8 }
 0x4a7   : > { %p1970_p11 = scmp.lt.u32.totalorder %s1968_s3, %s1964_s16  ;;  %p1972_p2 = scmp.lt.u32.totalorder %s1964_s16, %s2444_s4 }
 0x4a8   : > { %p1966_p3 = pnand %p1965_p9, %p2535_p13 }
 0x4a9   : > { %p1971_p12 = por %p1970_p11, %p1969_p1 }
 0x4aa   : > { %p1967_p10 = pneg %p1966_p3 }
 0x4ab   : > { %p1973_p5 = por %p1972_p2, %p1971_p12 }
 0x4ad   : > { %p1974_p8 = pnand %p1973_p5, %p1967_p10 }
 0x4af   : > { %1977 = shalt.err (!%p1974_p8)
}
 0x4b0   : > { %s2047_s25 = smov 128   ;;  %s2048_s19 = smov 8  }
 0x4b1   : > { %1657 = dma.vmem_to_hbm [thread:$0]  (%p2535_p13), %s2446_s13, 512, %s2444_s4, %s1051_s14, %s2047_s25, %s2047_s25, %s2048_s19  }
 0x4b2 PF: > { %p1697_p0 = scmp.ge.s32.totalorder %s2032_s30, 2  ;;  %s1079_s15 = sand.u32 1, %s2020_s27  }
 0x4b3   : > { %p2536_p4 = scmp.ne.s32.totalorder %s2523_s24, 0  ;;  %s1080_s0 = scalar_lea.sflag [#allocation4], %s1079_s15 }
 0x4b5   : > { %p1683_p6 = pnand %p1697_p0, %p2536_p4 }
 0x4b7   : > { %2015 = dma.done.wait (!%p1683_p6), %s1080_s0, 512  }
 0x4b8   : > { %2017 = vsyncadd (!%p1683_p6), %s1080_s0, 4294966784  ;;  %s2537_s2 = sld [smem:[#allocation21_spill]]  ;;  %p26_p7 = scmp.ge.s32.totalorder %s2259_s23, 6  }
 0x4b9   : > { %s2538_s27 = smov %s2024_s28  ;;  %s2539_s28 = smov %s2028_s29 }
 0x4ba   : > { %s2541_s30 = smov %s2259_s23  ;;  %28 = sbr.rel (!%p26_p7) target bundleno = 16 (0x10), region = 131 }
 0x4be   : > { %s2540_s29 = smov %s2537_s2 }
 0x4c1   :  { %1085 = vsyncpa [#allocation3], 1 }
 0x4c2   :  { %1087 = vsyncpa [#allocation3 + $0x1], 1 }
 0x4c3   :  { %1088 = vsyncpa [#allocation6], 1 }
 0x4c4   :  { %1090 = vsyncpa [#allocation6 + $0x1], 1 }
 0x4c5   :  { %1091 = vsyncpa [#allocation9], 1 }
 0x4c6   :  { %1092 = vsyncpa [#allocation12], 1 }
 0x4c7   :  { %1093 = vsyncpa [#allocation4], 1 }
 0x4c8   :  { %1095 = vsyncpa [#allocation4 + $0x1], 1 }

</bundles_post_ra>
